<compile_context>
chip_gen: v6e
topology: v6e:2x2x1
jax: 0.10.0
libtpu: 0.0.40
codegen_flags: <defaults>
</compile_context>

<pallas_src>
import functools

import jax
import jax.numpy as jnp
import numpy as np
from jax import lax
from jax.experimental import pallas as pl
from jax.experimental.pallas import tpu as pltpu


def _round_up(v, m):
    return (v + m - 1) // m * m


def _shift_lanes(x, d):
    """y[:, r] = x[:, (r + d) % NP]  (static circular lane shift).

    Wrap-around only ever lands on non-interior (padding) lanes, which are
    masked back to zero after every layer, so the shift is exact wherever it
    matters.  Written as two lane slices + concat (equivalent to a lane roll)
    to keep the semantics explicit.
    """
    if d == 0:
        return x
    n = x.shape[-1]
    s = d % n
    return jnp.concatenate([x[:, s:], x[:, :s]], axis=-1)


def _conv3x3_layer(p, w_ref, b_ref, row_stride, *, relu, mask):
    """One 3x3 / stride 1 / pad 1 conv on padded-flattened activations.

    p      : (Cin, NP) f32 value; channels on sublanes, padded pixels on lanes;
             every non-interior lane is exactly zero.
    w_ref  : (3, Cout, 3*Cin) ref with w_ref[kh][co, kw*Cin + c] = w_hwio[kh, kw, c, co]
    b_ref  : (Cout, 1) ref
    returns: (Cout, NP) f32 (border lanes re-zeroed via `mask` when given).
    """
    cin, npx = p.shape
    cout = w_ref.shape[1]
    # kw-grouped operand: rows = [p shifted by -1 ; p ; p shifted by +1]
    # -> one matmul per kh with contraction depth K = 3*Cin.
    p3 = jnp.concatenate(
        [_shift_lanes(p, -1), p, _shift_lanes(p, 1)], axis=0)     # (3*Cin, NP)
    shift_input = (3 * cin) <= cout  # shift whichever side is smaller
    acc = jnp.zeros((cout, npx), jnp.float32)
    for kh in range(3):
        dh = (kh - 1) * row_stride
        w_kh = w_ref[kh]                                          # (Cout, 3*Cin)
        if shift_input:
            m = jnp.dot(w_kh, _shift_lanes(p3, dh),
                        preferred_element_type=jnp.float32)
        else:
            m = _shift_lanes(
                jnp.dot(w_kh, p3, preferred_element_type=jnp.float32), dh)
        acc = acc + m
    acc = acc + b_ref[...]
    if relu:
        acc = jnp.maximum(acc, 0.0)
    if mask is not None:
        acc = acc * mask          # keep the zero-padding ring exactly zero
    return acc


def _conv_block_kernel(x_ref, mask_ref, w1_ref, b1_ref, w2_ref, b2_ref,
                       w3_ref, b3_ref, w4_ref, b4_ref, o_ref, p0_ref, *, h, w):
    rs = w + 2                                   # padded row stride
    cin = x_ref.shape[1]
    mask = mask_ref[...]                         # (1, NP), 1.0 on interior px

    # ---- layer-0 input: zero-pad inside the kernel --------------------------
    p0_ref[...] = jnp.zeros_like(p0_ref)         # (Cin_pad, NP), borders stay 0
    x2 = x_ref[0]                                # (Cin, H*W): NCHW is row-major
    for i in range(h):
        dst = (i + 1) * rs + 1
        p0_ref[:cin, dst:dst + w] = x2[:, i * w:(i + 1) * w]

    # ---- four fused conv layers; activations stay in VMEM -------------------
    p = p0_ref[...]
    p = _conv3x3_layer(p, w1_ref, b1_ref, rs, relu=True, mask=mask)
    p = _conv3x3_layer(p, w2_ref, b2_ref, rs, relu=True, mask=mask)
    p = _conv3x3_layer(p, w3_ref, b3_ref, rs, relu=True, mask=mask)
    p = _conv3x3_layer(p, w4_ref, b4_ref, rs, relu=False, mask=None)

    # ---- gather interior pixels into a lane-dense (1, H*W) output row -------
    # (only channel 0 is real; channels 1..7 are zero-padding of Cout=1)
    for i in range(h):
        src = (i + 1) * rs + 1
        o_ref[0, :, i * w:(i + 1) * w] = p[0:1, src:src + w].astype(o_ref.dtype)


def _prep_layer(w_hwio, b):
    """HWIO (3,3,Cin,Cout) -> kh-grouped (3, Cout_p, 3*Cin_p) + bias (Cout_p, 1).

    Cin/Cout are zero-padded to multiples of 8 so every sublane concat and
    matmul tile in the kernel is aligned; padded channels stay exactly zero
    through the network (zero weights + zero bias + ReLU/mask).
    """
    kh, kw, cin, cout = w_hwio.shape
    cin_p, cout_p = _round_up(cin, 8), _round_up(cout, 8)
    w_hwio = jnp.pad(w_hwio, ((0, 0), (0, 0), (0, cin_p - cin), (0, cout_p - cout)))
    b = jnp.pad(b, ((0, cout_p - cout),))
    wg = jnp.transpose(w_hwio, (0, 3, 1, 2)).reshape(kh, cout_p, kw * cin_p)
    return wg, b.reshape(cout_p, 1)


def conv_block_small(x_nchw, params):
    """Forward pass of ConvBlockSmall; input/output in NCHW (PyTorch layout)."""
    n, cin, h, w = x_nchw.shape
    rs = w + 2
    npx = _round_up((h + 2) * rs, 128)           # lane-padded flat pixel count
    cin_p = _round_up(cin, 8)

    # interior-pixel mask in padded-flat lane coordinates (tiny constant)
    r = np.arange(npx)
    ii, jj = r // rs, r % rs
    interior = (ii >= 1) & (ii <= h) & (jj >= 1) & (jj <= w)
    mask = jnp.asarray(interior.reshape(1, npx), dtype=jnp.float32)

    (w1, b1), (w2, b2), (w3, b3), (w4, b4) = [_prep_layer(wi, bi)
                                              for wi, bi in params]
    x_flat = x_nchw.reshape(n, cin, h * w)       # free: NCHW is row-major

    kernel = functools.partial(_conv_block_kernel, h=h, w=w)
    out = pl.pallas_call(
        kernel,
        out_shape=jax.ShapeDtypeStruct((n, 1, h * w), x_nchw.dtype),
        grid_spec=pltpu.PrefetchScalarGridSpec(
            num_scalar_prefetch=0,
            grid=(n,),
            in_specs=[
                pl.BlockSpec((1, cin, h * w), lambda b: (b, 0, 0)),
                pl.BlockSpec(mask.shape, lambda b: (0, 0)),
                pl.BlockSpec(w1.shape, lambda b: (0, 0, 0)),
                pl.BlockSpec(b1.shape, lambda b: (0, 0)),
                pl.BlockSpec(w2.shape, lambda b: (0, 0, 0)),
                pl.BlockSpec(b2.shape, lambda b: (0, 0)),
                pl.BlockSpec(w3.shape, lambda b: (0, 0, 0)),
                pl.BlockSpec(b3.shape, lambda b: (0, 0)),
                pl.BlockSpec(w4.shape, lambda b: (0, 0, 0)),
                pl.BlockSpec(b4.shape, lambda b: (0, 0)),
            ],
            out_specs=pl.BlockSpec((1, 1, h * w), lambda b: (b, 0, 0)),
            scratch_shapes=[pltpu.VMEM((cin_p, npx), jnp.float32)],
        ),
        compiler_params=pltpu.CompilerParams(
            dimension_semantics=("parallel",)),
    )(x_flat, mask, w1, b1, w2, b2, w3, b3, w4, b4)
    return out.reshape(n, 1, h, w)               # free bitcast: Cout == 1


def init_conv_params(key, cin, cout):
    """Deterministic synthetic init (shapes match nn.Conv2d(cin, cout, 3, padding=1))."""
    kw_, kb = jax.random.split(key)
    fan_in = cin * 9
    bound = 1.0 / jnp.sqrt(fan_in)
    w = jax.random.uniform(kw_, (3, 3, cin, cout), jnp.float32, -bound, bound)
    b = jax.random.uniform(kb, (cout,), jnp.float32, -bound, bound)
    return w, b


def _reference(x_nchw, params):
    """Pure-JAX reference (lax conv) for validation."""
    x = x_nchw
    dn = lax.conv_dimension_numbers(x.shape, (1, 1, 3, 3), ("NCHW", "OIHW", "NCHW"))
    for i, (w, b) in enumerate(params):
        w_oihw = jnp.transpose(w, (3, 2, 0, 1))  # HWIO -> OIHW
        x = lax.conv_general_dilated(x, w_oihw, (1, 1), ((1, 1), (1, 1)),
                                     dimension_numbers=dn)
        x = x + b[None, :, None, None]
        if i < 3:
            x = jnp.maximum(x, 0.0)
    return x


if __name__ == "__main__":
    key = jax.random.PRNGKey(0)
    k_x, k1, k2, k3, k4 = jax.random.split(key, 5)

    in_channels = 4
    in_layers = 32
    N, H, W = 2, 16, 16

    x = jax.random.normal(k_x, (N, in_channels, H, W), jnp.float32)
    params = (
        init_conv_params(k1, in_channels, in_layers),
        init_conv_params(k2, in_layers, in_layers * 2),
        init_conv_params(k3, in_layers * 2, in_layers),
        init_conv_params(k4, in_layers, 1),
    )

    out = jax.jit(conv_block_small)(x, params)
    out = jax.block_until_ready(out)

    ref = _reference(x, params)
    assert out.shape == (N, 1, H, W)
    assert jnp.allclose(out, ref, atol=1e-4, rtol=1e-4)
    print("KERNEL_OK")
</pallas_src>

<mosaic_0001>
module attributes {stable_mosaic.version = 11 : i64} {
  func.func @_conv_block_kernel(%arg0: i32, %arg1: memref<1x4x256xf32, #tpu.memory_space<vmem>>, %arg2: memref<1x384xf32, #tpu.memory_space<vmem>>, %arg3: memref<3x32x24xf32, #tpu.memory_space<vmem>>, %arg4: memref<32x1xf32, #tpu.memory_space<vmem>>, %arg5: memref<3x64x96xf32, #tpu.memory_space<vmem>>, %arg6: memref<64x1xf32, #tpu.memory_space<vmem>>, %arg7: memref<3x32x192xf32, #tpu.memory_space<vmem>>, %arg8: memref<32x1xf32, #tpu.memory_space<vmem>>, %arg9: memref<3x8x96xf32, #tpu.memory_space<vmem>>, %arg10: memref<8x1xf32, #tpu.memory_space<vmem>>, %arg11: memref<1x1x256xf32, #tpu.memory_space<vmem>>, %arg12: memref<8x384xf32, #tpu.memory_space<vmem>>) attributes {dimension_semantics = [#tpu.dimension_semantics<parallel>], iteration_bounds = array<i64: 2>, scalar_prefetch = 0 : i64, scratch_operands = 1 : i64, tpu.core_type = #tpu.core_type<tc>, window_params = [{transform_indices = @transform_0, window_bounds = array<i64: 1, 4, 256>}, {pipeline_mode = #tpu.pipeline_mode<synchronous>, transform_indices = @transform_1, window_bounds = array<i64: 1, 384>}, {pipeline_mode = #tpu.pipeline_mode<synchronous>, transform_indices = @transform_2, window_bounds = array<i64: 3, 32, 24>}, {pipeline_mode = #tpu.pipeline_mode<synchronous>, transform_indices = @transform_3, window_bounds = array<i64: 32, 1>}, {pipeline_mode = #tpu.pipeline_mode<synchronous>, transform_indices = @transform_4, window_bounds = array<i64: 3, 64, 96>}, {pipeline_mode = #tpu.pipeline_mode<synchronous>, transform_indices = @transform_5, window_bounds = array<i64: 64, 1>}, {pipeline_mode = #tpu.pipeline_mode<synchronous>, transform_indices = @transform_6, window_bounds = array<i64: 3, 32, 192>}, {pipeline_mode = #tpu.pipeline_mode<synchronous>, transform_indices = @transform_7, window_bounds = array<i64: 32, 1>}, {pipeline_mode = #tpu.pipeline_mode<synchronous>, transform_indices = @transform_8, window_bounds = array<i64: 3, 8, 96>}, {pipeline_mode = #tpu.pipeline_mode<synchronous>, transform_indices = @transform_9, window_bounds = array<i64: 8, 1>}, {transform_indices = @transform_10, window_bounds = array<i64: 1, 1, 256>}]} {
    %c0 = arith.constant 0 : index
    %c0_0 = arith.constant 0 : index
    %0 = vector.load %arg2[%c0, %c0_0] : memref<1x384xf32, #tpu.memory_space<vmem>>, vector<1x384xf32>
    %cst = arith.constant 0.000000e+00 : f32
    %1 = vector.broadcast %cst : f32 to vector<8x384xf32>
    %c0_1 = arith.constant 0 : index
    %c0_2 = arith.constant 0 : index
    %2 = vector.load %arg12[%c0_1, %c0_2] : memref<8x384xf32, #tpu.memory_space<vmem>>, vector<8x384xf32>
    tpu.vector_store %arg12[%c0_1, %c0_2], %1 {strides = array<i32>} : memref<8x384xf32, #tpu.memory_space<vmem>>, vector<8x384xf32>,
    %c0_3 = arith.constant 0 : index
    %c0_4 = arith.constant 0 : index
    %c0_5 = arith.constant 0 : index
    %3 = vector.load %arg1[%c0_3, %c0_4, %c0_5] : memref<1x4x256xf32, #tpu.memory_space<vmem>>, vector<1x4x256xf32>
    %4 = vector.shape_cast %3 : vector<1x4x256xf32> to vector<4x256xf32>
    %5 = vector.extract_strided_slice %4 {offsets = [0, 0], sizes = [4, 16], strides = [1, 1]} : vector<4x256xf32> to vector<4x16xf32>
    %c0_6 = arith.constant 0 : index
    %c19 = arith.constant 19 : index
    %6 = vector.load %arg12[%c0_6, %c19] : memref<8x384xf32, #tpu.memory_space<vmem>>, vector<4x16xf32>
    tpu.vector_store %arg12[%c0_6, %c19], %5 {strides = array<i32>} : memref<8x384xf32, #tpu.memory_space<vmem>>, vector<4x16xf32>,
    %7 = vector.extract_strided_slice %4 {offsets = [0, 16], sizes = [4, 16], strides = [1, 1]} : vector<4x256xf32> to vector<4x16xf32>
    %c0_7 = arith.constant 0 : index
    %c37 = arith.constant 37 : index
    %8 = vector.load %arg12[%c0_7, %c37] : memref<8x384xf32, #tpu.memory_space<vmem>>, vector<4x16xf32>
    tpu.vector_store %arg12[%c0_7, %c37], %7 {strides = array<i32>} : memref<8x384xf32, #tpu.memory_space<vmem>>, vector<4x16xf32>,
    %9 = vector.extract_strided_slice %4 {offsets = [0, 32], sizes = [4, 16], strides = [1, 1]} : vector<4x256xf32> to vector<4x16xf32>
    %c0_8 = arith.constant 0 : index
    %c55 = arith.constant 55 : index
    %10 = vector.load %arg12[%c0_8, %c55] : memref<8x384xf32, #tpu.memory_space<vmem>>, vector<4x16xf32>
    tpu.vector_store %arg12[%c0_8, %c55], %9 {strides = array<i32>} : memref<8x384xf32, #tpu.memory_space<vmem>>, vector<4x16xf32>,
    %11 = vector.extract_strided_slice %4 {offsets = [0, 48], sizes = [4, 16], strides = [1, 1]} : vector<4x256xf32> to vector<4x16xf32>
    %c0_9 = arith.constant 0 : index
    %c73 = arith.constant 73 : index
    %12 = vector.load %arg12[%c0_9, %c73] : memref<8x384xf32, #tpu.memory_space<vmem>>, vector<4x16xf32>
    tpu.vector_store %arg12[%c0_9, %c73], %11 {strides = array<i32>} : memref<8x384xf32, #tpu.memory_space<vmem>>, vector<4x16xf32>,
    %13 = vector.extract_strided_slice %4 {offsets = [0, 64], sizes = [4, 16], strides = [1, 1]} : vector<4x256xf32> to vector<4x16xf32>
    %c0_10 = arith.constant 0 : index
    %c91 = arith.constant 91 : index
    %14 = vector.load %arg12[%c0_10, %c91] : memref<8x384xf32, #tpu.memory_space<vmem>>, vector<4x16xf32>
    tpu.vector_store %arg12[%c0_10, %c91], %13 {strides = array<i32>} : memref<8x384xf32, #tpu.memory_space<vmem>>, vector<4x16xf32>,
    %15 = vector.extract_strided_slice %4 {offsets = [0, 80], sizes = [4, 16], strides = [1, 1]} : vector<4x256xf32> to vector<4x16xf32>
    %c0_11 = arith.constant 0 : index
    %c109 = arith.constant 109 : index
    %16 = vector.load %arg12[%c0_11, %c109] : memref<8x384xf32, #tpu.memory_space<vmem>>, vector<4x16xf32>
    tpu.vector_store %arg12[%c0_11, %c109], %15 {strides = array<i32>} : memref<8x384xf32, #tpu.memory_space<vmem>>, vector<4x16xf32>,
    %17 = vector.extract_strided_slice %4 {offsets = [0, 96], sizes = [4, 16], strides = [1, 1]} : vector<4x256xf32> to vector<4x16xf32>
    %c0_12 = arith.constant 0 : index
    %c127 = arith.constant 127 : index
    %18 = vector.load %arg12[%c0_12, %c127] : memref<8x384xf32, #tpu.memory_space<vmem>>, vector<4x16xf32>
    tpu.vector_store %arg12[%c0_12, %c127], %17 {strides = array<i32>} : memref<8x384xf32, #tpu.memory_space<vmem>>, vector<4x16xf32>,
    %19 = vector.extract_strided_slice %4 {offsets = [0, 112], sizes = [4, 16], strides = [1, 1]} : vector<4x256xf32> to vector<4x16xf32>
    %c0_13 = arith.constant 0 : index
    %c145 = arith.constant 145 : index
    %20 = vector.load %arg12[%c0_13, %c145] : memref<8x384xf32, #tpu.memory_space<vmem>>, vector<4x16xf32>
    tpu.vector_store %arg12[%c0_13, %c145], %19 {strides = array<i32>} : memref<8x384xf32, #tpu.memory_space<vmem>>, vector<4x16xf32>,
    %21 = vector.extract_strided_slice %4 {offsets = [0, 128], sizes = [4, 16], strides = [1, 1]} : vector<4x256xf32> to vector<4x16xf32>
    %c0_14 = arith.constant 0 : index
    %c163 = arith.constant 163 : index
    %22 = vector.load %arg12[%c0_14, %c163] : memref<8x384xf32, #tpu.memory_space<vmem>>, vector<4x16xf32>
    tpu.vector_store %arg12[%c0_14, %c163], %21 {strides = array<i32>} : memref<8x384xf32, #tpu.memory_space<vmem>>, vector<4x16xf32>,
    %23 = vector.extract_strided_slice %4 {offsets = [0, 144], sizes = [4, 16], strides = [1, 1]} : vector<4x256xf32> to vector<4x16xf32>
    %c0_15 = arith.constant 0 : index
    %c181 = arith.constant 181 : index
    %24 = vector.load %arg12[%c0_15, %c181] : memref<8x384xf32, #tpu.memory_space<vmem>>, vector<4x16xf32>
    tpu.vector_store %arg12[%c0_15, %c181], %23 {strides = array<i32>} : memref<8x384xf32, #tpu.memory_space<vmem>>, vector<4x16xf32>,
    %25 = vector.extract_strided_slice %4 {offsets = [0, 160], sizes = [4, 16], strides = [1, 1]} : vector<4x256xf32> to vector<4x16xf32>
    %c0_16 = arith.constant 0 : index
    %c199 = arith.constant 199 : index
    %26 = vector.load %arg12[%c0_16, %c199] : memref<8x384xf32, #tpu.memory_space<vmem>>, vector<4x16xf32>
    tpu.vector_store %arg12[%c0_16, %c199], %25 {strides = array<i32>} : memref<8x384xf32, #tpu.memory_space<vmem>>, vector<4x16xf32>,
    %27 = vector.extract_strided_slice %4 {offsets = [0, 176], sizes = [4, 16], strides = [1, 1]} : vector<4x256xf32> to vector<4x16xf32>
    %c0_17 = arith.constant 0 : index
    %c217 = arith.constant 217 : index
    %28 = vector.load %arg12[%c0_17, %c217] : memref<8x384xf32, #tpu.memory_space<vmem>>, vector<4x16xf32>
    tpu.vector_store %arg12[%c0_17, %c217], %27 {strides = array<i32>} : memref<8x384xf32, #tpu.memory_space<vmem>>, vector<4x16xf32>,
    %29 = vector.extract_strided_slice %4 {offsets = [0, 192], sizes = [4, 16], strides = [1, 1]} : vector<4x256xf32> to vector<4x16xf32>
    %c0_18 = arith.constant 0 : index
    %c235 = arith.constant 235 : index
    %30 = vector.load %arg12[%c0_18, %c235] : memref<8x384xf32, #tpu.memory_space<vmem>>, vector<4x16xf32>
    tpu.vector_store %arg12[%c0_18, %c235], %29 {strides = array<i32>} : memref<8x384xf32, #tpu.memory_space<vmem>>, vector<4x16xf32>,
    %31 = vector.extract_strided_slice %4 {offsets = [0, 208], sizes = [4, 16], strides = [1, 1]} : vector<4x256xf32> to vector<4x16xf32>
    %c0_19 = arith.constant 0 : index
    %c253 = arith.constant 253 : index
    %32 = vector.load %arg12[%c0_19, %c253] : memref<8x384xf32, #tpu.memory_space<vmem>>, vector<4x16xf32>
    tpu.vector_store %arg12[%c0_19, %c253], %31 {strides = array<i32>} : memref<8x384xf32, #tpu.memory_space<vmem>>, vector<4x16xf32>,
    %33 = vector.extract_strided_slice %4 {offsets = [0, 224], sizes = [4, 16], strides = [1, 1]} : vector<4x256xf32> to vector<4x16xf32>
    %c0_20 = arith.constant 0 : index
    %c271 = arith.constant 271 : index
    %34 = vector.load %arg12[%c0_20, %c271] : memref<8x384xf32, #tpu.memory_space<vmem>>, vector<4x16xf32>
    tpu.vector_store %arg12[%c0_20, %c271], %33 {strides = array<i32>} : memref<8x384xf32, #tpu.memory_space<vmem>>, vector<4x16xf32>,
    %35 = vector.extract_strided_slice %4 {offsets = [0, 240], sizes = [4, 16], strides = [1, 1]} : vector<4x256xf32> to vector<4x16xf32>
    %c0_21 = arith.constant 0 : index
    %c289 = arith.constant 289 : index
    %36 = vector.load %arg12[%c0_21, %c289] : memref<8x384xf32, #tpu.memory_space<vmem>>, vector<4x16xf32>
    tpu.vector_store %arg12[%c0_21, %c289], %35 {strides = array<i32>} : memref<8x384xf32, #tpu.memory_space<vmem>>, vector<4x16xf32>,
    %c0_22 = arith.constant 0 : index
    %c0_23 = arith.constant 0 : index
    %37 = vector.load %arg12[%c0_22, %c0_23] : memref<8x384xf32, #tpu.memory_space<vmem>>, vector<8x384xf32>
    %38 = vector.extract_strided_slice %37 {offsets = [0, 383], sizes = [8, 1], strides = [1, 1]} : vector<8x384xf32> to vector<8x1xf32>
    %39 = vector.extract_strided_slice %37 {offsets = [0, 0], sizes = [8, 383], strides = [1, 1]} : vector<8x384xf32> to vector<8x383xf32>
    %40 = tpu.concatenate %38, %39 in 1 : vector<8x1xf32>, vector<8x383xf32> -> vector<8x384xf32>
    %41 = vector.extract_strided_slice %37 {offsets = [0, 1], sizes = [8, 383], strides = [1, 1]} : vector<8x384xf32> to vector<8x383xf32>
    %42 = vector.extract_strided_slice %37 {offsets = [0, 0], sizes = [8, 1], strides = [1, 1]} : vector<8x384xf32> to vector<8x1xf32>
    %43 = tpu.concatenate %41, %42 in 1 : vector<8x383xf32>, vector<8x1xf32> -> vector<8x384xf32>
    %44 = tpu.concatenate %40, %37, %43 in 0 : vector<8x384xf32>, vector<8x384xf32>, vector<8x384xf32> -> vector<24x384xf32>
    %cst_24 = arith.constant 0.000000e+00 : f32
    %45 = vector.broadcast %cst_24 : f32 to vector<32x384xf32>
    %c0_25 = arith.constant 0 : index
    %c0_26 = arith.constant 0 : index
    %c0_27 = arith.constant 0 : index
    %46 = vector.load %arg3[%c0_25, %c0_26, %c0_27] : memref<3x32x24xf32, #tpu.memory_space<vmem>>, vector<1x32x24xf32>
    %47 = vector.shape_cast %46 : vector<1x32x24xf32> to vector<32x24xf32>
    %48 = vector.extract_strided_slice %44 {offsets = [0, 366], sizes = [24, 18], strides = [1, 1]} : vector<24x384xf32> to vector<24x18xf32>
    %49 = vector.extract_strided_slice %44 {offsets = [0, 0], sizes = [24, 366], strides = [1, 1]} : vector<24x384xf32> to vector<24x366xf32>
    %50 = tpu.concatenate %48, %49 in 1 : vector<24x18xf32>, vector<24x366xf32> -> vector<24x384xf32>
    %cst_28 = arith.constant dense<0.000000e+00> : vector<32x384xf32>
    %51 = tpu.matmul %47, %50, %cst_28 {dimension_numbers = #tpu.dot_dimension_numbers<[1], [0], [0], [1], [0, 0, 1, 1], [], []>} : vector<32x24xf32>, vector<24x384xf32>, vector<32x384xf32> -> vector<32x384xf32>
    %52 = arith.addf %45, %51 : vector<32x384xf32>
    %c1 = arith.constant 1 : index
    %c0_29 = arith.constant 0 : index
    %c0_30 = arith.constant 0 : index
    %53 = vector.load %arg3[%c1, %c0_29, %c0_30] : memref<3x32x24xf32, #tpu.memory_space<vmem>>, vector<1x32x24xf32>
    %54 = vector.shape_cast %53 : vector<1x32x24xf32> to vector<32x24xf32>
    %cst_31 = arith.constant dense<0.000000e+00> : vector<32x384xf32>
    %55 = tpu.matmul %54, %44, %cst_31 {dimension_numbers = #tpu.dot_dimension_numbers<[1], [0], [0], [1], [0, 0, 1, 1], [], []>} : vector<32x24xf32>, vector<24x384xf32>, vector<32x384xf32> -> vector<32x384xf32>
    %56 = arith.addf %52, %55 : vector<32x384xf32>
    %c2 = arith.constant 2 : index
    %c0_32 = arith.constant 0 : index
    %c0_33 = arith.constant 0 : index
    %57 = vector.load %arg3[%c2, %c0_32, %c0_33] : memref<3x32x24xf32, #tpu.memory_space<vmem>>, vector<1x32x24xf32>
    %58 = vector.shape_cast %57 : vector<1x32x24xf32> to vector<32x24xf32>
    %59 = vector.extract_strided_slice %44 {offsets = [0, 18], sizes = [24, 366], strides = [1, 1]} : vector<24x384xf32> to vector<24x366xf32>
    %60 = vector.extract_strided_slice %44 {offsets = [0, 0], sizes = [24, 18], strides = [1, 1]} : vector<24x384xf32> to vector<24x18xf32>
    %61 = tpu.concatenate %59, %60 in 1 : vector<24x366xf32>, vector<24x18xf32> -> vector<24x384xf32>
    %cst_34 = arith.constant dense<0.000000e+00> : vector<32x384xf32>
    %62 = tpu.matmul %58, %61, %cst_34 {dimension_numbers = #tpu.dot_dimension_numbers<[1], [0], [0], [1], [0, 0, 1, 1], [], []>} : vector<32x24xf32>, vector<24x384xf32>, vector<32x384xf32> -> vector<32x384xf32>
    %63 = arith.addf %56, %62 : vector<32x384xf32>
    %c0_35 = arith.constant 0 : index
    %c0_36 = arith.constant 0 : index
    %64 = vector.load %arg4[%c0_35, %c0_36] : memref<32x1xf32, #tpu.memory_space<vmem>>, vector<32x1xf32>
    %65 = vector.broadcast %64 : vector<32x1xf32> to vector<32x384xf32>
    %66 = arith.addf %63, %65 : vector<32x384xf32>
    %cst_37 = arith.constant 0.000000e+00 : f32
    %67 = vector.broadcast %cst_37 : f32 to vector<32x384xf32>
    %68 = arith.maximumf %66, %67 : vector<32x384xf32>
    %69 = vector.broadcast %0 : vector<1x384xf32> to vector<32x384xf32>
    %70 = arith.mulf %68, %69 : vector<32x384xf32>
    %71 = vector.extract_strided_slice %70 {offsets = [0, 383], sizes = [32, 1], strides = [1, 1]} : vector<32x384xf32> to vector<32x1xf32>
    %72 = vector.extract_strided_slice %70 {offsets = [0, 0], sizes = [32, 383], strides = [1, 1]} : vector<32x384xf32> to vector<32x383xf32>
    %73 = tpu.concatenate %71, %72 in 1 : vector<32x1xf32>, vector<32x383xf32> -> vector<32x384xf32>
    %74 = vector.extract_strided_slice %70 {offsets = [0, 1], sizes = [32, 383], strides = [1, 1]} : vector<32x384xf32> to vector<32x383xf32>
    %75 = vector.extract_strided_slice %70 {offsets = [0, 0], sizes = [32, 1], strides = [1, 1]} : vector<32x384xf32> to vector<32x1xf32>
    %76 = tpu.concatenate %74, %75 in 1 : vector<32x383xf32>, vector<32x1xf32> -> vector<32x384xf32>
    %77 = tpu.concatenate %73, %70, %76 in 0 : vector<32x384xf32>, vector<32x384xf32>, vector<32x384xf32> -> vector<96x384xf32>
    %cst_38 = arith.constant 0.000000e+00 : f32
    %78 = vector.broadcast %cst_38 : f32 to vector<64x384xf32>
    %c0_39 = arith.constant 0 : index
    %c0_40 = arith.constant 0 : index
    %c0_41 = arith.constant 0 : index
    %79 = vector.load %arg5[%c0_39, %c0_40, %c0_41] : memref<3x64x96xf32, #tpu.memory_space<vmem>>, vector<1x64x96xf32>
    %80 = vector.shape_cast %79 : vector<1x64x96xf32> to vector<64x96xf32>
    %cst_42 = arith.constant dense<0.000000e+00> : vector<64x384xf32>
    %81 = tpu.matmul %80, %77, %cst_42 {dimension_numbers = #tpu.dot_dimension_numbers<[1], [0], [0], [1], [0, 0, 1, 1], [], []>} : vector<64x96xf32>, vector<96x384xf32>, vector<64x384xf32> -> vector<64x384xf32>
    %82 = vector.extract_strided_slice %81 {offsets = [0, 366], sizes = [64, 18], strides = [1, 1]} : vector<64x384xf32> to vector<64x18xf32>
    %83 = vector.extract_strided_slice %81 {offsets = [0, 0], sizes = [64, 366], strides = [1, 1]} : vector<64x384xf32> to vector<64x366xf32>
    %84 = tpu.concatenate %82, %83 in 1 : vector<64x18xf32>, vector<64x366xf32> -> vector<64x384xf32>
    %85 = arith.addf %78, %84 : vector<64x384xf32>
    %c1_43 = arith.constant 1 : index
    %c0_44 = arith.constant 0 : index
    %c0_45 = arith.constant 0 : index
    %86 = vector.load %arg5[%c1_43, %c0_44, %c0_45] : memref<3x64x96xf32, #tpu.memory_space<vmem>>, vector<1x64x96xf32>
    %87 = vector.shape_cast %86 : vector<1x64x96xf32> to vector<64x96xf32>
    %cst_46 = arith.constant dense<0.000000e+00> : vector<64x384xf32>
    %88 = tpu.matmul %87, %77, %cst_46 {dimension_numbers = #tpu.dot_dimension_numbers<[1], [0], [0], [1], [0, 0, 1, 1], [], []>} : vector<64x96xf32>, vector<96x384xf32>, vector<64x384xf32> -> vector<64x384xf32>
    %89 = arith.addf %85, %88 : vector<64x384xf32>
    %c2_47 = arith.constant 2 : index
    %c0_48 = arith.constant 0 : index
    %c0_49 = arith.constant 0 : index
    %90 = vector.load %arg5[%c2_47, %c0_48, %c0_49] : memref<3x64x96xf32, #tpu.memory_space<vmem>>, vector<1x64x96xf32>
    %91 = vector.shape_cast %90 : vector<1x64x96xf32> to vector<64x96xf32>
    %cst_50 = arith.constant dense<0.000000e+00> : vector<64x384xf32>
    %92 = tpu.matmul %91, %77, %cst_50 {dimension_numbers = #tpu.dot_dimension_numbers<[1], [0], [0], [1], [0, 0, 1, 1], [], []>} : vector<64x96xf32>, vector<96x384xf32>, vector<64x384xf32> -> vector<64x384xf32>
    %93 = vector.extract_strided_slice %92 {offsets = [0, 18], sizes = [64, 366], strides = [1, 1]} : vector<64x384xf32> to vector<64x366xf32>
    %94 = vector.extract_strided_slice %92 {offsets = [0, 0], sizes = [64, 18], strides = [1, 1]} : vector<64x384xf32> to vector<64x18xf32>
    %95 = tpu.concatenate %93, %94 in 1 : vector<64x366xf32>, vector<64x18xf32> -> vector<64x384xf32>
    %96 = arith.addf %89, %95 : vector<64x384xf32>
    %c0_51 = arith.constant 0 : index
    %c0_52 = arith.constant 0 : index
    %97 = vector.load %arg6[%c0_51, %c0_52] : memref<64x1xf32, #tpu.memory_space<vmem>>, vector<64x1xf32>
    %98 = vector.broadcast %97 : vector<64x1xf32> to vector<64x384xf32>
    %99 = arith.addf %96, %98 : vector<64x384xf32>
    %cst_53 = arith.constant 0.000000e+00 : f32
    %100 = vector.broadcast %cst_53 : f32 to vector<64x384xf32>
    %101 = arith.maximumf %99, %100 : vector<64x384xf32>
    %102 = vector.broadcast %0 : vector<1x384xf32> to vector<64x384xf32>
    %103 = arith.mulf %101, %102 : vector<64x384xf32>
    %104 = vector.extract_strided_slice %103 {offsets = [0, 383], sizes = [64, 1], strides = [1, 1]} : vector<64x384xf32> to vector<64x1xf32>
    %105 = vector.extract_strided_slice %103 {offsets = [0, 0], sizes = [64, 383], strides = [1, 1]} : vector<64x384xf32> to vector<64x383xf32>
    %106 = tpu.concatenate %104, %105 in 1 : vector<64x1xf32>, vector<64x383xf32> -> vector<64x384xf32>
    %107 = vector.extract_strided_slice %103 {offsets = [0, 1], sizes = [64, 383], strides = [1, 1]} : vector<64x384xf32> to vector<64x383xf32>
    %108 = vector.extract_strided_slice %103 {offsets = [0, 0], sizes = [64, 1], strides = [1, 1]} : vector<64x384xf32> to vector<64x1xf32>
    %109 = tpu.concatenate %107, %108 in 1 : vector<64x383xf32>, vector<64x1xf32> -> vector<64x384xf32>
    %110 = tpu.concatenate %106, %103, %109 in 0 : vector<64x384xf32>, vector<64x384xf32>, vector<64x384xf32> -> vector<192x384xf32>
    %cst_54 = arith.constant 0.000000e+00 : f32
    %111 = vector.broadcast %cst_54 : f32 to vector<32x384xf32>
    %c0_55 = arith.constant 0 : index
    %c0_56 = arith.constant 0 : index
    %c0_57 = arith.constant 0 : index
    %112 = vector.load %arg7[%c0_55, %c0_56, %c0_57] : memref<3x32x192xf32, #tpu.memory_space<vmem>>, vector<1x32x192xf32>
    %113 = vector.shape_cast %112 : vector<1x32x192xf32> to vector<32x192xf32>
    %cst_58 = arith.constant dense<0.000000e+00> : vector<32x384xf32>
    %114 = tpu.matmul %113, %110, %cst_58 {dimension_numbers = #tpu.dot_dimension_numbers<[1], [0], [0], [1], [0, 0, 1, 1], [], []>} : vector<32x192xf32>, vector<192x384xf32>, vector<32x384xf32> -> vector<32x384xf32>
    %115 = vector.extract_strided_slice %114 {offsets = [0, 366], sizes = [32, 18], strides = [1, 1]} : vector<32x384xf32> to vector<32x18xf32>
    %116 = vector.extract_strided_slice %114 {offsets = [0, 0], sizes = [32, 366], strides = [1, 1]} : vector<32x384xf32> to vector<32x366xf32>
    %117 = tpu.concatenate %115, %116 in 1 : vector<32x18xf32>, vector<32x366xf32> -> vector<32x384xf32>
    %118 = arith.addf %111, %117 : vector<32x384xf32>
    %c1_59 = arith.constant 1 : index
    %c0_60 = arith.constant 0 : index
    %c0_61 = arith.constant 0 : index
    %119 = vector.load %arg7[%c1_59, %c0_60, %c0_61] : memref<3x32x192xf32, #tpu.memory_space<vmem>>, vector<1x32x192xf32>
    %120 = vector.shape_cast %119 : vector<1x32x192xf32> to vector<32x192xf32>
    %cst_62 = arith.constant dense<0.000000e+00> : vector<32x384xf32>
    %121 = tpu.matmul %120, %110, %cst_62 {dimension_numbers = #tpu.dot_dimension_numbers<[1], [0], [0], [1], [0, 0, 1, 1], [], []>} : vector<32x192xf32>, vector<192x384xf32>, vector<32x384xf32> -> vector<32x384xf32>
    %122 = arith.addf %118, %121 : vector<32x384xf32>
    %c2_63 = arith.constant 2 : index
    %c0_64 = arith.constant 0 : index
    %c0_65 = arith.constant 0 : index
    %123 = vector.load %arg7[%c2_63, %c0_64, %c0_65] : memref<3x32x192xf32, #tpu.memory_space<vmem>>, vector<1x32x192xf32>
    %124 = vector.shape_cast %123 : vector<1x32x192xf32> to vector<32x192xf32>
    %cst_66 = arith.constant dense<0.000000e+00> : vector<32x384xf32>
    %125 = tpu.matmul %124, %110, %cst_66 {dimension_numbers = #tpu.dot_dimension_numbers<[1], [0], [0], [1], [0, 0, 1, 1], [], []>} : vector<32x192xf32>, vector<192x384xf32>, vector<32x384xf32> -> vector<32x384xf32>
    %126 = vector.extract_strided_slice %125 {offsets = [0, 18], sizes = [32, 366], strides = [1, 1]} : vector<32x384xf32> to vector<32x366xf32>
    %127 = vector.extract_strided_slice %125 {offsets = [0, 0], sizes = [32, 18], strides = [1, 1]} : vector<32x384xf32> to vector<32x18xf32>
    %128 = tpu.concatenate %126, %127 in 1 : vector<32x366xf32>, vector<32x18xf32> -> vector<32x384xf32>
    %129 = arith.addf %122, %128 : vector<32x384xf32>
    %c0_67 = arith.constant 0 : index
    %c0_68 = arith.constant 0 : index
    %130 = vector.load %arg8[%c0_67, %c0_68] : memref<32x1xf32, #tpu.memory_space<vmem>>, vector<32x1xf32>
    %131 = vector.broadcast %130 : vector<32x1xf32> to vector<32x384xf32>
    %132 = arith.addf %129, %131 : vector<32x384xf32>
    %cst_69 = arith.constant 0.000000e+00 : f32
    %133 = vector.broadcast %cst_69 : f32 to vector<32x384xf32>
    %134 = arith.maximumf %132, %133 : vector<32x384xf32>
    %135 = vector.broadcast %0 : vector<1x384xf32> to vector<32x384xf32>
    %136 = arith.mulf %134, %135 : vector<32x384xf32>
    %137 = vector.extract_strided_slice %136 {offsets = [0, 383], sizes = [32, 1], strides = [1, 1]} : vector<32x384xf32> to vector<32x1xf32>
    %138 = vector.extract_strided_slice %136 {offsets = [0, 0], sizes = [32, 383], strides = [1, 1]} : vector<32x384xf32> to vector<32x383xf32>
    %139 = tpu.concatenate %137, %138 in 1 : vector<32x1xf32>, vector<32x383xf32> -> vector<32x384xf32>
    %140 = vector.extract_strided_slice %136 {offsets = [0, 1], sizes = [32, 383], strides = [1, 1]} : vector<32x384xf32> to vector<32x383xf32>
    %141 = vector.extract_strided_slice %136 {offsets = [0, 0], sizes = [32, 1], strides = [1, 1]} : vector<32x384xf32> to vector<32x1xf32>
    %142 = tpu.concatenate %140, %141 in 1 : vector<32x383xf32>, vector<32x1xf32> -> vector<32x384xf32>
    %143 = tpu.concatenate %139, %136, %142 in 0 : vector<32x384xf32>, vector<32x384xf32>, vector<32x384xf32> -> vector<96x384xf32>
    %cst_70 = arith.constant 0.000000e+00 : f32
    %144 = vector.broadcast %cst_70 : f32 to vector<8x384xf32>
    %c0_71 = arith.constant 0 : index
    %c0_72 = arith.constant 0 : index
    %c0_73 = arith.constant 0 : index
    %145 = vector.load %arg9[%c0_71, %c0_72, %c0_73] : memref<3x8x96xf32, #tpu.memory_space<vmem>>, vector<1x8x96xf32>
    %146 = vector.shape_cast %145 : vector<1x8x96xf32> to vector<8x96xf32>
    %cst_74 = arith.constant dense<0.000000e+00> : vector<8x384xf32>
    %147 = tpu.matmul %146, %143, %cst_74 {dimension_numbers = #tpu.dot_dimension_numbers<[1], [0], [0], [1], [0, 0, 1, 1], [], []>} : vector<8x96xf32>, vector<96x384xf32>, vector<8x384xf32> -> vector<8x384xf32>
    %148 = vector.extract_strided_slice %147 {offsets = [0, 366], sizes = [8, 18], strides = [1, 1]} : vector<8x384xf32> to vector<8x18xf32>
    %149 = vector.extract_strided_slice %147 {offsets = [0, 0], sizes = [8, 366], strides = [1, 1]} : vector<8x384xf32> to vector<8x366xf32>
    %150 = tpu.concatenate %148, %149 in 1 : vector<8x18xf32>, vector<8x366xf32> -> vector<8x384xf32>
    %151 = arith.addf %144, %150 : vector<8x384xf32>
    %c1_75 = arith.constant 1 : index
    %c0_76 = arith.constant 0 : index
    %c0_77 = arith.constant 0 : index
    %152 = vector.load %arg9[%c1_75, %c0_76, %c0_77] : memref<3x8x96xf32, #tpu.memory_space<vmem>>, vector<1x8x96xf32>
    %153 = vector.shape_cast %152 : vector<1x8x96xf32> to vector<8x96xf32>
    %cst_78 = arith.constant dense<0.000000e+00> : vector<8x384xf32>
    %154 = tpu.matmul %153, %143, %cst_78 {dimension_numbers = #tpu.dot_dimension_numbers<[1], [0], [0], [1], [0, 0, 1, 1], [], []>} : vector<8x96xf32>, vector<96x384xf32>, vector<8x384xf32> -> vector<8x384xf32>
    %155 = arith.addf %151, %154 : vector<8x384xf32>
    %c2_79 = arith.constant 2 : index
    %c0_80 = arith.constant 0 : index
    %c0_81 = arith.constant 0 : index
    %156 = vector.load %arg9[%c2_79, %c0_80, %c0_81] : memref<3x8x96xf32, #tpu.memory_space<vmem>>, vector<1x8x96xf32>
    %157 = vector.shape_cast %156 : vector<1x8x96xf32> to vector<8x96xf32>
    %cst_82 = arith.constant dense<0.000000e+00> : vector<8x384xf32>
    %158 = tpu.matmul %157, %143, %cst_82 {dimension_numbers = #tpu.dot_dimension_numbers<[1], [0], [0], [1], [0, 0, 1, 1], [], []>} : vector<8x96xf32>, vector<96x384xf32>, vector<8x384xf32> -> vector<8x384xf32>
    %159 = vector.extract_strided_slice %158 {offsets = [0, 18], sizes = [8, 366], strides = [1, 1]} : vector<8x384xf32> to vector<8x366xf32>
    %160 = vector.extract_strided_slice %158 {offsets = [0, 0], sizes = [8, 18], strides = [1, 1]} : vector<8x384xf32> to vector<8x18xf32>
    %161 = tpu.concatenate %159, %160 in 1 : vector<8x366xf32>, vector<8x18xf32> -> vector<8x384xf32>
    %162 = arith.addf %155, %161 : vector<8x384xf32>
    %c0_83 = arith.constant 0 : index
    %c0_84 = arith.constant 0 : index
    %163 = vector.load %arg10[%c0_83, %c0_84] : memref<8x1xf32, #tpu.memory_space<vmem>>, vector<8x1xf32>
    %164 = vector.broadcast %163 : vector<8x1xf32> to vector<8x384xf32>
    %165 = arith.addf %162, %164 : vector<8x384xf32>
    %166 = vector.extract_strided_slice %165 {offsets = [0, 19], sizes = [1, 16], strides = [1, 1]} : vector<8x384xf32> to vector<1x16xf32>
    %c0_85 = arith.constant 0 : index
    %c0_86 = arith.constant 0 : index
    %c0_87 = arith.constant 0 : index
    %167 = vector.load %arg11[%c0_85, %c0_86, %c0_87] : memref<1x1x256xf32, #tpu.memory_space<vmem>>, vector<1x1x16xf32>
    %168 = vector.shape_cast %167 : vector<1x1x16xf32> to vector<1x16xf32>
    %169 = vector.shape_cast %166 : vector<1x16xf32> to vector<1x1x16xf32>
    tpu.vector_store %arg11[%c0_85, %c0_86, %c0_87], %169 {strides = array<i32>} : memref<1x1x256xf32, #tpu.memory_space<vmem>>, vector<1x1x16xf32>,
    %170 = vector.extract_strided_slice %165 {offsets = [0, 37], sizes = [1, 16], strides = [1, 1]} : vector<8x384xf32> to vector<1x16xf32>
    %c0_88 = arith.constant 0 : index
    %c0_89 = arith.constant 0 : index
    %c16 = arith.constant 16 : index
    %171 = vector.load %arg11[%c0_88, %c0_89, %c16] : memref<1x1x256xf32, #tpu.memory_space<vmem>>, vector<1x1x16xf32>
    %172 = vector.shape_cast %171 : vector<1x1x16xf32> to vector<1x16xf32>
    %173 = vector.shape_cast %170 : vector<1x16xf32> to vector<1x1x16xf32>
    tpu.vector_store %arg11[%c0_88, %c0_89, %c16], %173 {strides = array<i32>} : memref<1x1x256xf32, #tpu.memory_space<vmem>>, vector<1x1x16xf32>,
    %174 = vector.extract_strided_slice %165 {offsets = [0, 55], sizes = [1, 16], strides = [1, 1]} : vector<8x384xf32> to vector<1x16xf32>
    %c0_90 = arith.constant 0 : index
    %c0_91 = arith.constant 0 : index
    %c32 = arith.constant 32 : index
    %175 = vector.load %arg11[%c0_90, %c0_91, %c32] : memref<1x1x256xf32, #tpu.memory_space<vmem>>, vector<1x1x16xf32>
    %176 = vector.shape_cast %175 : vector<1x1x16xf32> to vector<1x16xf32>
    %177 = vector.shape_cast %174 : vector<1x16xf32> to vector<1x1x16xf32>
    tpu.vector_store %arg11[%c0_90, %c0_91, %c32], %177 {strides = array<i32>} : memref<1x1x256xf32, #tpu.memory_space<vmem>>, vector<1x1x16xf32>,
    %178 = vector.extract_strided_slice %165 {offsets = [0, 73], sizes = [1, 16], strides = [1, 1]} : vector<8x384xf32> to vector<1x16xf32>
    %c0_92 = arith.constant 0 : index
    %c0_93 = arith.constant 0 : index
    %c48 = arith.constant 48 : index
    %179 = vector.load %arg11[%c0_92, %c0_93, %c48] : memref<1x1x256xf32, #tpu.memory_space<vmem>>, vector<1x1x16xf32>
    %180 = vector.shape_cast %179 : vector<1x1x16xf32> to vector<1x16xf32>
    %181 = vector.shape_cast %178 : vector<1x16xf32> to vector<1x1x16xf32>
    tpu.vector_store %arg11[%c0_92, %c0_93, %c48], %181 {strides = array<i32>} : memref<1x1x256xf32, #tpu.memory_space<vmem>>, vector<1x1x16xf32>,
    %182 = vector.extract_strided_slice %165 {offsets = [0, 91], sizes = [1, 16], strides = [1, 1]} : vector<8x384xf32> to vector<1x16xf32>
    %c0_94 = arith.constant 0 : index
    %c0_95 = arith.constant 0 : index
    %c64 = arith.constant 64 : index
    %183 = vector.load %arg11[%c0_94, %c0_95, %c64] : memref<1x1x256xf32, #tpu.memory_space<vmem>>, vector<1x1x16xf32>
    %184 = vector.shape_cast %183 : vector<1x1x16xf32> to vector<1x16xf32>
    %185 = vector.shape_cast %182 : vector<1x16xf32> to vector<1x1x16xf32>
    tpu.vector_store %arg11[%c0_94, %c0_95, %c64], %185 {strides = array<i32>} : memref<1x1x256xf32, #tpu.memory_space<vmem>>, vector<1x1x16xf32>,
    %186 = vector.extract_strided_slice %165 {offsets = [0, 109], sizes = [1, 16], strides = [1, 1]} : vector<8x384xf32> to vector<1x16xf32>
    %c0_96 = arith.constant 0 : index
    %c0_97 = arith.constant 0 : index
    %c80 = arith.constant 80 : index
    %187 = vector.load %arg11[%c0_96, %c0_97, %c80] : memref<1x1x256xf32, #tpu.memory_space<vmem>>, vector<1x1x16xf32>
    %188 = vector.shape_cast %187 : vector<1x1x16xf32> to vector<1x16xf32>
    %189 = vector.shape_cast %186 : vector<1x16xf32> to vector<1x1x16xf32>
    tpu.vector_store %arg11[%c0_96, %c0_97, %c80], %189 {strides = array<i32>} : memref<1x1x256xf32, #tpu.memory_space<vmem>>, vector<1x1x16xf32>,
    %190 = vector.extract_strided_slice %165 {offsets = [0, 127], sizes = [1, 16], strides = [1, 1]} : vector<8x384xf32> to vector<1x16xf32>
    %c0_98 = arith.constant 0 : index
    %c0_99 = arith.constant 0 : index
    %c96 = arith.constant 96 : index
    %191 = vector.load %arg11[%c0_98, %c0_99, %c96] : memref<1x1x256xf32, #tpu.memory_space<vmem>>, vector<1x1x16xf32>
    %192 = vector.shape_cast %191 : vector<1x1x16xf32> to vector<1x16xf32>
    %193 = vector.shape_cast %190 : vector<1x16xf32> to vector<1x1x16xf32>
    tpu.vector_store %arg11[%c0_98, %c0_99, %c96], %193 {strides = array<i32>} : memref<1x1x256xf32, #tpu.memory_space<vmem>>, vector<1x1x16xf32>,
    %194 = vector.extract_strided_slice %165 {offsets = [0, 145], sizes = [1, 16], strides = [1, 1]} : vector<8x384xf32> to vector<1x16xf32>
    %c0_100 = arith.constant 0 : index
    %c0_101 = arith.constant 0 : index
    %c112 = arith.constant 112 : index
    %195 = vector.load %arg11[%c0_100, %c0_101, %c112] : memref<1x1x256xf32, #tpu.memory_space<vmem>>, vector<1x1x16xf32>
    %196 = vector.shape_cast %195 : vector<1x1x16xf32> to vector<1x16xf32>
    %197 = vector.shape_cast %194 : vector<1x16xf32> to vector<1x1x16xf32>
    tpu.vector_store %arg11[%c0_100, %c0_101, %c112], %197 {strides = array<i32>} : memref<1x1x256xf32, #tpu.memory_space<vmem>>, vector<1x1x16xf32>,
    %198 = vector.extract_strided_slice %165 {offsets = [0, 163], sizes = [1, 16], strides = [1, 1]} : vector<8x384xf32> to vector<1x16xf32>
    %c0_102 = arith.constant 0 : index
    %c0_103 = arith.constant 0 : index
    %c128 = arith.constant 128 : index
    %199 = vector.load %arg11[%c0_102, %c0_103, %c128] : memref<1x1x256xf32, #tpu.memory_space<vmem>>, vector<1x1x16xf32>
    %200 = vector.shape_cast %199 : vector<1x1x16xf32> to vector<1x16xf32>
    %201 = vector.shape_cast %198 : vector<1x16xf32> to vector<1x1x16xf32>
    tpu.vector_store %arg11[%c0_102, %c0_103, %c128], %201 {strides = array<i32>} : memref<1x1x256xf32, #tpu.memory_space<vmem>>, vector<1x1x16xf32>,
    %202 = vector.extract_strided_slice %165 {offsets = [0, 181], sizes = [1, 16], strides = [1, 1]} : vector<8x384xf32> to vector<1x16xf32>
    %c0_104 = arith.constant 0 : index
    %c0_105 = arith.constant 0 : index
    %c144 = arith.constant 144 : index
    %203 = vector.load %arg11[%c0_104, %c0_105, %c144] : memref<1x1x256xf32, #tpu.memory_space<vmem>>, vector<1x1x16xf32>
    %204 = vector.shape_cast %203 : vector<1x1x16xf32> to vector<1x16xf32>
    %205 = vector.shape_cast %202 : vector<1x16xf32> to vector<1x1x16xf32>
    tpu.vector_store %arg11[%c0_104, %c0_105, %c144], %205 {strides = array<i32>} : memref<1x1x256xf32, #tpu.memory_space<vmem>>, vector<1x1x16xf32>,
    %206 = vector.extract_strided_slice %165 {offsets = [0, 199], sizes = [1, 16], strides = [1, 1]} : vector<8x384xf32> to vector<1x16xf32>
    %c0_106 = arith.constant 0 : index
    %c0_107 = arith.constant 0 : index
    %c160 = arith.constant 160 : index
    %207 = vector.load %arg11[%c0_106, %c0_107, %c160] : memref<1x1x256xf32, #tpu.memory_space<vmem>>, vector<1x1x16xf32>
    %208 = vector.shape_cast %207 : vector<1x1x16xf32> to vector<1x16xf32>
    %209 = vector.shape_cast %206 : vector<1x16xf32> to vector<1x1x16xf32>
    tpu.vector_store %arg11[%c0_106, %c0_107, %c160], %209 {strides = array<i32>} : memref<1x1x256xf32, #tpu.memory_space<vmem>>, vector<1x1x16xf32>,
    %210 = vector.extract_strided_slice %165 {offsets = [0, 217], sizes = [1, 16], strides = [1, 1]} : vector<8x384xf32> to vector<1x16xf32>
    %c0_108 = arith.constant 0 : index
    %c0_109 = arith.constant 0 : index
    %c176 = arith.constant 176 : index
    %211 = vector.load %arg11[%c0_108, %c0_109, %c176] : memref<1x1x256xf32, #tpu.memory_space<vmem>>, vector<1x1x16xf32>
    %212 = vector.shape_cast %211 : vector<1x1x16xf32> to vector<1x16xf32>
    %213 = vector.shape_cast %210 : vector<1x16xf32> to vector<1x1x16xf32>
    tpu.vector_store %arg11[%c0_108, %c0_109, %c176], %213 {strides = array<i32>} : memref<1x1x256xf32, #tpu.memory_space<vmem>>, vector<1x1x16xf32>,
    %214 = vector.extract_strided_slice %165 {offsets = [0, 235], sizes = [1, 16], strides = [1, 1]} : vector<8x384xf32> to vector<1x16xf32>
    %c0_110 = arith.constant 0 : index
    %c0_111 = arith.constant 0 : index
    %c192 = arith.constant 192 : index
    %215 = vector.load %arg11[%c0_110, %c0_111, %c192] : memref<1x1x256xf32, #tpu.memory_space<vmem>>, vector<1x1x16xf32>
    %216 = vector.shape_cast %215 : vector<1x1x16xf32> to vector<1x16xf32>
    %217 = vector.shape_cast %214 : vector<1x16xf32> to vector<1x1x16xf32>
    tpu.vector_store %arg11[%c0_110, %c0_111, %c192], %217 {strides = array<i32>} : memref<1x1x256xf32, #tpu.memory_space<vmem>>, vector<1x1x16xf32>,
    %218 = vector.extract_strided_slice %165 {offsets = [0, 253], sizes = [1, 16], strides = [1, 1]} : vector<8x384xf32> to vector<1x16xf32>
    %c0_112 = arith.constant 0 : index
    %c0_113 = arith.constant 0 : index
    %c208 = arith.constant 208 : index
    %219 = vector.load %arg11[%c0_112, %c0_113, %c208] : memref<1x1x256xf32, #tpu.memory_space<vmem>>, vector<1x1x16xf32>
    %220 = vector.shape_cast %219 : vector<1x1x16xf32> to vector<1x16xf32>
    %221 = vector.shape_cast %218 : vector<1x16xf32> to vector<1x1x16xf32>
    tpu.vector_store %arg11[%c0_112, %c0_113, %c208], %221 {strides = array<i32>} : memref<1x1x256xf32, #tpu.memory_space<vmem>>, vector<1x1x16xf32>,
    %222 = vector.extract_strided_slice %165 {offsets = [0, 271], sizes = [1, 16], strides = [1, 1]} : vector<8x384xf32> to vector<1x16xf32>
    %c0_114 = arith.constant 0 : index
    %c0_115 = arith.constant 0 : index
    %c224 = arith.constant 224 : index
    %223 = vector.load %arg11[%c0_114, %c0_115, %c224] : memref<1x1x256xf32, #tpu.memory_space<vmem>>, vector<1x1x16xf32>
    %224 = vector.shape_cast %223 : vector<1x1x16xf32> to vector<1x16xf32>
    %225 = vector.shape_cast %222 : vector<1x16xf32> to vector<1x1x16xf32>
    tpu.vector_store %arg11[%c0_114, %c0_115, %c224], %225 {strides = array<i32>} : memref<1x1x256xf32, #tpu.memory_space<vmem>>, vector<1x1x16xf32>,
    %226 = vector.extract_strided_slice %165 {offsets = [0, 289], sizes = [1, 16], strides = [1, 1]} : vector<8x384xf32> to vector<1x16xf32>
    %c0_116 = arith.constant 0 : index
    %c0_117 = arith.constant 0 : index
    %c240 = arith.constant 240 : index
    %227 = vector.load %arg11[%c0_116, %c0_117, %c240] : memref<1x1x256xf32, #tpu.memory_space<vmem>>, vector<1x1x16xf32>
    %228 = vector.shape_cast %227 : vector<1x1x16xf32> to vector<1x16xf32>
    %229 = vector.shape_cast %226 : vector<1x16xf32> to vector<1x1x16xf32>
    tpu.vector_store %arg11[%c0_116, %c0_117, %c240], %229 {strides = array<i32>} : memref<1x1x256xf32, #tpu.memory_space<vmem>>, vector<1x1x16xf32>,
    return
  }
  func.func @transform_0(%arg0: i32) -> (i32, i32, i32) {
    %c0_i32 = arith.constant 0 : i32
    %c0_i32_0 = arith.constant 0 : i32
    %c0_i32_1 = arith.constant 0 : i32
    return %arg0, %c0_i32, %c0_i32_0 : i32, i32, i32
  }
  func.func @transform_1(%arg0: i32) -> (i32, i32) {
    %c0_i32 = arith.constant 0 : i32
    %c0_i32_0 = arith.constant 0 : i32
    %c0_i32_1 = arith.constant 0 : i32
    return %c0_i32, %c0_i32_0 : i32, i32
  }
  func.func @transform_2(%arg0: i32) -> (i32, i32, i32) {
    %c0_i32 = arith.constant 0 : i32
    %c0_i32_0 = arith.constant 0 : i32
    %c0_i32_1 = arith.constant 0 : i32
    %c0_i32_2 = arith.constant 0 : i32
    return %c0_i32, %c0_i32_0, %c0_i32_1 : i32, i32, i32
  }
  func.func @transform_3(%arg0: i32) -> (i32, i32) {
    %c0_i32 = arith.constant 0 : i32
    %c0_i32_0 = arith.constant 0 : i32
    %c0_i32_1 = arith.constant 0 : i32
    return %c0_i32, %c0_i32_0 : i32, i32
  }
  func.func @transform_4(%arg0: i32) -> (i32, i32, i32) {
    %c0_i32 = arith.constant 0 : i32
    %c0_i32_0 = arith.constant 0 : i32
    %c0_i32_1 = arith.constant 0 : i32
    %c0_i32_2 = arith.constant 0 : i32
    return %c0_i32, %c0_i32_0, %c0_i32_1 : i32, i32, i32
  }
  func.func @transform_5(%arg0: i32) -> (i32, i32) {
    %c0_i32 = arith.constant 0 : i32
    %c0_i32_0 = arith.constant 0 : i32
    %c0_i32_1 = arith.constant 0 : i32
    return %c0_i32, %c0_i32_0 : i32, i32
  }
  func.func @transform_6(%arg0: i32) -> (i32, i32, i32) {
    %c0_i32 = arith.constant 0 : i32
    %c0_i32_0 = arith.constant 0 : i32
    %c0_i32_1 = arith.constant 0 : i32
    %c0_i32_2 = arith.constant 0 : i32
    return %c0_i32, %c0_i32_0, %c0_i32_1 : i32, i32, i32
  }
  func.func @transform_7(%arg0: i32) -> (i32, i32) {
    %c0_i32 = arith.constant 0 : i32
    %c0_i32_0 = arith.constant 0 : i32
    %c0_i32_1 = arith.constant 0 : i32
    return %c0_i32, %c0_i32_0 : i32, i32
  }
  func.func @transform_8(%arg0: i32) -> (i32, i32, i32) {
    %c0_i32 = arith.constant 0 : i32
    %c0_i32_0 = arith.constant 0 : i32
    %c0_i32_1 = arith.constant 0 : i32
    %c0_i32_2 = arith.constant 0 : i32
    return %c0_i32, %c0_i32_0, %c0_i32_1 : i32, i32, i32
  }
  func.func @transform_9(%arg0: i32) -> (i32, i32) {
    %c0_i32 = arith.constant 0 : i32
    %c0_i32_0 = arith.constant 0 : i32
    %c0_i32_1 = arith.constant 0 : i32
    return %c0_i32, %c0_i32_0 : i32, i32
  }
  func.func @transform_10(%arg0: i32) -> (i32, i32, i32) {
    %c0_i32 = arith.constant 0 : i32
    %c0_i32_0 = arith.constant 0 : i32
    %c0_i32_1 = arith.constant 0 : i32
    return %arg0, %c0_i32, %c0_i32_0 : i32, i32, i32
  }
}

</mosaic_0001>

<bundles_post_ra>
// kernel: conv_block_small.1
= control target key start
LH: loop header
LB: loop body
LE: loop exit
PB: predicated region body
PF: predicated region fallthrough
CT: control target
= control target key end

     0   :  { %s5064_s13 = smov 0   ;;  %s7451_s0 = inlined_call_operand.vmem [shape: f32[2,4,256], index: 0, kind: input, shape index: {}]   ;;  %s7452_s1 = inlined_call_operand.vmem [shape: f32[1,384], index: 1, kind: input, shape index: {}]   ;;  %s7453_s2 = inlined_call_operand.vmem [shape: f32[3,32,24], index: 2, kind: input, shape index: {}]   ;;  %s7454_s3 = inlined_call_operand.vmem [shape: f32[32,1], index: 3, kind: input, shape index: {}]   ;;  %s7455_s4 = inlined_call_operand.vmem [shape: f32[3,64,96], index: 4, kind: input, shape index: {}]   ;;  %s7456_s5 = inlined_call_operand.vmem [shape: f32[64,1], index: 5, kind: input, shape index: {}]   ;;  %s7457_s6 = inlined_call_operand.vmem [shape: f32[3,32,192], index: 6, kind: input, shape index: {}]   ;;  %s7458_s7 = inlined_call_operand.vmem [shape: f32[32,1], index: 7, kind: input, shape index: {}]   ;;  %s7459_s8 = inlined_call_operand.vmem [shape: f32[3,8,96], index: 8, kind: input, shape index: {}]   ;;  %s7460_s9 = inlined_call_operand.vmem [shape: f32[8,1], index: 9, kind: input, shape index: {}]   ;;  %s7461_s10 = inlined_call_operand.vmem [shape: f32[2,1,256], index: 10, kind: output, shape index: {}]  }
   0x1 LB: > { %s4410_s14 = sadd.s32 4294967295, %s4967_s13   ;;  %p4414_p0 = scmp.ge.s32.totalorder %s4967_s13, 1  ;;  %s4967_s13 = sphi %s5064_s13, %s20_s13  }
   0x2   : > { %p312_p1 = scmp.lt.s32.totalorder %s4967_s13, 3 }
   0x4   : > { %p313_p2 = pnand %p4414_p0, %p312_p1 }
   0x6   : > { %316 = sbr.rel (%p313_p2) target bundleno = 2594 (0xa22), region = 60 }
   0xb   : > { %p349_p3 = scmp.lt.s32.totalorder %s4410_s14, 1  ;;  %v7464_v0 = vmov 0.0   ;;  %s4970_s19 = smov 33   ;;  %vm399_vm0 = vcmask 117760   ;;  %vm404_vm1 = vcmask 265352   ;;  %vm367_vm2 = vcmask 281752  }
   0xc   : > { %360 = vst [vmem:[#allocation2 + $0x8] sm:$0xff] %v7464_v0  ;;  %359 = vst [vmem:[#allocation2] sm:$0xff] %v7464_v0  ;;  %611 = vmatprep.mubr.f32.mxu0 %v7464_v0  ;;  %s4971_s20 = smov 31   ;;  %s4972_s21 = smov 21   ;;  %vm372_vm3 = vcmask 429352   ;;  %vm377_vm4 = vcmask 576952  }
   0xd   : > { %361 = vst [vmem:[#allocation2 + $0x10] sm:$0xff] %v7464_v0  ;;  %s7629_s14 = smov (!%p349_p3, %s4410_s14), 1  ;;  %s4973_s22 = smov 19   ;;  %vm410_vm5 = vcmask 412952   ;;  %vm382_vm6 = vcmask 724552   ;;  %vm415_vm7 = vcmask 560552  }
   0xe   : > { %s4564_s15 = sshll.u32 %s7629_s14, 3  ;;  %s4974_s23 = smov 23   ;;  %vm387_vm8 = vcmask 872152   ;;  %vm420_vm9 = vcmask 708152   ;;  %vm437_vm10 = vcmask 101376   ;;  %vm425_vm11 = vcmask 855752  }
   0xf   : > { %s353_s18 = scalar_lea.vmem %s7451_s0, %s4564_s15  ;;  %s4975_s24 = smov 35   ;;  %vm430_vm12 = vcmask 1003352   ;;  %vm392_vm13 = vcmask 1019752   ;;  %vm435_vm14 = vcmask 1044456   ;;  %vm397_vm15 = vcmask 1044472   ;;  %v4418_v22 = vld [vmem:[%s7453_s2 + $0x20] sm:$0xff] }
  0x10   : > { %v362_v1 = vld [vmem:[%s353_s18] sm:$0xff]  ;;  %s4976_s25 = smov 25   ;;  %s4977_s26 = smov 37   ;;  %v4419_v35 = vld [vmem:[%s7453_s2 + $0x28] sm:$0xff]  ;;  %v4420_v36 = vld [vmem:[%s7453_s2 + $0x30] sm:$0xff]  ;;  %v4990_v41 = vmov 0  }
  0x11   : > { %401 = vrot.lane.b32.xlu1 %v362_v1, %s4970_s19  ;;  %394 = vrot.lane.b32.xlu0 %v362_v1, %s4971_s20  ;;  %v406_v2 = vcombine.high %v362_v1, %v362_v1  ;;  %s4978_s27 = smov 27   ;;  %s4979_s28 = smov 39   ;;  %v4421_v37 = vld [vmem:[%s7453_s2 + $0x38] sm:$0xff]  ;;  %v483_v38 = vld [vmem:[%s7453_s2] sm:$0xff] }
  0x12   : > { %s4980_s29 = smov 45   ;;  %s4981_s30 = smov 41   ;;  %v1153_v39 = vld [vmem:[%s7454_s3 + $0x18] sm:$0xff]  ;;  %v1152_v40 = vld [vmem:[%s7454_s3 + $0x10] sm:$0xff]  ;;  %4958 = vset.pattern.permute.xlu0 %v4990_v41  ;;  %4959 = vset.pattern.permute.xlu1 %v4990_v41  ;;  %v1150_v42 = vld [vmem:[%s7454_s3] sm:$0xff] }
  0x13   : > { %s4982_s11 = smov 43   ;;  %s4983_s12 = smov 29   ;;  %v1151_v43 = vld [vmem:[%s7454_s3 + $0x8] sm:$0xff] }
  0x14   : > { %s4984_s15 = smov 47   ;;  %s4985_s16 = smov 49  }
  0x15   : > { %369 = vrot.lane.b32.xlu1 %v362_v1, %s4972_s21  ;;  %364 = vrot.lane.b32.xlu0 %v362_v1, %s4973_s22  ;;  %s4986_s17 = smov 1   ;;  %s4987_s18 = smov 127  }
  0x16   : > { %s4988_s19 = smov 18   ;;  %s4989_s20 = smov 110  }
  0x17   : > { %s5004_s21 = smov 87   ;;  %s5006_s22 = smov 85  }
  0x19   : > { %374 = vrot.lane.b32.xlu1 %v362_v1, %s4974_s23  ;;  %407 = vrot.lane.b32.xlu0 %v406_v2, %s4975_s24  ;;  %s5007_s23 = smov 95   ;;  %s5008_s24 = smov 79  }
  0x1d   : > { %379 = vrot.lane.b32.xlu1 %v362_v1, %s4976_s25  ;;  %412 = vrot.lane.b32.xlu0 %v406_v2, %s4977_s26  ;;  %s4417_s25 = sshll.u32 %s7629_s14, 1 }
  0x21   : > { %384 = vrot.lane.b32.xlu1 %v362_v1, %s4978_s27  ;;  %417 = vrot.lane.b32.xlu0 %v406_v2, %s4979_s28  ;;  %s4995_s27 = smov 107   ;;  %s4996_s28 = smov 93  }
  0x25   : > { %432 = vrot.lane.b32.xlu1 %v406_v2, %s4980_s29  ;;  %422 = vrot.lane.b32.xlu0 %v406_v2, %s4981_s30  ;;  %s4997_s29 = smov 105   ;;  %s4998_s30 = smov 91  }
  0x29   : > { %427 = vrot.lane.b32.xlu1 %v406_v2, %s4982_s11  ;;  %389 = vrot.lane.b32.xlu0 %v362_v1, %s4983_s12  ;;  %s4999_s11 = smov 101   ;;  %s5000_s12 = smov 89  }
  0x2d   : > { %439 = vrot.lane.b32.xlu0 %v406_v2, %s4984_s15  ;;  %444 = vrot.lane.b32.xlu1 %v406_v2, %s4985_s16  ;;  %s5001_s15 = smov 99   ;;  %s5002_s16 = smov 103  }
  0x83   : > { %v402_v3 = vpop.permute.xlu1 %401  ;;  %v395_v4 = vpop.permute.xlu0 %394 }
  0x84   : > { %400 = vst.msk [vmem:[#allocation2 + $0x8] sm:$0xf] %vm399_vm0, %v395_v4  ;;  %vm442_vm0 = vcmask 248952  }
  0x85   : > { %405 = vst.msk [vmem:[#allocation2 + $0x8] sm:$0xf] %vm404_vm1, %v402_v3  ;;  %vm447_vm1 = vcmask 396552   ;;  %v484_v3 = vld [vmem:[%s7453_s2 + $0x8] sm:$0xff] }
  0x87   : > { %v370_v5 = vpop.permute.xlu1 %369  ;;  %v365_v6 = vpop.permute.xlu0 %364 }
  0x88   : > { %368 = vst.msk [vmem:[#allocation2] sm:$0xf] %vm367_vm2, %v365_v6  ;;  %vm534_vm2 = vcmask 195584  }
  0x89   : > { %373 = vst.msk [vmem:[#allocation2] sm:$0xf] %vm372_vm3, %v370_v5  ;;  %4691 = vmatprep.mubr.msk.f32.mxu1 %vm534_vm2, %v4418_v22  ;;  %vm475_vm3 = vcmask 1039360  }
  0x8b   : > { %v375_v7 = vpop.permute.xlu1 %374  ;;  %v408_v8 = vpop.permute.xlu0 %407 }
  0x8c   : > { %378 = vst.msk [vmem:[#allocation2] sm:$0xf] %vm377_vm4, %v375_v7  ;;  %vm462_vm4 = vcmask 7168  }
  0x8d   : > { %411 = vst.msk [vmem:[#allocation2 + $0x8] sm:$0xf] %vm410_vm5, %v408_v8  ;;  %vm510_vm5 = vcmask 146432  }
  0x8f   : > { %v380_v9 = vpop.permute.xlu1 %379  ;;  %v413_v10 = vpop.permute.xlu0 %412 }
  0x90   : > { %383 = vst.msk [vmem:[#allocation2] sm:$0xf] %vm382_vm6, %v380_v9  ;;  %vm930_vm6 = vcmask 900096  }
  0x91   : > { %416 = vst.msk [vmem:[#allocation2 + $0x8] sm:$0xf] %vm415_vm7, %v413_v10  ;;  %vm1350_vm7 = vcmask 785408  }
  0x93   : > { %v385_v11 = vpop.permute.xlu1 %384  ;;  %v418_v12 = vpop.permute.xlu0 %417 }
  0x94   : > { %388 = vst.msk [vmem:[#allocation2] sm:$0xf] %vm387_vm8, %v385_v11  ;;  %v485_v11 = vld [vmem:[%s7453_s2 + $0x10] sm:$0xff]  ;;  %vm2783_vm8 = vcmask 523264  }
  0x95   : > { %421 = vst.msk [vmem:[#allocation2 + $0x8] sm:$0xf] %vm420_vm9, %v418_v12  ;;  %vm4991_vm9 = vmmov 0  }
  0x97   : > { %v433_v13 = vpop.permute.xlu1 %432  ;;  %v423_v14 = vpop.permute.xlu0 %422 }
  0x98   : > { %438 = vst.msk [vmem:[#allocation2 + $0x10] sm:$0xf] %vm437_vm10, %v433_v13 }
  0x99   : > { %426 = vst.msk [vmem:[#allocation2 + $0x8] sm:$0xf] %vm425_vm11, %v423_v14  ;;  %v486_v14 = vld [vmem:[%s7453_s2 + $0x18] sm:$0xff] }
  0x9b   : > { %v428_v15 = vpop.permute.xlu1 %427  ;;  %v390_v16 = vpop.permute.xlu0 %389 }
  0x9c   : > { %431 = vst.msk [vmem:[#allocation2 + $0x8] sm:$0xf] %vm430_vm12, %v428_v15 }
  0x9d   : > { %393 = vst.msk [vmem:[#allocation2] sm:$0xf] %vm392_vm13, %v390_v16 }
  0x9e   : > { %436 = vst.msk [vmem:[#allocation2 + $0x8] sm:$0xf] %vm435_vm14, %v433_v13 }
  0x9f   : > { %398 = vst.msk [vmem:[#allocation2] sm:$0xf] %vm397_vm15, %v395_v4  ;;  %v440_v17 = vpop.permute.xlu0 %439  ;;  %v445_v18 = vpop.permute.xlu1 %444 }
  0xa0   : > { %443 = vst.msk [vmem:[#allocation2 + $0x10] sm:$0xf] %vm442_vm0, %v440_v17 }
  0xa1   : > { %448 = vst.msk [vmem:[#allocation2 + $0x10] sm:$0xf] %vm447_vm1, %v445_v18 }
  0xa5   : > { %v450_v20 = vld [vmem:[#allocation2 + $0x8] sm:$0xff] }
  0xa6   : > { %v5084_v21 = vld [vmem:[#allocation2] sm:$0xff] }
  0xa8   : > { %v451_v19 = vld [vmem:[#allocation2 + $0x10] sm:$0xff] }
  0xa9   : > { %453 = vrot.lane.b32.xlu1 %v451_v19, %s4986_s17  ;;  %473 = vrot.lane.b32.xlu0 %v451_v19, %s4987_s18 }
  0xad   : > { %471 = vrot.lane.b32.xlu1 %v450_v20, %s4987_s18  ;;  %469 = vrot.lane.b32.xlu0 %v5084_v21, %s4987_s18 }
  0xb1   : > { %460 = vrot.lane.b32.xlu1 %v450_v20, %s4986_s17  ;;  %458 = vrot.lane.b32.xlu0 %v5084_v21, %s4986_s17 }
  0xb5   : > { %502 = vrot.lane.b32.xlu1 %v5084_v21, %s4988_s19  ;;  %490 = vrot.lane.b32.xlu0 %v451_v19, %s4988_s19 }
  0xb9   : > { %922 = vrot.lane.b32.xlu1 %v451_v19, %s4989_s20  ;;  %920 = vrot.lane.b32.xlu0 %v450_v20, %s4989_s20 }
  0xbd   : > { %504 = vrot.lane.b32.xlu1 %v450_v20, %s4988_s19 }
 0x11b   : > { %v454_v23 = vpop.permute.xlu1 %453  ;;  %v474_v24 = vpop.permute.xlu0 %473 }
 0x11f   : > { %v472_v25 = vpop.permute.xlu1 %471  ;;  %v470_v26 = vpop.permute.xlu0 %469 }
 0x120   : > { %v477_v27 = vsel %vm475_vm3, %v472_v25, %v474_v24  ;;  %v482_v28 = vsel %vm475_vm3, %v474_v24, %v470_v26  ;;  %v476_v29 = vsel %vm475_vm3, %v470_v26, %v472_v25 }
 0x121   : > { %508 = vrot.lane.b32.xlu1 %v477_v27, %s4988_s19  ;;  %573 = vmatprep.subr.mxu0 %v477_v27 }
 0x122   : > { %492 = vrot.lane.b32.xlu0 %v482_v28, %s4988_s19  ;;  %4685 = vmatprep.subr.mxu1 %v482_v28 }
 0x123   : > { %574 = vmatpush1.msra.mxu0 %v476_v29  ;;  %4686 = vmatpush3.msra.mxu1 %v482_v28  ;;  %v461_v30 = vpop.permute.xlu1 %460  ;;  %v459_v31 = vpop.permute.xlu0 %458 }
 0x124   : > { %575 = vmatprep.subr.mxu0 %v450_v20  ;;  %4687 = vmatprep.subr.mxu1 %v451_v19  ;;  %v464_v32 = vsel %vm462_vm4, %v461_v30, %v454_v23  ;;  %v468_v33 = vsel %vm462_vm4, %v454_v23, %v459_v31  ;;  %v463_v34 = vsel %vm462_vm4, %v459_v31, %v461_v30  ;;  %v4438_v20 = vld [vmem:[%s7453_s2 + $0x40] sm:$0xff]  ;;  %v4441_v23 = vld [vmem:[%s7453_s2 + $0x58] sm:$0xff] }
 0x125   : > { %576 = vmatpush1.msra.mxu0 %v5084_v21  ;;  %4688 = vmatpush3.msra.mxu1 %v451_v19 }
 0x126   : > { %488 = vrot.lane.b32.xlu1 %v464_v32, %s4988_s19  ;;  %4689 = vmatprep.subr.mxu1 %v464_v32 }
 0x127   : > { %498 = vrot.lane.b32.xlu0 %v468_v33, %s4988_s19  ;;  %577 = vmatprep.subr.mxu0 %v463_v34  ;;  %v503_v44 = vpop.permute.xlu1 %502  ;;  %v491_v46 = vpop.permute.xlu0 %490 }
 0x128   : > { %578 = vmatpush1.msra.mxu0 %v468_v33  ;;  %4690 = vmatpush3.msra.mxu1 %v464_v32  ;;  %v527_v63 = vsel %vm510_vm5, %v491_v46, %v503_v44 }
 0x129   : > { %4422 = vmatmul.mubr.msk.f32.vlgmr.msra.gmra.mxu0 %vm534_vm2, %v4418_v22  ;;  %4692 = vmatmul.mubr.msk.f32.vlgmr.msra.gmra.mxu1 %vm534_vm2, %v4419_v35  ;;  %v4440_v22 = vld [vmem:[%s7453_s2 + $0x50] sm:$0xff] }
 0x12a   : > { %926 = vrot.lane.b32.xlu1 %v477_v27, %s4989_s20  ;;  %617 = vmatprep.mubr.f32.mxu0 %v7464_v0 }
 0x12b   : > { %928 = vrot.lane.b32.xlu0 %v482_v28, %s4989_s20  ;;  %4694 = vmatprep.mubr.msk.f32.mxu1 %vm534_vm2, %v4420_v36  ;;  %v923_v45 = vpop.permute.xlu1 %922  ;;  %v921_v48 = vpop.permute.xlu0 %920 }
 0x12c   : > { %v934_v12 = vsel %vm930_vm6, %v921_v48, %v923_v45 }
 0x12d   : > { %4423 = vmatmul.mubr.msk.f32.gmra.mxu0 %vm534_vm2, %v4419_v35  ;;  %4695 = vmatmul.mubr.msk.f32.gmra.mxu1 %vm534_vm2, %v4421_v37 }
 0x12e   : > { %924 = vrot.lane.b32.xlu1 %v476_v29, %s4989_s20  ;;  %623 = vmatprep.mubr.f32.mxu0 %v7464_v0 }
 0x12f   : > { %506 = vrot.lane.b32.xlu0 %v476_v29, %s4988_s19  ;;  %797 = vmatprep.mubr.f32.mxu1 %v7464_v0  ;;  %v505_v47 = vpop.permute.xlu1 %504 }
 0x130   : > { %v514_v52 = vsel %vm510_vm5, %v505_v47, %v491_v46  ;;  %v513_v61 = vsel %vm510_vm5, %v503_v44, %v505_v47 }
 0x131   : > { %4424 = vmatmul.mubr.msk.f32.gmra.mxu0 %vm534_vm2, %v4420_v36 }
 0x132   : > { %914 = vrot.lane.b32.xlu1 %v463_v34, %s4989_s20  ;;  %629 = vmatprep.mubr.f32.mxu0 %v7464_v0 }
 0x133   : > { %500 = vrot.lane.b32.xlu0 %v463_v34, %s4988_s19 }
 0x135   : > { %4425 = vmatmul.mubr.msk.f32.gmra.mxu0 %vm534_vm2, %v4421_v37 }
 0x136   : > { %912 = vrot.lane.b32.xlu1 %v468_v33, %s4989_s20  ;;  %4703 = vmatprep.mubr.msk.f32.mxu0 %vm534_vm2, %v483_v38 }
 0x137   : > { %918 = vrot.lane.b32.xlu0 %v5084_v21, %s4989_s20  ;;  %v4439_v21 = vld [vmem:[%s7453_s2 + $0x48] sm:$0xff] }
 0x13a   : > { %1166 = vperm.xlu1 %4959, %v1152_v40  }
 0x13b   : > { %916 = vrot.lane.b32.xlu0 %v464_v32, %s4989_s20 }
 0x13e   : > { %1161 = vperm.xlu1 %4959, %v1151_v43  }
 0x13f   : > { %1171 = vperm.xlu0 %4958, %v1153_v39  }
 0x143   : > { %1156 = vperm.xlu0 %4958, %v1150_v42  }
 0x193   : > { %v509_v49 = vpop.permute.xlu1 %508 }
 0x194   : > { %v493_v50 = vpop.permute.xlu0 %492 }
 0x195   : > { %v516_v51 = vsel %vm510_vm5, %v509_v49, %v493_v50 }
 0x196   : > { %4697 = vmatprep.subr.mxu0 %v516_v51 }
 0x197   : > { %4698 = vmatpush3.msra.mxu0 %v516_v51 }
 0x198   : > { %v489_v53 = vpop.permute.xlu1 %488  ;;  %4699 = vmatprep.subr.mxu0 %v514_v52 }
 0x199   : > { %v499_v54 = vpop.permute.xlu0 %498  ;;  %4700 = vmatpush3.msra.mxu0 %v514_v52 }
 0x19a   : > { %v526_v5 = vsel %vm510_vm5, %v489_v53, %v499_v54 }
 0x19c   : > { %v927_v55 = vpop.permute.xlu1 %926 }
 0x19d   : > { %v929_v56 = vpop.permute.xlu0 %928 }
 0x19e   : > { %v936_v6 = vsel %vm930_vm6, %v927_v55, %v929_v56 }
 0x1a0   : > { %v925_v57 = vpop.permute.xlu1 %924 }
 0x1a1   : > { %v507_v58 = vpop.permute.xlu0 %506  ;;  %v951_v7 = vsel %vm930_vm6, %v929_v56, %v925_v57  ;;  %v935_v9 = vsel %vm930_vm6, %v925_v57, %v927_v55 }
 0x1a2   : > { %v515_v59 = vsel %vm510_vm5, %v507_v58, %v509_v49  ;;  %v528_v60 = vsel %vm510_vm5, %v493_v50, %v507_v58 }
 0x1a3   : > { %759 = vmatprep.subr.mxu1 %v515_v59 }
 0x1a4   : > { %760 = vmatpush1.msra.mxu1 %v528_v60  ;;  %v915_v4 = vpop.permute.xlu1 %914 }
 0x1a5   : > { %761 = vmatprep.subr.mxu1 %v513_v61  ;;  %v501_v62 = vpop.permute.xlu0 %500 }
 0x1a6   : > { %762 = vmatpush1.msra.mxu1 %v527_v63  ;;  %v511_v1 = vsel %vm510_vm5, %v499_v54, %v501_v62  ;;  %v512_v2 = vsel %vm510_vm5, %v501_v62, %v489_v53  ;;  %v358_v53 = vld [vmem:[%s7452_s1] sm:$0x7] }
 0x1a7   : > { %763 = vmatprep.subr.mxu1 %v511_v1  ;;  %4701 = vmatprep.subr.mxu0 %v512_v2 }
 0x1a8   : > { %764 = vmatpush1.msra.mxu1 %v526_v5  ;;  %4702 = vmatpush3.msra.mxu0 %v512_v2  ;;  %v913_v15 = vpop.permute.xlu1 %912 }
 0x1a9   : > { %4430 = vmatmul.mubr.msk.f32.vlgmr.msra.gmra.mxu1 %vm534_vm2, %v483_v38  ;;  %4704 = vmatmul.mubr.msk.f32.vlgmr.msra.gmra.mxu0 %vm534_vm2, %v484_v3  ;;  %v919_v8 = vpop.permute.xlu0 %918  ;;  %v931_v19 = vsel %vm930_vm6, %v913_v15, %v915_v4  ;;  %v7462_v38 = vlaneseq }
 0x1aa   : > { %990 = vmatprep.subr.mxu0 %v936_v6  ;;  %4709 = vmatprep.subr.mxu1 %v951_v7  ;;  %v950_v10 = vsel %vm930_vm6, %v923_v45, %v919_v8  ;;  %v933_v13 = vsel %vm930_vm6, %v919_v8, %v921_v48 }
 0x1ab   : > { %991 = vmatpush1.msra.mxu0 %v935_v9  ;;  %4710 = vmatpush3.msra.mxu1 %v951_v7  ;;  %v5230_v42 = vshrl.u32 %v7462_v38, 7 }
 0x1ac   : > { %992 = vmatprep.subr.mxu0 %v934_v12  ;;  %4711 = vmatprep.subr.mxu1 %v950_v10 }
 0x1ad   : > { %803 = vmatprep.mubr.f32.mxu1 %v7464_v0  ;;  %4706 = vmatprep.mubr.msk.f32.mxu0 %vm534_vm2, %v485_v11  ;;  %v917_v16 = vpop.permute.xlu0 %916  ;;  %7519 = vst [vmem:[#allocation3_spill] sm:$0xff] %v5230_v42  ;;  %v1201_v49 = vsub.s32 0, %v5230_v42  ;;  %v1205_v58 = vsub.s32 1, %v5230_v42 }
 0x1ae   : > { %993 = vmatpush1.msra.mxu0 %v933_v13  ;;  %4712 = vmatpush3.msra.mxu1 %v950_v10  ;;  %v932_v17 = vsel %vm930_vm6, %v915_v4, %v917_v16  ;;  %v949_v18 = vsel %vm930_vm6, %v917_v16, %v913_v15 }
 0x1af   : > { %4431 = vmatmul.mubr.msk.f32.gmra.mxu1 %vm534_vm2, %v484_v3  ;;  %4707 = vmatmul.mubr.msk.f32.gmra.mxu0 %vm534_vm2, %v486_v14  ;;  %v5241_v61 = vrot.slane %v358_v53, %v1201_v49  ;;  %v5243_v8 = vrot.slane %v358_v53, %v1205_v58 }
 0x1b0   : > { %994 = vmatprep.subr.mxu0 %v932_v17  ;;  %4713 = vmatprep.subr.mxu1 %v949_v18 }
 0x1b1   : > { %809 = vmatprep.mubr.f32.mxu1 %v7464_v0  ;;  %995 = vmatpush1.msra.mxu0 %v931_v19  ;;  %7520 = vst [vmem:[#allocation4_spill] sm:$0xff] %v5241_v61  ;;  %7521 = vst [vmem:[#allocation5_spill] sm:$0xff] %v5243_v8 }
 0x1b2   : > { %1028 = vmatprep.mubr.f32.mxu0 %v7464_v0  ;;  %4714 = vmatpush3.msra.mxu1 %v949_v18  ;;  %v1209_v18 = vsub.s32 2, %v5230_v42 }
 0x1b3   : > { %4432 = vmatmul.mubr.msk.f32.gmra.mxu1 %vm534_vm2, %v485_v11  ;;  %4442 = vmatmul.mubr.msk.f32.vlgmr.msra.gmra.mxu0 %vm534_vm2, %v4438_v20 }
 0x1b4   : > { %815 = vmatprep.mubr.f32.mxu1 %v7464_v0  ;;  %1034 = vmatprep.mubr.f32.mxu0 %v7464_v0 }
 0x1b5   : > { %v5234_v48 = vpop.permute.xlu1 %1166 }
 0x1b7   : > { %4433 = vmatmul.mubr.msk.f32.gmra.mxu1 %vm534_vm2, %v486_v14  ;;  %4443 = vmatmul.mubr.msk.f32.gmra.mxu0 %vm534_vm2, %v4439_v21 }
 0x1b8   : > { %1040 = vmatprep.mubr.f32.mxu0 %v7464_v0  ;;  %4715 = vmatprep.mubr.msk.f32.mxu1 %vm534_vm2, %v4438_v20 }
 0x1b9   : > { %v1162_v5 = vpop.permute.xlu1 %1161 }
 0x1ba   : > { %v5227_v41 = vpop.permute.xlu0 %1171 }
 0x1bb   : > { %4444 = vmatmul.mubr.msk.f32.gmra.mxu0 %vm534_vm2, %v4440_v22  ;;  %4716 = vmatmul.mubr.msk.f32.vlgmr.msra.gmra.mxu1 %vm534_vm2, %v4439_v21 }
 0x1bc   : > { %1046 = vmatprep.mubr.f32.mxu0 %v7464_v0  ;;  %4718 = vmatprep.mubr.msk.f32.mxu1 %vm534_vm2, %v4440_v22 }
 0x1be   : > { %v1157_v50 = vpop.permute.xlu0 %1156 }
 0x1bf   : > { %4445 = vmatmul.mubr.msk.f32.gmra.mxu0 %vm534_vm2, %v4441_v23  ;;  %4719 = vmatmul.mubr.msk.f32.gmra.mxu1 %vm534_vm2, %v4441_v23 }
 0x1c0   : > { %1439 = vmatprep.mubr.f32.mxu0 %v7464_v0 }
 0x1e9   : > { %v613_v24 = vpop.f32.mrf.mxu0  ;;  %v4693_v28 = vpop.f32.mrf.mxu1 }
 0x1eb   : > { %v615_v25 = vpop.f32.mrf.mxu0  ;;  %v702_v30 = vpop.f32.mrf.mxu1 }
 0x1ed   : > { %v619_v26 = vpop.f32.mrf.mxu0  ;;  %v5221_v32 = vpop.f32.mrf.mxu1 }
 0x1ef   : > { %v621_v27 = vpop.f32.mrf.mxu0  ;;  %v5223_v34 = vpop.f32.mrf.mxu1 }
 0x1f1   : > { %v625_v29 = vpop.f32.mrf.mxu0 }
 0x1f3   : > { %v627_v31 = vpop.f32.mrf.mxu0 }
 0x1f5   : > { %v631_v33 = vpop.f32.mrf.mxu0 }
 0x1f7   : > { %v5225_v35 = vpop.f32.mrf.mxu0 }
 0x269   : > { %v799_v36 = vpop.f32.mrf.mxu1  ;;  %v4705_v37 = vpop.f32.mrf.mxu0 }
 0x26a   : > { %v800_v47 = vadd.f32 %v799_v36, %v613_v24  ;;  %v894_v6 = vadd.f32 %v4705_v37, %v4693_v28 }
 0x26b   : > { %v801_v39 = vpop.f32.mrf.mxu1  ;;  %v888_v40 = vpop.f32.mrf.mxu0 }
 0x26c   : > { %v802_v54 = vadd.f32 %v801_v39, %v615_v25  ;;  %v889_v23 = vadd.f32 %v888_v40, %v702_v30 }
 0x26f   : > { %v805_v43 = vpop.f32.mrf.mxu1  ;;  %v4708_v44 = vpop.f32.mrf.mxu0 }
 0x270   : > { %v806_v59 = vadd.f32 %v805_v43, %v619_v26  ;;  %v904_v30 = vadd.f32 %v4708_v44, %v5221_v32 }
 0x271   : > { %v807_v45 = vpop.f32.mrf.mxu1  ;;  %v5232_v46 = vpop.f32.mrf.mxu0 }
 0x272   : > { %v808_v7 = vadd.f32 %v807_v45, %v621_v27 }
 0x273   : > { %v811_v51 = vpop.f32.mrf.mxu1  ;;  %v1030_v52 = vpop.f32.mrf.mxu0 }
 0x274   : > { %v1138_v55 = vadd.f32 %v1030_v52, %v800_v47  ;;  %v812_v11 = vadd.f32 %v811_v51, %v625_v29  ;;  %v5263_v51 = vrot.slane %v358_v53, %v1209_v18  ;;  %v2425_v18 = vld [vmem:[%s7456_s5 + $0x10] sm:$0xff] }
 0x275   : > { %v813_v56 = vpop.f32.mrf.mxu1  ;;  %v1032_v57 = vpop.f32.mrf.mxu0 }
 0x276   : > { %v1139_v60 = vadd.f32 %v1032_v57, %v802_v54  ;;  %v1174_v62 = vadd.f32 %v1157_v50, %v1138_v55  ;;  %v814_v19 = vadd.f32 %v813_v56, %v627_v31  ;;  %7522 = vst [vmem:[#allocation6_spill] sm:$0xff] %v5263_v51 }
 0x277   : > { %v817_v63 = vpop.f32.mrf.mxu1  ;;  %v1036_v1 = vpop.f32.mrf.mxu0 }
 0x278   : > { %v1175_v2 = vadd.f32 %v1157_v50, %v1139_v60  ;;  %v1186_v3 = vmax.f32 %v1174_v62, 0.0  ;;  %v1141_v4 = vadd.f32 %v1036_v1, %v806_v59  ;;  %v818_v25 = vadd.f32 %v817_v63, %v631_v33 }
 0x279   : > { %v819_v9 = vpop.f32.mrf.mxu1  ;;  %v1038_v10 = vpop.f32.mrf.mxu0 }
 0x27a   : > { %v1187_v12 = vmax.f32 %v1175_v2, 0.0  ;;  %v5246_v13 = vmul.f32 %v5241_v61, %v1186_v3  ;;  %v1177_v14 = vadd.f32 %v1162_v5, %v1141_v4  ;;  %v1142_v15 = vadd.f32 %v1038_v10, %v808_v7 }
 0x27b   : > { %v1042_v16 = vpop.f32.mrf.mxu0  ;;  %v4717_v17 = vpop.f32.mrf.mxu1  ;;  %v820_v59 = vadd.f32 %v819_v9, %v5225_v35  ;;  %v899_v35 = vadd.f32 %v5232_v46, %v5223_v34 }
 0x27c   : > { %v1189_v20 = vmax.f32 %v1177_v14, 0.0  ;;  %v1144_v21 = vadd.f32 %v1042_v16, %v812_v11  ;;  %v1143_v22 = vadd.f32 %v4717_v17, %v894_v6  ;;  %1290 = vrot.lane.b32.xlu0 %v5246_v13, %s4987_s18  ;;  %v5252_v24 = vmul.f32 %v5243_v8, %v1187_v12  ;;  %v2430_v12 = vld [vmem:[%s7456_s5 + $0x38] sm:$0xff]  ;;  %v2429_v14 = vld [vmem:[%s7456_s5 + $0x30] sm:$0xff]  ;;  %v2427_v16 = vld [vmem:[%s7456_s5 + $0x20] sm:$0xff] }
 0x27d   : > { %v1178_v26 = vadd.f32 %v1162_v5, %v1142_v15  ;;  %v1044_v27 = vpop.f32.mrf.mxu0  ;;  %v1119_v28 = vpop.f32.mrf.mxu1  ;;  %v2428_v15 = vld [vmem:[%s7456_s5 + $0x28] sm:$0xff]  ;;  %v2426_v17 = vld [vmem:[%s7456_s5 + $0x18] sm:$0xff] }
 0x27e   : > { %v5255_v29 = vmul.f32 %v5241_v61, %v1189_v20  ;;  %v1180_v36 = vadd.f32 %v5234_v48, %v1144_v21  ;;  %v1179_v31 = vadd.f32 %v1162_v5, %v1143_v22  ;;  %v1145_v37 = vadd.f32 %v1044_v27, %v814_v19  ;;  %v2424_v19 = vld [vmem:[%s7456_s5 + $0x8] sm:$0xff]  ;;  %v2423_v20 = vld [vmem:[%s7456_s5] sm:$0xff] }
 0x27f   : > { %v1190_v39 = vmax.f32 %v1178_v26, 0.0  ;;  %v1140_v43 = vadd.f32 %v1119_v28, %v889_v23  ;;  %v1048_v45 = vpop.f32.mrf.mxu0  ;;  %v4720_v47 = vpop.f32.mrf.mxu1 }
 0x280   : > { %v1192_v40 = vmax.f32 %v1180_v36, 0.0  ;;  %v1147_v49 = vadd.f32 %v1048_v45, %v818_v25  ;;  %1296 = vrot.lane.b32.xlu1 %v5255_v29, %s4987_s18  ;;  %1292 = vrot.lane.b32.xlu0 %v5252_v24, %s4987_s18  ;;  %v1191_v33 = vmax.f32 %v1179_v31, 0.0  ;;  %v1181_v52 = vadd.f32 %v5234_v48, %v1145_v37 }
 0x281   : > { %v1176_v54 = vadd.f32 %v1157_v50, %v1140_v43  ;;  %v5267_v55 = vmul.f32 %v5243_v8, %v1190_v39  ;;  %v1149_v44 = vadd.f32 %v4720_v47, %v904_v30  ;;  %v1050_v58 = vpop.f32.mrf.mxu0  ;;  %v1129_v2 = vpop.f32.mrf.mxu1 }
 0x282   : > { %v5270_v56 = vmul.f32 %v5241_v61, %v1192_v40  ;;  %v1183_v32 = vadd.f32 %v5227_v41, %v1147_v49  ;;  %v5279_v50 = vmul.f32 %v5263_v51, %v1191_v33  ;;  %v1193_v53 = vmax.f32 %v1181_v52, 0.0 }
 0x283   : > { %v1188_v57 = vmax.f32 %v1176_v54, 0.0  ;;  %v1185_v63 = vadd.f32 %v5227_v41, %v1149_v44  ;;  %v1148_v1 = vadd.f32 %v1050_v58, %v820_v59  ;;  %v1146_v3 = vadd.f32 %v1129_v2, %v899_v35 }
 0x284   : > { %1298 = vrot.lane.b32.xlu1 %v5267_v55, %s4987_s18  ;;  %1302 = vrot.lane.b32.xlu0 %v5270_v56, %s4987_s18  ;;  %v1195_v62 = vmax.f32 %v1183_v32, 0.0  ;;  %v5292_v4 = vmul.f32 %v5243_v8, %v1193_v53 }
 0x285   : > { %v5282_v60 = vmul.f32 %v5263_v51, %v1188_v57  ;;  %v1197_v6 = vmax.f32 %v1185_v63, 0.0  ;;  %v1184_v7 = vadd.f32 %v5227_v41, %v1148_v1  ;;  %v1182_v9 = vadd.f32 %v5234_v48, %v1146_v3  ;;  %v5335_v48 = vld [vmem:[%s7455_s4] sm:$0xff] }
 0x286   : > { %v5295_v5 = vmul.f32 %v5241_v61, %v1195_v62  ;;  %4745 = vmatprep.mubr.msk.f32.mxu1 %vm1350_vm7, %v5335_v48 }
 0x287   : > { %v5303_v34 = vmul.f32 %v5263_v51, %v1197_v6  ;;  %v1196_v46 = vmax.f32 %v1184_v7, 0.0  ;;  %v1194_v10 = vmax.f32 %v1182_v9, 0.0 }
 0x288   : > { %1294 = vrot.lane.b32.xlu1 %v5282_v60, %s4987_s18  ;;  %1300 = vrot.lane.b32.xlu0 %v5279_v50, %s4987_s18 }
 0x289   : > { %v5311_v41 = vmul.f32 %v5243_v8, %v1196_v46  ;;  %v5318_v11 = vmul.f32 %v5263_v51, %v1194_v10 }
 0x28c   : > { %1308 = vrot.lane.b32.xlu1 %v5295_v5, %s4987_s18  ;;  %1304 = vrot.lane.b32.xlu0 %v5292_v4, %s4987_s18 }
 0x290   : > { %1262 = vrot.lane.b32.xlu1 %v5295_v5, %s4986_s17  ;;  %1312 = vrot.lane.b32.xlu0 %v5303_v34, %s4987_s18 }
 0x294   : > { %1310 = vrot.lane.b32.xlu1 %v5311_v41, %s4987_s18  ;;  %1258 = vrot.lane.b32.xlu0 %v5270_v56, %s4986_s17 }
 0x298   : > { %1306 = vrot.lane.b32.xlu1 %v5318_v11, %s4987_s18  ;;  %1256 = vrot.lane.b32.xlu0 %v5267_v55, %s4986_s17 }
 0x29c   : > { %1236 = vrot.lane.b32.xlu1 %v5303_v34, %s4986_s17  ;;  %1250 = vrot.lane.b32.xlu0 %v5246_v13, %s4986_s17 }
 0x2a0   : > { %1260 = vrot.lane.b32.xlu1 %v5292_v4, %s4986_s17  ;;  %1264 = vrot.lane.b32.xlu0 %v5311_v41, %s4986_s17 }
 0x2a4   : > { %1254 = vrot.lane.b32.xlu1 %v5255_v29, %s4986_s17  ;;  %1234 = vrot.lane.b32.xlu0 %v5318_v11, %s4986_s17 }
 0x2a8   : > { %1232 = vrot.lane.b32.xlu1 %v5279_v50, %s4986_s17  ;;  %1230 = vrot.lane.b32.xlu0 %v5282_v60, %s4986_s17 }
 0x2ac   : > { %1252 = vrot.lane.b32.xlu1 %v5252_v24, %s4986_s17  ;;  %2468 = vperm.xlu0 %4958, %v2430_v12  }
 0x2b0   : > { %2463 = vperm.xlu1 %4959, %v2429_v14   ;;  %2458 = vperm.xlu0 %4958, %v2428_v15  }
 0x2b4   : > { %2453 = vperm.xlu1 %4959, %v2427_v16   ;;  %2448 = vperm.xlu0 %4958, %v2426_v17  }
 0x2b8   : > { %2443 = vperm.xlu1 %4959, %v2425_v18   ;;  %2438 = vperm.xlu0 %4958, %v2424_v19  }
 0x2bc   : > { %2433 = vperm.xlu1 %4959, %v2423_v20  }
 0x2ee   : > { %v1291_v21 = vpop.permute.xlu0 %1290 }
 0x2f2   : > { %v1297_v22 = vpop.permute.xlu1 %1296  ;;  %v1293_v23 = vpop.permute.xlu0 %1292 }
 0x2f3   : > { %v5423_v1 = vsel %vm475_vm3, %v1291_v21, %v1293_v23 }
 0x2f6   : > { %v1299_v25 = vpop.permute.xlu1 %1298  ;;  %v1303_v26 = vpop.permute.xlu0 %1302 }
 0x2f7   : > { %v5410_v53 = vsel %vm475_vm3, %v1297_v22, %v1299_v25 }
 0x2fa   : > { %v1295_v27 = vpop.permute.xlu1 %1294  ;;  %v1301_v28 = vpop.permute.xlu0 %1300 }
 0x2fb   : > { %v5400_v44 = vsel %vm475_vm3, %v1301_v28, %v1297_v22  ;;  %v5405_v57 = vsel %vm475_vm3, %v1299_v25, %v1301_v28  ;;  %v5413_v62 = vsel %vm475_vm3, %v1295_v27, %v1291_v21  ;;  %v5418_v63 = vsel %vm475_vm3, %v1293_v23, %v1295_v27  ;;  %v1343_v23 = vld [vmem:[%s7455_s4 + $0x8] sm:$0xff]  ;;  %v1346_v27 = vld [vmem:[%s7455_s4 + $0x20] sm:$0xff] }
 0x2fc   : > { %v1347_v28 = vld [vmem:[%s7455_s4 + $0x28] sm:$0xff] }
 0x2fe   : > { %v1309_v36 = vpop.permute.xlu1 %1308  ;;  %v1305_v31 = vpop.permute.xlu0 %1304 }
 0x2ff   : > { %v5397_v32 = vsel %vm475_vm3, %v1303_v26, %v1305_v31 }
 0x302   : > { %v1263_v37 = vpop.permute.xlu1 %1262  ;;  %v1313_v39 = vpop.permute.xlu0 %1312 }
 0x303   : > { %v5374_v43 = vsel %vm475_vm3, %v1313_v39, %v1309_v36 }
 0x304   : > { %4721 = vmatprep.subr.mxu1 %v5374_v43 }
 0x305   : > { %4722 = vmatpush3.msra.mxu1 %v5374_v43 }
 0x306   : > { %v1311_v45 = vpop.permute.xlu1 %1310  ;;  %v5378_v47 = vpop.permute.xlu0 %1258 }
 0x307   : > { %v5381_v30 = vsel %vm475_vm3, %v1311_v45, %v1313_v39  ;;  %v5384_v40 = vsel %vm475_vm3, %v1309_v36, %v1311_v45  ;;  %v1348_v36 = vld [vmem:[%s7455_s4 + $0x30] sm:$0xff]  ;;  %v4467_v39 = vld [vmem:[%s7455_s4 + $0x48] sm:$0xff]  ;;  %v4469_v45 = vld [vmem:[%s7455_s4 + $0x58] sm:$0xff] }
 0x308   : > { %1383 = vmatprep.subr.mxu0 %v5381_v30 }
 0x309   : > { %1384 = vmatpush1.msra.mxu0 %v5384_v40 }
 0x30a   : > { %v1307_v49 = vpop.permute.xlu1 %1306  ;;  %v1257_v33 = vpop.permute.xlu0 %1256 }
 0x30b   : > { %v5389_v52 = vsel %vm475_vm3, %v1307_v49, %v1303_v26  ;;  %v5392_v54 = vsel %vm475_vm3, %v1305_v31, %v1307_v49  ;;  %v1345_v26 = vld [vmem:[%s7455_s4 + $0x18] sm:$0xff] }
 0x30c   : > { %1385 = vmatprep.subr.mxu0 %v5392_v54  ;;  %4723 = vmatprep.subr.mxu1 %v5389_v52  ;;  %v1349_v31 = vld [vmem:[%s7455_s4 + $0x38] sm:$0xff] }
 0x30d   : > { %1386 = vmatpush1.msra.mxu0 %v5397_v32  ;;  %4724 = vmatpush3.msra.mxu1 %v5389_v52 }
 0x30e   : > { %v1237_v58 = vpop.permute.xlu1 %1236  ;;  %1387 = vmatprep.subr.mxu0 %v5405_v57  ;;  %4725 = vmatprep.subr.mxu1 %v5400_v44  ;;  %v1251_v59 = vpop.permute.xlu0 %1250 }
 0x30f   : > { %1388 = vmatpush1.msra.mxu0 %v5410_v53  ;;  %4726 = vmatpush3.msra.mxu1 %v5400_v44  ;;  %v5452_v10 = vsel %vm462_vm4, %v1237_v58, %v1263_v37 }
 0x310   : > { %1389 = vmatprep.subr.mxu0 %v5418_v63  ;;  %4727 = vmatprep.subr.mxu1 %v5413_v62 }
 0x311   : > { %1390 = vmatpush1.msra.mxu0 %v5423_v1  ;;  %4728 = vmatpush3.msra.mxu1 %v5413_v62 }
 0x312   : > { %v1261_v2 = vpop.permute.xlu1 %1260  ;;  %1391 = vmatprep.subr.mxu0 %v5311_v41  ;;  %4729 = vmatprep.subr.mxu1 %v5303_v34  ;;  %v1265_v35 = vpop.permute.xlu0 %1264 }
 0x313   : > { %1392 = vmatpush1.msra.mxu0 %v5295_v5  ;;  %4730 = vmatpush3.msra.mxu1 %v5303_v34  ;;  %v5442_v7 = vsel %vm462_vm4, %v1265_v35, %v1237_v58  ;;  %v5447_v46 = vsel %vm462_vm4, %v1263_v37, %v1265_v35  ;;  %v5461_v14 = vsel %vm462_vm4, %v5378_v47, %v1261_v2  ;;  %v4466_v37 = vld [vmem:[%s7455_s4 + $0x40] sm:$0xff] }
 0x314   : > { %1393 = vmatprep.subr.mxu0 %v5292_v4  ;;  %4731 = vmatprep.subr.mxu1 %v5318_v11 }
 0x315   : > { %1394 = vmatpush1.msra.mxu0 %v5270_v56  ;;  %4732 = vmatpush3.msra.mxu1 %v5318_v11 }
 0x316   : > { %v1255_v3 = vpop.permute.xlu1 %1254  ;;  %1395 = vmatprep.subr.mxu0 %v5267_v55  ;;  %4733 = vmatprep.subr.mxu1 %v5279_v50  ;;  %v1235_v6 = vpop.permute.xlu0 %1234 }
 0x317   : > { %1396 = vmatpush1.msra.mxu0 %v5255_v29  ;;  %4734 = vmatpush3.msra.mxu1 %v5279_v50  ;;  %v5455_v12 = vsel %vm462_vm4, %v1261_v2, %v1235_v6  ;;  %v5467_v15 = vsel %vm462_vm4, %v1235_v6, %v5378_v47  ;;  %v5475_v18 = vsel %vm462_vm4, %v1255_v3, %v1257_v33 }
 0x318   : > { %1397 = vmatprep.subr.mxu0 %v5252_v24  ;;  %4735 = vmatprep.subr.mxu1 %v5282_v60 }
 0x319   : > { %1398 = vmatpush1.msra.mxu0 %v5246_v13  ;;  %4736 = vmatpush3.msra.mxu1 %v5282_v60 }
 0x31a   : > { %v1233_v9 = vpop.permute.xlu1 %1232  ;;  %1399 = vmatprep.subr.mxu0 %v5447_v46  ;;  %4737 = vmatprep.subr.mxu1 %v5442_v7  ;;  %v1231_v17 = vpop.permute.xlu0 %1230 }
 0x31b   : > { %1400 = vmatpush1.msra.mxu0 %v5452_v10  ;;  %4738 = vmatpush3.msra.mxu1 %v5442_v7  ;;  %v5470_v16 = vsel %vm462_vm4, %v1257_v33, %v1233_v9  ;;  %v5480_v20 = vsel %vm462_vm4, %v1233_v9, %v1255_v3  ;;  %v5496_v25 = vsel %vm462_vm4, %v1231_v17, %v1251_v59 }
 0x31c   : > { %1401 = vmatprep.subr.mxu0 %v5461_v14  ;;  %4739 = vmatprep.subr.mxu1 %v5455_v12 }
 0x31d   : > { %1402 = vmatpush1.msra.mxu0 %v5467_v15  ;;  %4740 = vmatpush3.msra.mxu1 %v5455_v12 }
 0x31e   : > { %v1253_v19 = vpop.permute.xlu1 %1252  ;;  %1403 = vmatprep.subr.mxu0 %v5475_v18  ;;  %4741 = vmatprep.subr.mxu1 %v5470_v16 }
 0x31f   : > { %v5483_v21 = vsel %vm462_vm4, %v1253_v19, %v1231_v17  ;;  %1404 = vmatpush1.msra.mxu0 %v5480_v20  ;;  %4742 = vmatpush3.msra.mxu1 %v5470_v16  ;;  %v5488_v22 = vsel %vm462_vm4, %v1251_v59, %v1253_v19 }
 0x320   : > { %1405 = vmatprep.subr.mxu0 %v5488_v22  ;;  %4743 = vmatprep.subr.mxu1 %v5483_v21 }
 0x321   : > { %1406 = vmatpush1.msra.mxu0 %v5496_v25  ;;  %4744 = vmatpush3.msra.mxu1 %v5483_v21 }
 0x322   : > { %4450 = vmatmul.mubr.msk.f32.vlgmr.msra.gmra.mxu0 %vm1350_vm7, %v5335_v48  ;;  %4746 = vmatmul.mubr.msk.f32.vlgmr.msra.gmra.mxu1 %vm1350_vm7, %v1343_v23  ;;  %v1344_v48 = vld [vmem:[%s7455_s4 + $0x10] sm:$0xff] }
 0x323   : > { %1786 = vmatprep.subr.mxu1 %v5381_v30  ;;  %4757 = vmatprep.subr.mxu0 %v5374_v43 }
 0x324   : > { %1787 = vmatpush1.msra.mxu1 %v5384_v40  ;;  %4758 = vmatpush3.msra.mxu0 %v5374_v43 }
 0x325   : > { %1788 = vmatprep.subr.mxu1 %v5392_v54  ;;  %4759 = vmatprep.subr.mxu0 %v5389_v52 }
 0x326   : > { %1445 = vmatprep.mubr.f32.mxu0 %v7464_v0  ;;  %1789 = vmatpush1.msra.mxu1 %v5397_v32 }
 0x327   : > { %4760 = vmatpush3.msra.mxu0 %v5389_v52  ;;  %1790 = vmatprep.subr.mxu1 %v5405_v57 }
 0x328   : > { %4451 = vmatmul.mubr.msk.f32.gmra.mxu0 %vm1350_vm7, %v1343_v23  ;;  %4761 = vmatprep.subr.mxu0 %v5400_v44 }
 0x329   : > { %1791 = vmatpush1.msra.mxu1 %v5410_v53  ;;  %4762 = vmatpush3.msra.mxu0 %v5400_v44 }
 0x32a   : > { %1792 = vmatprep.subr.mxu1 %v5418_v63  ;;  %4763 = vmatprep.subr.mxu0 %v5413_v62 }
 0x32b   : > { %1451 = vmatprep.mubr.f32.mxu0 %v7464_v0  ;;  %4748 = vmatprep.mubr.msk.f32.mxu1 %vm1350_vm7, %v1344_v48 }
 0x32c   : > { %1793 = vmatpush1.msra.mxu1 %v5423_v1  ;;  %4764 = vmatpush3.msra.mxu0 %v5413_v62 }
 0x32d   : > { %4452 = vmatmul.mubr.msk.f32.gmra.mxu0 %vm1350_vm7, %v1344_v48  ;;  %4749 = vmatmul.mubr.msk.f32.gmra.mxu1 %vm1350_vm7, %v1345_v26 }
 0x32e   : > { %1794 = vmatprep.subr.mxu1 %v5311_v41  ;;  %4765 = vmatprep.subr.mxu0 %v5303_v34 }
 0x32f   : > { %1795 = vmatpush1.msra.mxu1 %v5295_v5  ;;  %4766 = vmatpush3.msra.mxu0 %v5303_v34 }
 0x330   : > { %1796 = vmatprep.subr.mxu1 %v5292_v4  ;;  %4767 = vmatprep.subr.mxu0 %v5318_v11 }
 0x331   : > { %1457 = vmatprep.mubr.f32.mxu0 %v7464_v0  ;;  %4751 = vmatprep.mubr.msk.f32.mxu1 %vm1350_vm7, %v1346_v27 }
 0x332   : > { %1797 = vmatpush1.msra.mxu1 %v5270_v56  ;;  %4768 = vmatpush3.msra.mxu0 %v5318_v11 }
 0x333   : > { %4453 = vmatmul.mubr.msk.f32.gmra.mxu0 %vm1350_vm7, %v1345_v26  ;;  %4752 = vmatmul.mubr.msk.f32.gmra.mxu1 %vm1350_vm7, %v1347_v28 }
 0x334   : > { %1798 = vmatprep.subr.mxu1 %v5267_v55  ;;  %4769 = vmatprep.subr.mxu0 %v5279_v50 }
 0x335   : > { %1799 = vmatpush1.msra.mxu1 %v5255_v29  ;;  %4770 = vmatpush3.msra.mxu0 %v5279_v50 }
 0x336   : > { %1800 = vmatprep.subr.mxu1 %v5252_v24  ;;  %4771 = vmatprep.subr.mxu0 %v5282_v60 }
 0x337   : > { %1463 = vmatprep.mubr.f32.mxu0 %v7464_v0  ;;  %1801 = vmatpush1.msra.mxu1 %v5246_v13 }
 0x338   : > { %4772 = vmatpush3.msra.mxu0 %v5282_v60  ;;  %1802 = vmatprep.subr.mxu1 %v5447_v46 }
 0x339   : > { %4454 = vmatmul.mubr.msk.f32.gmra.mxu0 %vm1350_vm7, %v1346_v27  ;;  %4773 = vmatprep.subr.mxu0 %v5442_v7 }
 0x33a   : > { %1803 = vmatpush1.msra.mxu1 %v5452_v10  ;;  %4774 = vmatpush3.msra.mxu0 %v5442_v7 }
 0x33b   : > { %1804 = vmatprep.subr.mxu1 %v5461_v14  ;;  %4775 = vmatprep.subr.mxu0 %v5455_v12 }
 0x33c   : > { %1469 = vmatprep.mubr.f32.mxu0 %v7464_v0  ;;  %4754 = vmatprep.mubr.msk.f32.mxu1 %vm1350_vm7, %v1348_v36 }
 0x33d   : > { %1805 = vmatpush1.msra.mxu1 %v5467_v15  ;;  %4776 = vmatpush3.msra.mxu0 %v5455_v12 }
 0x33e   : > { %4455 = vmatmul.mubr.msk.f32.gmra.mxu0 %vm1350_vm7, %v1347_v28  ;;  %4755 = vmatmul.mubr.msk.f32.gmra.mxu1 %vm1350_vm7, %v1349_v31 }
 0x33f   : > { %1806 = vmatprep.subr.mxu1 %v5475_v18  ;;  %4777 = vmatprep.subr.mxu0 %v5470_v16 }
 0x340   : > { %1807 = vmatpush1.msra.mxu1 %v5480_v20  ;;  %4778 = vmatpush3.msra.mxu0 %v5470_v16 }
 0x341   : > { %1808 = vmatprep.subr.mxu1 %v5488_v22  ;;  %4779 = vmatprep.subr.mxu0 %v5483_v21 }
 0x342   : > { %1475 = vmatprep.mubr.f32.mxu0 %v7464_v0  ;;  %1809 = vmatpush1.msra.mxu1 %v5496_v25 }
 0x343   : > { %1842 = vmatprep.mubr.f32.mxu1 %v7464_v0  ;;  %4780 = vmatpush3.msra.mxu0 %v5483_v21 }
 0x344   : > { %4456 = vmatmul.mubr.msk.f32.gmra.mxu0 %vm1350_vm7, %v1348_v36  ;;  %4474 = vmatmul.mubr.msk.f32.vlgmr.msra.gmra.mxu1 %vm1350_vm7, %v4466_v37 }
 0x345   : > { %2061 = vmatprep.subr.mxu0 %v5381_v30  ;;  %4793 = vmatprep.subr.mxu1 %v5374_v43 }
 0x346   : > { %4794 = vmatpush3.msra.mxu1 %v5374_v43  ;;  %1481 = vmatprep.mubr.f32.mxu0 %v7464_v0  ;;  %v4468_v43 = vld [vmem:[%s7455_s4 + $0x50] sm:$0xff] }
 0x347   : > { %4795 = vmatprep.subr.mxu1 %v5389_v52  ;;  %1848 = vmatprep.mubr.f32.mxu1 %v7464_v0 }
 0x348   : > { %4796 = vmatpush3.msra.mxu1 %v5389_v52  ;;  %4457 = vmatmul.mubr.msk.f32.gmra.mxu0 %vm1350_vm7, %v1349_v31 }
 0x349   : > { %4475 = vmatmul.mubr.msk.f32.gmra.mxu1 %vm1350_vm7, %v4467_v39  ;;  %4797 = vmatprep.subr.mxu1 %v5400_v44 }
 0x34a   : > { %4798 = vmatpush3.msra.mxu1 %v5400_v44  ;;  %1854 = vmatprep.mubr.f32.mxu1 %v7464_v0 }
 0x34b   : > { %4799 = vmatprep.subr.mxu1 %v5413_v62  ;;  %4781 = vmatprep.mubr.msk.f32.mxu0 %vm1350_vm7, %v4466_v37 }
 0x34c   : > { %4800 = vmatpush3.msra.mxu1 %v5413_v62  ;;  %4782 = vmatmul.mubr.msk.f32.vlgmr.msra.gmra.mxu0 %vm1350_vm7, %v4467_v39 }
 0x34d   : > { %4476 = vmatmul.mubr.msk.f32.gmra.mxu1 %vm1350_vm7, %v4468_v43  ;;  %2062 = vmatpush1.msra.mxu0 %v5384_v40 }
 0x34e   : > { %4801 = vmatprep.subr.mxu1 %v5303_v34  ;;  %2063 = vmatprep.subr.mxu0 %v5392_v54 }
 0x34f   : > { %4802 = vmatpush3.msra.mxu1 %v5303_v34  ;;  %2064 = vmatpush1.msra.mxu0 %v5397_v32  ;;  %v4470_v34 = vld [vmem:[%s7455_s4 + $0x60] sm:$0xff] }
 0x350   : > { %4803 = vmatprep.subr.mxu1 %v5318_v11  ;;  %1860 = vmatprep.mubr.f32.mxu1 %v7464_v0 }
 0x351   : > { %2065 = vmatprep.subr.mxu0 %v5405_v57  ;;  %4804 = vmatpush3.msra.mxu1 %v5318_v11  ;;  %v4497_v11 = vld [vmem:[%s7455_s4 + $0xb8] sm:$0xff] }
 0x352   : > { %4477 = vmatmul.mubr.msk.f32.gmra.mxu1 %vm1350_vm7, %v4469_v45  ;;  %2066 = vmatpush1.msra.mxu0 %v5410_v53 }
 0x353   : > { %4805 = vmatprep.subr.mxu1 %v5279_v50  ;;  %2067 = vmatprep.subr.mxu0 %v5418_v63 }
 0x354   : > { %4806 = vmatpush3.msra.mxu1 %v5279_v50  ;;  %2068 = vmatpush1.msra.mxu0 %v5423_v1  ;;  %v4471_v50 = vld [vmem:[%s7455_s4 + $0x68] sm:$0xff] }
 0x355   : > { %4807 = vmatprep.subr.mxu1 %v5282_v60  ;;  %1866 = vmatprep.mubr.f32.mxu1 %v7464_v0 }
 0x356   : > { %2069 = vmatprep.subr.mxu0 %v5311_v41  ;;  %4808 = vmatpush3.msra.mxu1 %v5282_v60  ;;  %v4493_v60 = vld [vmem:[%s7455_s4 + $0x98] sm:$0xff]  ;;  %v4496_v41 = vld [vmem:[%s7455_s4 + $0xb0] sm:$0xff] }
 0x357   : > { %4478 = vmatmul.mubr.msk.f32.gmra.mxu1 %vm1350_vm7, %v4470_v34  ;;  %2070 = vmatpush1.msra.mxu0 %v5295_v5  ;;  %v4495_v5 = vld [vmem:[%s7455_s4 + $0xa8] sm:$0xff] }
 0x358   : > { %4809 = vmatprep.subr.mxu1 %v5442_v7  ;;  %2071 = vmatprep.subr.mxu0 %v5292_v4  ;;  %v4494_v4 = vld [vmem:[%s7455_s4 + $0xa0] sm:$0xff] }
 0x359   : > { %4810 = vmatpush3.msra.mxu1 %v5442_v7  ;;  %2072 = vmatpush1.msra.mxu0 %v5270_v56  ;;  %v4492_v56 = vld [vmem:[%s7455_s4 + $0x90] sm:$0xff] }
 0x35a   : > { %4811 = vmatprep.subr.mxu1 %v5455_v12  ;;  %1872 = vmatprep.mubr.f32.mxu1 %v7464_v0 }
 0x35b   : > { %2073 = vmatprep.subr.mxu0 %v5267_v55  ;;  %4812 = vmatpush3.msra.mxu1 %v5455_v12  ;;  %v4472_v55 = vld [vmem:[%s7455_s4 + $0x70] sm:$0xff] }
 0x35c   : > { %4479 = vmatmul.mubr.msk.f32.gmra.mxu1 %vm1350_vm7, %v4471_v50  ;;  %2074 = vmatpush1.msra.mxu0 %v5255_v29  ;;  %v4491_v29 = vld [vmem:[%s7455_s4 + $0x88] sm:$0xff] }
 0x35d   : > { %4813 = vmatprep.subr.mxu1 %v5470_v16  ;;  %2075 = vmatprep.subr.mxu0 %v5252_v24  ;;  %v4490_v24 = vld [vmem:[%s7455_s4 + $0x80] sm:$0xff] }
 0x35e   : > { %4814 = vmatpush3.msra.mxu1 %v5470_v16  ;;  %2076 = vmatpush1.msra.mxu0 %v5246_v13  ;;  %v4473_v13 = vld [vmem:[%s7455_s4 + $0x78] sm:$0xff] }
 0x35f   : > { %4815 = vmatprep.subr.mxu1 %v5483_v21  ;;  %1878 = vmatprep.mubr.f32.mxu1 %v7464_v0 }
 0x360   : > { %4784 = vmatprep.mubr.msk.f32.mxu0 %vm1350_vm7, %v4468_v43  ;;  %2077 = vmatprep.subr.mxu0 %v5447_v46 }
 0x361   : > { %4816 = vmatpush3.msra.mxu1 %v5483_v21  ;;  %4785 = vmatmul.mubr.msk.f32.gmra.mxu0 %vm1350_vm7, %v4469_v45 }
 0x362   : > { %4480 = vmatmul.mubr.msk.f32.gmra.mxu1 %vm1350_vm7, %v4472_v55  ;;  %2078 = vmatpush1.msra.mxu0 %v5452_v10 }
 0x363   : > { %2079 = vmatprep.subr.mxu0 %v5461_v14  ;;  %1884 = vmatprep.mubr.f32.mxu1 %v7464_v0 }
 0x364   : > { %2080 = vmatpush1.msra.mxu0 %v5467_v15  ;;  %4787 = vmatprep.mubr.msk.f32.mxu0 %vm1350_vm7, %v4470_v34 }
 0x365   : > { %2081 = vmatprep.subr.mxu0 %v5475_v18  ;;  %4788 = vmatmul.mubr.msk.f32.gmra.mxu0 %vm1350_vm7, %v4471_v50 }
 0x366   : > { %4481 = vmatmul.mubr.msk.f32.gmra.mxu1 %vm1350_vm7, %v4473_v13  ;;  %2082 = vmatpush1.msra.mxu0 %v5480_v20 }
 0x367   : > { %2083 = vmatprep.subr.mxu0 %v5488_v22  ;;  %4790 = vmatprep.mubr.msk.f32.mxu0 %vm1350_vm7, %v4472_v55 }
 0x368   : > { %2084 = vmatpush1.msra.mxu0 %v5496_v25  ;;  %4817 = vmatprep.mubr.msk.f32.mxu1 %vm1350_vm7, %v4490_v24 }
 0x369   : > { %4791 = vmatmul.mubr.msk.f32.gmra.mxu0 %vm1350_vm7, %v4473_v13  ;;  %2885 = vmatprep.subr.mxu1 %v7464_v0 }
 0x36a   : > { %4818 = vmatmul.mubr.msk.f32.vlgmr.msra.gmra.mxu1 %vm1350_vm7, %v4491_v29  ;;  %2117 = vmatprep.mubr.f32.mxu0 %v7464_v0 }
 0x36b   : > { %4820 = vmatprep.mubr.msk.f32.mxu1 %vm1350_vm7, %v4492_v56 }
 0x36d   : > { %4498 = vmatmul.mubr.msk.f32.vlgmr.msra.gmra.mxu0 %vm1350_vm7, %v4490_v24 }
 0x36e   : > { %4821 = vmatmul.mubr.msk.f32.gmra.mxu1 %vm1350_vm7, %v4493_v60  ;;  %2123 = vmatprep.mubr.f32.mxu0 %v7464_v0 }
 0x36f   : > { %4823 = vmatprep.mubr.msk.f32.mxu1 %vm1350_vm7, %v4494_v4 }
 0x371   : > { %4499 = vmatmul.mubr.msk.f32.gmra.mxu0 %vm1350_vm7, %v4491_v29 }
 0x372   : > { %2129 = vmatprep.mubr.f32.mxu0 %v7464_v0  ;;  %4824 = vmatmul.mubr.msk.f32.gmra.mxu1 %vm1350_vm7, %v4495_v5 }
 0x373   : > { %4826 = vmatprep.mubr.msk.f32.mxu1 %vm1350_vm7, %v4496_v41 }
 0x375   : > { %4500 = vmatmul.mubr.msk.f32.gmra.mxu0 %vm1350_vm7, %v4492_v56 }
 0x376   : > { %4827 = vmatmul.mubr.msk.f32.gmra.mxu1 %vm1350_vm7, %v4497_v11  ;;  %2135 = vmatprep.mubr.f32.mxu0 %v7464_v0 }
 0x379   : > { %4501 = vmatmul.mubr.msk.f32.gmra.mxu0 %vm1350_vm7, %v4493_v60 }
 0x37a   : > { %2141 = vmatprep.mubr.f32.mxu0 %v7464_v0 }
 0x37d   : > { %4502 = vmatmul.mubr.msk.f32.gmra.mxu0 %vm1350_vm7, %v4494_v4 }
 0x37e   : > { %2147 = vmatprep.mubr.f32.mxu0 %v7464_v0 }
 0x381   : > { %4503 = vmatmul.mubr.msk.f32.gmra.mxu0 %vm1350_vm7, %v4495_v5 }
 0x382   : > { %2153 = vmatprep.mubr.f32.mxu0 %v7464_v0 }
 0x385   : > { %4504 = vmatmul.mubr.msk.f32.gmra.mxu0 %vm1350_vm7, %v4496_v41 }
 0x386   : > { %2159 = vmatprep.mubr.f32.mxu0 %v7464_v0 }
 0x389   : > { %4505 = vmatmul.mubr.msk.f32.gmra.mxu0 %vm1350_vm7, %v4497_v11 }
 0x3e2   : > { %v4747_v47 = vpop.f32.mrf.mxu1  ;;  %v1441_v30 = vpop.f32.mrf.mxu0 }
 0x3e3   : > { %1603 = vrot.lane.b32.xlu0 %v4747_v47, %s4988_s19 }
 0x3e4   : > { %v1554_v40 = vpop.f32.mrf.mxu1  ;;  %v1443_v49 = vpop.f32.mrf.mxu0 }
 0x3e5   : > { %1601 = vrot.lane.b32.xlu1 %v1554_v40, %s4988_s19 }
 0x3e7   : > { %1641 = vrot.lane.b32.xlu0 %v1441_v30, %s4988_s19 }
 0x3e8   : > { %v1447_v33 = vpop.f32.mrf.mxu0 }
 0x3e9   : > { %1643 = vrot.lane.b32.xlu1 %v1443_v49, %s4988_s19 }
 0x3ea   : > { %v1449_v52 = vpop.f32.mrf.mxu0 }
 0x3ed   : > { %v4750_v54 = vpop.f32.mrf.mxu1  ;;  %v1453_v32 = vpop.f32.mrf.mxu0 }
 0x3ee   : > { %1607 = vrot.lane.b32.xlu0 %v4750_v54, %s4988_s19 }
 0x3ef   : > { %v1564_v44 = vpop.f32.mrf.mxu1  ;;  %v1455_v57 = vpop.f32.mrf.mxu0 }
 0x3f0   : > { %1605 = vrot.lane.b32.xlu1 %v1564_v44, %s4988_s19  ;;  %v5816_v44 = vpop.permute.xlu1 %2463 }
 0x3f1   : > { %7524 = vst [vmem:[#allocation8_spill] sm:$0xff] %v5816_v44 }
 0x3f3   : > { %v4753_v58 = vpop.f32.mrf.mxu1  ;;  %v1459_v59 = vpop.f32.mrf.mxu0 }
 0x3f4   : > { %1611 = vrot.lane.b32.xlu0 %v4753_v58, %s4988_s19  ;;  %1645 = vrot.lane.b32.xlu1 %v1447_v33, %s4988_s19 }
 0x3f5   : > { %v1461_v53 = vpop.f32.mrf.mxu0  ;;  %v1574_v62 = vpop.f32.mrf.mxu1 }
 0x3f8   : > { %1647 = vrot.lane.b32.xlu0 %v1449_v52, %s4988_s19  ;;  %1609 = vrot.lane.b32.xlu1 %v1574_v62, %s4988_s19  ;;  %v5823_v62 = vpop.permute.xlu1 %2453 }
 0x3f9   : > { %v1465_v63 = vpop.f32.mrf.mxu0  ;;  %7526 = vst [vmem:[#allocation10_spill] sm:$0xff] %v5823_v62 }
 0x3fb   : > { %v1467_v1 = vpop.f32.mrf.mxu0 }
 0x3fc   : > { %1649 = vrot.lane.b32.xlu0 %v1453_v32, %s4988_s19 }
 0x3fe   : > { %v4756_v2 = vpop.f32.mrf.mxu1  ;;  %v1471_v35 = vpop.f32.mrf.mxu0 }
 0x3ff   : > { %1615 = vrot.lane.b32.xlu1 %v4756_v2, %s4988_s19  ;;  %v5830_v2 = vpop.permute.xlu1 %2443 }
 0x400   : > { %1655 = vrot.lane.b32.xlu0 %v1461_v53, %s4988_s19  ;;  %v1584_v3 = vpop.f32.mrf.mxu1  ;;  %v1473_v6 = vpop.f32.mrf.mxu0  ;;  %7528 = vst [vmem:[#allocation12_spill] sm:$0xff] %v5830_v2 }
 0x401   : > { %v5821_v53 = vpop.permute.xlu0 %2468 }
 0x402   : > { %7525 = vst [vmem:[#allocation9_spill] sm:$0xff] %v5821_v53 }
 0x403   : > { %1651 = vrot.lane.b32.xlu1 %v1455_v57, %s4988_s19 }
 0x404   : > { %v5748_v7 = vpop.f32.mrf.mxu1  ;;  %1657 = vrot.lane.b32.xlu0 %v1465_v63, %s4988_s19  ;;  %v1477_v9 = vpop.f32.mrf.mxu0 }
 0x406   : > { %v5751_v46 = vpop.f32.mrf.mxu1  ;;  %v1479_v14 = vpop.f32.mrf.mxu0 }
 0x407   : > { %1613 = vrot.lane.b32.xlu1 %v1584_v3, %s4988_s19 }
 0x408   : > { %1663 = vrot.lane.b32.xlu0 %v1473_v6, %s4988_s19  ;;  %v1483_v17 = vpop.f32.mrf.mxu0 }
 0x409   : > { %v5755_v10 = vpop.f32.mrf.mxu1 }
 0x40a   : > { %v1485_v20 = vpop.f32.mrf.mxu0 }
 0x40b   : > { %v5757_v12 = vpop.f32.mrf.mxu1  ;;  %1653 = vrot.lane.b32.xlu1 %v1459_v59, %s4988_s19 }
 0x40c   : > { %1665 = vrot.lane.b32.xlu0 %v1477_v9, %s4988_s19  ;;  %v5777_v23 = vpop.f32.mrf.mxu0  ;;  %v5837_v9 = vpop.permute.xlu1 %2433 }
 0x40d   : > { %v5761_v15 = vpop.f32.mrf.mxu1  ;;  %7530 = vst [vmem:[#allocation14_spill] sm:$0xff] %v5837_v9 }
 0x40e   : > { %v5784_v26 = vpop.f32.mrf.mxu0 }
 0x40f   : > { %v5763_v16 = vpop.f32.mrf.mxu1  ;;  %1659 = vrot.lane.b32.xlu1 %v1467_v1, %s4988_s19  ;;  %v5828_v1 = vpop.permute.xlu0 %2458 }
 0x410   : > { %1669 = vrot.lane.b32.xlu0 %v1483_v17, %s4988_s19  ;;  %7527 = vst [vmem:[#allocation11_spill] sm:$0xff] %v5828_v1 }
 0x412   : > { %v5767_v18 = vpop.f32.mrf.mxu1 }
 0x413   : > { %1661 = vrot.lane.b32.xlu1 %v1471_v35, %s4988_s19  ;;  %v5835_v6 = vpop.permute.xlu0 %2448 }
 0x414   : > { %v5770_v19 = vpop.f32.mrf.mxu1  ;;  %7529 = vst [vmem:[#allocation13_spill] sm:$0xff] %v5835_v6 }
 0x417   : > { %v5772_v21 = vpop.f32.mrf.mxu1  ;;  %1667 = vrot.lane.b32.xlu1 %v1479_v14, %s4988_s19  ;;  %v5842_v17 = vpop.permute.xlu0 %2438 }
 0x418   : > { %7531 = vst [vmem:[#allocation15_spill] sm:$0xff] %v5842_v17 }
 0x419   : > { %v5775_v22 = vpop.f32.mrf.mxu1 }
 0x41b   : > { %1671 = vrot.lane.b32.xlu1 %v1485_v20, %s4988_s19 }
 0x41c   : > { %v5780_v25 = vpop.f32.mrf.mxu1 }
 0x41e   : > { %v5782_v48 = vpop.f32.mrf.mxu1 }
 0x421   : > { %v5786_v27 = vpop.f32.mrf.mxu0 }
 0x422   : > { %v5788_v28 = vpop.f32.mrf.mxu1 }
 0x423   : > { %v5790_v36 = vpop.f32.mrf.mxu0 }
 0x424   : > { %v5792_v31 = vpop.f32.mrf.mxu1 }
 0x425   : > { %v5794_v37 = vpop.f32.mrf.mxu0 }
 0x426   : > { %v5796_v39 = vpop.f32.mrf.mxu1 }
 0x427   : > { %v5798_v43 = vpop.f32.mrf.mxu0 }
 0x428   : > { %v5800_v45 = vpop.f32.mrf.mxu1 }
 0x429   : > { %v5802_v34 = vpop.f32.mrf.mxu0 }
 0x42a   : > { %7523 = vst [vmem:[#allocation7_spill] sm:$0xff] %v5802_v34  ;;  %v4819_v50 = vpop.f32.mrf.mxu1 }
 0x42b   : > { %2305 = vrot.lane.b32.xlu0 %v4819_v50, %s4989_s20  ;;  %v5805_v55 = vpop.f32.mrf.mxu0 }
 0x42c   : > { %v2232_v13 = vpop.f32.mrf.mxu1 }
 0x42d   : > { %v2119_v24 = vpop.f32.mrf.mxu0 }
 0x42e   : > { %v4822_v29 = vpop.f32.mrf.mxu1 }
 0x42f   : > { %2295 = vrot.lane.b32.xlu0 %v2119_v24, %s4989_s20  ;;  %v2121_v56 = vpop.f32.mrf.mxu0 }
 0x430   : > { %v2242_v60 = vpop.f32.mrf.mxu1 }
 0x431   : > { %2311 = vrot.lane.b32.xlu1 %v2242_v60, %s4989_s20  ;;  %v2125_v4 = vpop.f32.mrf.mxu0 }
 0x432   : > { %v4825_v41 = vpop.f32.mrf.mxu1 }
 0x433   : > { %2317 = vrot.lane.b32.xlu0 %v4822_v29, %s4989_s20  ;;  %v2127_v5 = vpop.f32.mrf.mxu0 }
 0x434   : > { %v2252_v30 = vpop.f32.mrf.mxu1 }
 0x435   : > { %2303 = vrot.lane.b32.xlu1 %v2127_v5, %s4989_s20  ;;  %v2131_v11 = vpop.f32.mrf.mxu0 }
 0x436   : > { %v4828_v49 = vpop.f32.mrf.mxu1 }
 0x437   : > { %2301 = vrot.lane.b32.xlu0 %v2125_v4, %s4989_s20  ;;  %v2133_v47 = vpop.f32.mrf.mxu0 }
 0x438   : > { %v2262_v54 = vpop.f32.mrf.mxu1 }
 0x439   : > { %2307 = vrot.lane.b32.xlu1 %v2131_v11, %s4989_s20  ;;  %v2137_v40 = vpop.f32.mrf.mxu0 }
 0x43b   : > { %2329 = vrot.lane.b32.xlu0 %v4825_v41, %s4989_s20  ;;  %v2139_v33 = vpop.f32.mrf.mxu0 }
 0x43d   : > { %2323 = vrot.lane.b32.xlu1 %v2252_v30, %s4989_s20  ;;  %v2143_v52 = vpop.f32.mrf.mxu0 }
 0x43f   : > { %2309 = vrot.lane.b32.xlu0 %v2133_v47, %s4989_s20  ;;  %v2145_v32 = vpop.f32.mrf.mxu0 }
 0x441   : > { %2335 = vrot.lane.b32.xlu1 %v2262_v54, %s4989_s20  ;;  %v2149_v57 = vpop.f32.mrf.mxu0 }
 0x443   : > { %2341 = vrot.lane.b32.xlu0 %v4828_v49, %s4989_s20  ;;  %v2151_v58 = vpop.f32.mrf.mxu0 }
 0x445   : > { %2315 = vrot.lane.b32.xlu1 %v2139_v33, %s4989_s20  ;;  %v2155_v59 = vpop.f32.mrf.mxu0 }
 0x447   : > { %2313 = vrot.lane.b32.xlu0 %v2137_v40, %s4989_s20  ;;  %v2157_v63 = vpop.f32.mrf.mxu0 }
 0x449   : > { %2319 = vrot.lane.b32.xlu1 %v2143_v52, %s4989_s20  ;;  %v2161_v35 = vpop.f32.mrf.mxu0 }
 0x44b   : > { %2321 = vrot.lane.b32.xlu0 %v2145_v32, %s4989_s20  ;;  %v2163_v3 = vpop.f32.mrf.mxu0 }
 0x44d   : > { %2327 = vrot.lane.b32.xlu1 %v2151_v58, %s4989_s20 }
 0x44f   : > { %2325 = vrot.lane.b32.xlu0 %v2149_v57, %s4989_s20 }
 0x451   : > { %2331 = vrot.lane.b32.xlu1 %v2155_v59, %s4989_s20 }
 0x453   : > { %2333 = vrot.lane.b32.xlu0 %v2157_v63, %s4989_s20 }
 0x455   : > { %2339 = vrot.lane.b32.xlu1 %v2163_v3, %s4989_s20  ;;  %v1604_v20 = vpop.permute.xlu0 %1603 }
 0x457   : > { %2337 = vrot.lane.b32.xlu0 %v2161_v35, %s4989_s20  ;;  %v1602_v14 = vpop.permute.xlu1 %1601 }
 0x459   : > { %2297 = vrot.lane.b32.xlu1 %v2121_v56, %s4989_s20  ;;  %v1642_v24 = vpop.permute.xlu0 %1641 }
 0x45a   : > { %v1713_v1 = vsel %vm510_vm5, %v1602_v14, %v1642_v24 }
 0x45b   : > { %2299 = vrot.lane.b32.xlu0 %v2232_v13, %s4989_s20  ;;  %v1644_v50 = vpop.permute.xlu1 %1643 }
 0x45c   : > { %v1673_v53 = vsel %vm510_vm5, %v1642_v24, %v1644_v50 }
 0x460   : > { %v1608_v60 = vpop.permute.xlu0 %1607 }
 0x462   : > { %v1606_v29 = vpop.permute.xlu1 %1605 }
 0x466   : > { %v1646_v4 = vpop.permute.xlu1 %1645  ;;  %v1612_v5 = vpop.permute.xlu0 %1611 }
 0x467   : > { %v1714_v62 = vsel %vm510_vm5, %v1604_v20, %v1646_v4 }
 0x46a   : > { %v1610_v41 = vpop.permute.xlu1 %1609  ;;  %v1648_v11 = vpop.permute.xlu0 %1647 }
 0x46b   : > { %v1675_v6 = vsel %vm510_vm5, %v1646_v4, %v1648_v11  ;;  %v1676_v2 = vsel %vm510_vm5, %v1648_v11, %v1604_v20  ;;  %v1999_v4 = vadd.f32 %v5755_v10, %v1714_v62 }
 0x46c   : > { %v2000_v20 = vadd.f32 %v5757_v12, %v1675_v6 }
 0x46e   : > { %v1650_v30 = vpop.permute.xlu0 %1649 }
 0x46f   : > { %v1715_v17 = vsel %vm510_vm5, %v1606_v29, %v1650_v30 }
 0x471   : > { %v5846_v47 = vpop.permute.xlu1 %1615 }
 0x472   : > { %v1656_v49 = vpop.permute.xlu0 %1655 }
 0x473   : > { %v1680_v24 = vsel %vm510_vm5, %v1656_v49, %v1608_v60 }
 0x475   : > { %v1652_v40 = vpop.permute.xlu1 %1651 }
 0x476   : > { %v1658_v52 = vpop.permute.xlu0 %1657  ;;  %v1678_v11 = vsel %vm510_vm5, %v1652_v40, %v1606_v29 }
 0x477   : > { %v2004_v6 = vadd.f32 %v5790_v36, %v1678_v11  ;;  %v7536_v11 = vld [vmem:[#allocation7_spill] sm:$0xff] }
 0x479   : > { %v5848_v33 = vpop.permute.xlu1 %1613 }
 0x47a   : > { %v1664_v54 = vpop.permute.xlu0 %1663 }
 0x47d   : > { %v1654_v56 = vpop.permute.xlu1 %1653 }
 0x47e   : > { %v5850_v32 = vpop.permute.xlu0 %1665  ;;  %v1679_v10 = vsel %vm510_vm5, %v1654_v56, %v1656_v49  ;;  %v1716_v12 = vsel %vm510_vm5, %v1608_v60, %v1654_v56 }
 0x47f   : > { %v2005_v60 = vadd.f32 %v5767_v18, %v1716_v12 }
 0x481   : > { %v1660_v13 = vpop.permute.xlu1 %1659 }
 0x482   : > { %v5852_v58 = vpop.permute.xlu0 %1669 }
 0x485   : > { %v1662_v57 = vpop.permute.xlu1 %1661 }
 0x486   : > { %v1718_v36 = vsel %vm510_vm5, %v1612_v5, %v1662_v57  ;;  %v1683_v49 = vsel %vm510_vm5, %v1662_v57, %v1664_v54 }
 0x487   : > { %v2011_v18 = vadd.f32 %v5780_v25, %v1718_v36 }
 0x489   : > { %v5854_v59 = vpop.permute.xlu1 %1667 }
 0x48d   : > { %v5856_v35 = vpop.permute.xlu1 %1671 }
 0x48e   : > { %v1687_v25 = vsel %vm510_vm5, %v5852_v58, %v5856_v35 }
 0x49d   : > { %v2306_v63 = vpop.permute.xlu0 %2305 }
 0x4a1   : > { %v5858_v3 = vpop.permute.xlu0 %2295 }
 0x4a2   : > { %7532 = vst [vmem:[#allocation16_spill] sm:$0xff] %v5858_v3  ;;  %v1674_v3 = vsel %vm510_vm5, %v1644_v50, %v1602_v14  ;;  %v1677_v14 = vsel %vm510_vm5, %v1650_v30, %v1652_v40  ;;  %v2007_v30 = vadd.f32 %v5786_v27, %v1680_v24  ;;  %v1720_v27 = vsel %vm510_vm5, %v5846_v47, %v5852_v58 }
 0x4a3   : > { %v2312_v38 = vpop.permute.xlu1 %2311  ;;  %v5892_v50 = vadd.f32 %v5784_v26, %v1674_v3  ;;  %v2003_v26 = vadd.f32 %v5763_v16, %v1677_v14  ;;  %v2006_v40 = vadd.f32 %v5770_v19, %v1679_v10 }
 0x4a5   : > { %v5860_v0 = vpop.permute.xlu0 %2317 }
 0x4a7   : > { %v5862_v42 = vpop.permute.xlu1 %2303 }
 0x4a9   : > { %v5864_v9 = vpop.permute.xlu0 %2301 }
 0x4aa   : > { %v2392_v56 = vsel %vm930_vm6, %v2306_v63, %v5864_v9 }
 0x4ab   : > { %v5866_v51 = vpop.permute.xlu1 %2307 }
 0x4ac   : > { %v2393_v19 = vsel %vm930_vm6, %v2312_v38, %v5866_v51 }
 0x4ad   : > { %v5868_v61 = vpop.permute.xlu0 %2329  ;;  %v2407_v3 = vadd.f32 %v2393_v19, %v2004_v6 }
 0x4ae   : > { %7533 = vst [vmem:[#allocation17_spill] sm:$0xff] %v5868_v61  ;;  %v5884_v61 = vadd.f32 %v5748_v7, %v1713_v1  ;;  %v2001_v7 = vadd.f32 %v5777_v23, %v1676_v2  ;;  %v1684_v1 = vsel %vm510_vm5, %v1664_v54, %v1612_v5  ;;  %v1719_v23 = vsel %vm510_vm5, %v5848_v33, %v5850_v32 }
 0x4af   : > { %v5870_v8 = vpop.permute.xlu1 %2323  ;;  %v1682_v2 = vsel %vm510_vm5, %v1660_v13, %v1610_v41  ;;  %v5917_v16 = vadd.f32 %v5794_v37, %v1684_v1 }
 0x4b0   : > { %7534 = vst [vmem:[#allocation18_spill] sm:$0xff] %v5870_v8  ;;  %v5887_v8 = vadd.f32 %v5751_v46, %v1673_v53  ;;  %v2002_v46 = vadd.f32 %v5761_v15, %v1715_v17  ;;  %v1717_v53 = vsel %vm510_vm5, %v1610_v41, %v1658_v52  ;;  %v1681_v15 = vsel %vm510_vm5, %v1658_v52, %v1660_v13 }
 0x4b1   : > { %v5874_v44 = vpop.permute.xlu0 %2309  ;;  %v5914_v17 = vadd.f32 %v5772_v21, %v1717_v53  ;;  %v2346_v21 = vsel %vm930_vm6, %v5862_v42, %v2306_v63  ;;  %v2014_v41 = vadd.f32 %v5788_v28, %v1719_v23  ;;  %v2009_v37 = vadd.f32 %v5775_v22, %v1681_v15 }
 0x4b2   : > { %v2010_v52 = vadd.f32 %v5798_v43, %v1682_v2  ;;  %v5934_v13 = vadd.f32 %v5796_v39, %v1720_v27  ;;  %v2348_v54 = vsel %vm930_vm6, %v5874_v44, %v2312_v38  ;;  %v2012_v28 = vadd.f32 %v5782_v48, %v1683_v49 }
 0x4b3   : > { %v5881_v34 = vpop.permute.xlu1 %2335  ;;  %v1685_v22 = vsel %vm510_vm5, %v5850_v32, %v5854_v59  ;;  %v1686_v43 = vsel %vm510_vm5, %v5854_v59, %v5848_v33  ;;  %v2403_v39 = vadd.f32 %v2346_v21, %v2000_v20  ;;  %v1688_v38 = vsel %vm510_vm5, %v5856_v35, %v5846_v47 }
 0x4b4   : > { %7535 = vst [vmem:[#allocation19_spill] sm:$0xff] %v5881_v34  ;;  %v2404_v63 = vadd.f32 %v2392_v56, %v2001_v7  ;;  %v2345_v32 = vsel %vm930_vm6, %v5864_v9, %v5862_v42  ;;  %v2406_v33 = vadd.f32 %v2348_v54, %v2003_v26  ;;  %v2015_v14 = vadd.f32 %v5792_v31, %v1685_v22  ;;  %v7537_v9 = vld [vmem:[#allocation15_spill] sm:$0xff] }
 0x4b5   : > { %v5897_v34 = vpop.permute.xlu0 %2341  ;;  %v2016_v58 = vadd.f32 %v5805_v55, %v1686_v43  ;;  %v2347_v47 = vsel %vm930_vm6, %v5866_v51, %v5874_v44  ;;  %v2018_v20 = vadd.f32 %v5800_v45, %v1687_v25  ;;  %v2019_v42 = vadd.f32 %v7536_v11, %v1688_v38  ;;  %v7539_v44 = vld [vmem:[#allocation12_spill] sm:$0xff]  ;;  %v7540_v23 = vld [vmem:[#allocation17_spill] sm:$0xff] }
 0x4b6   : > { %v5970_v7 = vadd.f32 %v7537_v9, %v2403_v39  ;;  %v5972_v26 = vadd.f32 %v2345_v32, %v1999_v4  ;;  %v5975_v31 = vadd.f32 %v7537_v9, %v2404_v63  ;;  %v5982_v45 = vadd.f32 %v2347_v47, %v2002_v46 }
 0x4b7   : > { %v2316_v62 = vpop.permute.xlu1 %2315  ;;  %v7538_v10 = vld [vmem:[#allocation18_spill] sm:$0xff]  ;;  %v5985_v12 = vadd.f32 %v7539_v44, %v2406_v33  ;;  %v7544_v33 = vld [vmem:[#allocation8_spill] sm:$0xff] }
 0x4b8   : > { %v2350_v48 = vsel %vm930_vm6, %v2316_v62, %v5860_v0 }
 0x4b9   : > { %v2314_v29 = vpop.permute.xlu0 %2313  ;;  %v2409_v53 = vadd.f32 %v2350_v48, %v2006_v40 }
 0x4ba   : > { %v2349_v59 = vsel %vm930_vm6, %v2314_v29, %v2316_v62  ;;  %v2394_v35 = vsel %vm930_vm6, %v5860_v0, %v2314_v29  ;;  %v5980_v0 = vadd.f32 %v7539_v44, %v2407_v3  ;;  %v7542_v29 = vld [vmem:[#allocation13_spill] sm:$0xff] }
 0x4bb   : > { %v2320_v5 = vpop.permute.xlu1 %2319  ;;  %v2408_v55 = vadd.f32 %v2349_v59, %v2005_v60  ;;  %v2410_v62 = vadd.f32 %v2394_v35, %v2007_v30  ;;  %v7541_v27 = vld [vmem:[#allocation19_spill] sm:$0xff]  ;;  %v5995_v60 = vadd.f32 %v7542_v29, %v2409_v53 }
 0x4bc   : > { %v2395_v51 = vsel %vm930_vm6, %v7538_v10, %v2320_v5  ;;  %v7546_v53 = vld [vmem:[#allocation11_spill] sm:$0xff] }
 0x4bd   : > { %v2322_v57 = vpop.permute.xlu0 %2321  ;;  %v2413_v46 = vadd.f32 %v2395_v51, %v2010_v52  ;;  %v6000_v21 = vadd.f32 %v7542_v29, %v2408_v55  ;;  %v6007_v22 = vadd.f32 %v7542_v29, %v2410_v62 }
 0x4be   : > { %v2352_v4 = vsel %vm930_vm6, %v2322_v57, %v7538_v10  ;;  %v2351_v56 = vsel %vm930_vm6, %v2320_v5, %v2322_v57  ;;  %v7543_v5 = vld [vmem:[#allocation10_spill] sm:$0xff]  ;;  %v7547_v10 = vld [vmem:[#allocation16_spill] sm:$0xff] }
 0x4bf   : > { %v2328_v24 = vpop.permute.xlu1 %2327  ;;  %v2412_v43 = vadd.f32 %v2352_v4, %v2009_v37  ;;  %v6013_v57 = vadd.f32 %v7543_v5, %v2413_v46  ;;  %v2411_v3 = vadd.f32 %v2351_v56, %v5914_v17 }
 0x4c0   : > { %v2354_v15 = vsel %vm930_vm6, %v2328_v24, %v7540_v23 }
 0x4c1   : > { %v2326_v1 = vpop.permute.xlu0 %2325  ;;  %v2415_v52 = vadd.f32 %v2354_v15, %v2012_v28  ;;  %v2484_v28 = vadd.f32 %v7543_v5, %v2412_v43 }
 0x4c2   : > { %v2353_v2 = vsel %vm930_vm6, %v2326_v1, %v2328_v24  ;;  %v2396_v40 = vsel %vm930_vm6, %v7540_v23, %v2326_v1 }
 0x4c3   : > { %v2332_v6 = vpop.permute.xlu1 %2331  ;;  %v2414_v39 = vadd.f32 %v2353_v2, %v2011_v18  ;;  %v2416_v38 = vadd.f32 %v2396_v40, %v5917_v16 }
 0x4c4   : > { %v2397_v36 = vsel %vm930_vm6, %v7541_v27, %v2332_v6 }
 0x4c5   : > { %v2419_v30 = vadd.f32 %v2397_v36, %v2016_v58  ;;  %v2334_v49 = vpop.permute.xlu0 %2333  ;;  %v2486_v1 = vadd.f32 %v7546_v53, %v2414_v39  ;;  %v2488_v55 = vadd.f32 %v7546_v53, %v2416_v38 }
 0x4c6   : > { %v2355_v19 = vsel %vm930_vm6, %v2332_v6, %v2334_v49  ;;  %v2356_v54 = vsel %vm930_vm6, %v2334_v49, %v7541_v27  ;;  %v7548_v27 = vld [vmem:[#allocation5_spill] sm:$0xff] }
 0x4c7   : > { %v2340_v25 = vpop.permute.xlu1 %2339  ;;  %v2417_v63 = vadd.f32 %v2355_v19, %v2014_v41  ;;  %v2418_v48 = vadd.f32 %v2356_v54, %v2015_v14  ;;  %v2491_v59 = vadd.f32 %v7544_v33, %v2419_v30  ;;  %v7545_v14 = vld [vmem:[#allocation9_spill] sm:$0xff]  ;;  %v2483_v30 = vadd.f32 %v7543_v5, %v2411_v3 }
 0x4c8   : > { %v2358_v32 = vsel %vm930_vm6, %v2340_v25, %v5897_v34  ;;  %v2510_v54 = vmax.f32 %v2486_v1, 0.0  ;;  %v2512_v43 = vmax.f32 %v2488_v55, 0.0 }
 0x4c9   : > { %v2421_v24 = vadd.f32 %v2358_v32, %v2018_v20  ;;  %v2338_v58 = vpop.permute.xlu0 %2337  ;;  %v2489_v37 = vadd.f32 %v7544_v33, %v2417_v63  ;;  %v2490_v18 = vadd.f32 %v7544_v33, %v2418_v48  ;;  %v2487_v20 = vadd.f32 %v7546_v53, %v2415_v52  ;;  %v7549_v52 = vld [vmem:[#allocation4_spill] sm:$0xff]  ;;  %v7551_v48 = vld [vmem:[#allocation14_spill] sm:$0xff] }
 0x4ca   : > { %v2357_v16 = vsel %vm930_vm6, %v2338_v58, %v2340_v25  ;;  %v2398_v41 = vsel %vm930_vm6, %v5897_v34, %v2338_v58  ;;  %v2515_v62 = vmax.f32 %v2491_v59, 0.0  ;;  %v7550_v25 = vld [vmem:[#allocation6_spill] sm:$0xff]  ;;  %v2509_v63 = vmax.f32 %v6013_v57, 0.0 }
 0x4cb   : > { %v2493_v47 = vadd.f32 %v7545_v14, %v2421_v24  ;;  %v2420_v35 = vadd.f32 %v2357_v16, %v5934_v13  ;;  %v2422_v17 = vadd.f32 %v2398_v41, %v2019_v42  ;;  %v2298_v11 = vpop.permute.xlu1 %2297  ;;  %v2513_v15 = vmax.f32 %v2489_v37, 0.0 }
 0x4cc   : > { %v2343_v51 = vsel %vm930_vm6, %v7547_v10, %v2298_v11  ;;  %v2514_v13 = vmax.f32 %v2490_v18, 0.0  ;;  %v2511_v49 = vmax.f32 %v2487_v20, 0.0  ;;  %v6056_v5 = vmul.f32 %v2515_v62, %v7550_v25 }
 0x4cd   : > { %v2517_v6 = vmax.f32 %v2493_v47, 0.0  ;;  %v2492_v34 = vadd.f32 %v7545_v14, %v2420_v35  ;;  %v2494_v4 = vadd.f32 %v7545_v14, %v2422_v17  ;;  %v2300_v23 = vpop.permute.xlu0 %2299  ;;  %v2399_v40 = vadd.f32 %v2343_v51, %v5884_v61 }
 0x4ce   : > { %v2344_v42 = vsel %vm930_vm6, %v2298_v11, %v2300_v23  ;;  %v2391_v2 = vsel %vm930_vm6, %v2300_v23, %v7547_v10  ;;  %v6051_v61 = vmul.f32 %v2514_v13, %v7548_v27  ;;  %v6059_v3 = vmul.f32 %v2513_v15, %v7549_v52  ;;  %v3527_v23 = vld [vmem:[%s7458_s7 + $0x18] sm:$0xff]  ;;  %v3526_v15 = vld [vmem:[%s7458_s7 + $0x10] sm:$0xff]  ;;  %v3525_v13 = vld [vmem:[%s7458_s7 + $0x8] sm:$0xff] }
 0x4cf   : > { %v6036_v36 = vmul.f32 %v2517_v6, %v7548_v27  ;;  %v2516_v29 = vmax.f32 %v2492_v34, 0.0  ;;  %v2518_v46 = vmax.f32 %v2494_v4, 0.0  ;;  %v2400_v56 = vadd.f32 %v2344_v42, %v5887_v8  ;;  %v2776_v4 = vld [vmem:[%s7457_s6 + $0x8] sm:$0xff] }
 0x4d0   : > { %v2401_v19 = vadd.f32 %v2391_v2, %v5892_v50  ;;  %v2508_v50 = vmax.f32 %v2484_v28, 0.0  ;;  %v2471_v33 = vadd.f32 %v7551_v48, %v2399_v40  ;;  %v2507_v57 = vmax.f32 %v2483_v30, 0.0  ;;  %4518 = vmatprep.mubr.msk.f32.mxu1 %vm2783_vm8, %v2776_v4  ;;  %4514 = vmatprep.mubr.msk.f32.mxu0 %vm2783_vm8, %v2776_v4 }
 0x4d1   : > { %v6043_v39 = vmul.f32 %v2516_v29, %v7549_v52  ;;  %v6046_v38 = vmul.f32 %v2518_v46, %v7550_v25  ;;  %2796 = vmatprep.subr.mxu0 %v6036_v36  ;;  %v2472_v32 = vadd.f32 %v7551_v48, %v2400_v56  ;;  %v6065_v59 = vmul.f32 %v2511_v49, %v7548_v27 }
 0x4d2   : > { %v2473_v8 = vadd.f32 %v7551_v48, %v2401_v19  ;;  %v7552_v37 = vmov 0.0   ;;  %v2477_v18 = vadd.f32 %v7539_v44, %v5982_v45  ;;  %v2505_v16 = vmax.f32 %v5995_v60, 0.0 }
 0x4d3   : > { %2797 = vmatpush1.msra.mxu0 %v6043_v39  ;;  %2886 = vmatpush1.msra.mxu1 %v6046_v38  ;;  %v2496_v24 = vmax.f32 %v2472_v32, 0.0  ;;  %v6073_v41 = vmul.f32 %v2510_v54, %v7549_v52  ;;  %v6076_v28 = vmul.f32 %v2512_v43, %v7550_v25  ;;  %v2504_v14 = vmax.f32 %v6000_v21, 0.0 }
 0x4d4   : > { %v2497_v58 = vmax.f32 %v2473_v8, 0.0  ;;  %2798 = vmatprep.subr.mxu0 %v6051_v61  ;;  %2887 = vmatprep.subr.mxu1 %v7552_v37  ;;  %v2506_v47 = vmax.f32 %v6007_v22, 0.0  ;;  %v2474_v45 = vadd.f32 %v7537_v9, %v5972_v26  ;;  %v2500_v60 = vmax.f32 %v5975_v31, 0.0 }
 0x4d5   : > { %2799 = vmatpush1.msra.mxu0 %v6059_v3  ;;  %2888 = vmatpush1.msra.mxu1 %v6056_v5  ;;  %v6083_v35 = vmul.f32 %v2496_v24, %v7548_v27  ;;  %v6094_v17 = vmul.f32 %v2508_v50, %v7548_v27  ;;  %v2495_v21 = vmax.f32 %v2471_v33, 0.0  ;;  %v2502_v22 = vmax.f32 %v5985_v12, 0.0 }
 0x4d6   : > { %v6086_v44 = vmul.f32 %v2497_v58, %v7550_v25  ;;  %2800 = vmatprep.subr.mxu0 %v6065_v59  ;;  %2889 = vmatprep.subr.mxu1 %v7552_v37  ;;  %v6100_v11 = vmul.f32 %v2509_v63, %v7550_v25  ;;  %v6103_v53 = vmul.f32 %v2507_v57, %v7549_v52  ;;  %v2503_v9 = vmax.f32 %v5980_v0, 0.0 }
 0x4d7   : > { %2801 = vmatpush1.msra.mxu0 %v6073_v41  ;;  %2890 = vmatpush1.msra.mxu1 %v6076_v28  ;;  %v2501_v26 = vmax.f32 %v2477_v18, 0.0  ;;  %v6111_v31 = vmul.f32 %v2505_v16, %v7548_v27  ;;  %v2499_v12 = vmax.f32 %v5970_v7, 0.0  ;;  %v6117_v20 = vmul.f32 %v2504_v14, %v7549_v52 }
 0x4d8   : > { %2551 = vrot.lane.b32.xlu0 %v6086_v44, %s4986_s17  ;;  %2593 = vrot.lane.b32.xlu1 %v6083_v35, %s4986_s17  ;;  %v6120_v1 = vmul.f32 %v2506_v47, %v7550_v25  ;;  %v2498_v0 = vmax.f32 %v2474_v45, 0.0  ;;  %v6125_v55 = vmul.f32 %v2500_v60, %v7550_v25  ;;  %v6128_v10 = vmul.f32 %v2495_v21, %v7549_v52 }
 0x4d9   : > { %2802 = vmatprep.subr.mxu0 %v6094_v17  ;;  %2891 = vmatprep.subr.mxu1 %v7552_v37  ;;  %v6133_v7 = vmul.f32 %v2502_v22, %v7548_v27  ;;  %v6138_v51 = vmul.f32 %v2503_v9, %v7550_v25  ;;  %v6141_v62 = vmul.f32 %v2501_v26, %v7549_v52 }
 0x4da   : > { %2803 = vmatpush1.msra.mxu0 %v6103_v53  ;;  %2892 = vmatpush1.msra.mxu1 %v6100_v11  ;;  %v6148_v6 = vmul.f32 %v2499_v12, %v7548_v27  ;;  %v6153_v34 = vmul.f32 %v2498_v0, %v7549_v52 }
 0x4db   : > { %2804 = vmatprep.subr.mxu0 %v6111_v31  ;;  %2893 = vmatprep.subr.mxu1 %v7552_v37 }
 0x4dc   : > { %2805 = vmatpush1.msra.mxu0 %v6117_v20  ;;  %2894 = vmatpush1.msra.mxu1 %v6120_v1 }
 0x4dd   : > { %2591 = vrot.lane.b32.xlu0 %v6128_v10, %s4986_s17  ;;  %2553 = vrot.lane.b32.xlu1 %v6125_v55, %s4986_s17 }
 0x4de   : > { %2806 = vmatprep.subr.mxu0 %v6133_v7  ;;  %2895 = vmatprep.subr.mxu1 %v7552_v37 }
 0x4df   : > { %2807 = vmatpush1.msra.mxu0 %v6141_v62  ;;  %2896 = vmatpush1.msra.mxu1 %v6138_v51 }
 0x4e0   : > { %2808 = vmatprep.subr.mxu0 %v6148_v6  ;;  %2897 = vmatprep.subr.mxu1 %v7552_v37 }
 0x4e1   : > { %2809 = vmatpush1.msra.mxu0 %v6153_v34  ;;  %2898 = vmatpush1.msra.mxu1 %v6125_v55 }
 0x4e2   : > { %2597 = vrot.lane.b32.xlu0 %v6148_v6, %s4986_s17  ;;  %2595 = vrot.lane.b32.xlu1 %v6153_v34, %s4986_s17 }
 0x4e3   : > { %2810 = vmatprep.subr.mxu0 %v6083_v35  ;;  %2899 = vmatprep.subr.mxu1 %v7552_v37 }
 0x4e4   : > { %2811 = vmatpush1.msra.mxu0 %v6128_v10  ;;  %2900 = vmatpush1.msra.mxu1 %v6086_v44 }
 0x4e5   : > { %2901 = vmatprep.subr.mxu1 %v7552_v37 }
 0x4e6   : > { %2555 = vrot.lane.b32.xlu0 %v6138_v51, %s4986_s17  ;;  %2601 = vrot.lane.b32.xlu1 %v6133_v7, %s4986_s17 }
 0x4ea   : > { %2599 = vrot.lane.b32.xlu0 %v6141_v62, %s4986_s17  ;;  %2557 = vrot.lane.b32.xlu1 %v6120_v1, %s4986_s17 }
 0x4ee   : > { %2605 = vrot.lane.b32.xlu0 %v6111_v31, %s4986_s17  ;;  %2603 = vrot.lane.b32.xlu1 %v6117_v20, %s4986_s17 }
 0x4f2   : > { %2559 = vrot.lane.b32.xlu0 %v6100_v11, %s4986_s17  ;;  %2609 = vrot.lane.b32.xlu1 %v6094_v17, %s4986_s17 }
 0x4f6   : > { %2607 = vrot.lane.b32.xlu0 %v6103_v53, %s4986_s17  ;;  %2561 = vrot.lane.b32.xlu1 %v6076_v28, %s4986_s17 }
 0x4fa   : > { %2705 = vrot.lane.b32.xlu0 %v6076_v28, %s4987_s18  ;;  %2611 = vrot.lane.b32.xlu1 %v6073_v41, %s4986_s17 }
 0x4fe   : > { %2613 = vrot.lane.b32.xlu0 %v6065_v59, %s4986_s17  ;;  %2703 = vrot.lane.b32.xlu1 %v6065_v59, %s4987_s18 }
 0x502   : > { %2563 = vrot.lane.b32.xlu0 %v6056_v5, %s4986_s17  ;;  %2701 = vrot.lane.b32.xlu1 %v6073_v41, %s4987_s18 }
 0x506   : > { %2615 = vrot.lane.b32.xlu0 %v6059_v3, %s4986_s17  ;;  %2711 = vrot.lane.b32.xlu1 %v6056_v5, %s4987_s18 }
 0x50a   : > { %2709 = vrot.lane.b32.xlu0 %v6051_v61, %s4987_s18  ;;  %2617 = vrot.lane.b32.xlu1 %v6051_v61, %s4986_s17 }
 0x50e   : > { %2707 = vrot.lane.b32.xlu0 %v6059_v3, %s4987_s18  ;;  %2565 = vrot.lane.b32.xlu1 %v6046_v38, %s4986_s17 }
 0x512   : > { %2717 = vrot.lane.b32.xlu0 %v6046_v38, %s4987_s18  ;;  %2619 = vrot.lane.b32.xlu1 %v6043_v39, %s4986_s17 }
 0x516   : > { %2621 = vrot.lane.b32.xlu0 %v6036_v36, %s4986_s17  ;;  %2699 = vrot.lane.b32.xlu1 %v6100_v11, %s4987_s18 }
 0x51a   : > { %2697 = vrot.lane.b32.xlu0 %v6094_v17, %s4987_s18  ;;  %2691 = vrot.lane.b32.xlu1 %v6111_v31, %s4987_s18 }
 0x51e   : > { %2695 = vrot.lane.b32.xlu0 %v6103_v53, %s4987_s18  ;;  %2689 = vrot.lane.b32.xlu1 %v6117_v20, %s4987_s18 }
 0x522   : > { %2693 = vrot.lane.b32.xlu0 %v6120_v1, %s4987_s18  ;;  %2715 = vrot.lane.b32.xlu1 %v6036_v36, %s4987_s18 }
 0x526   : > { %2685 = vrot.lane.b32.xlu0 %v6133_v7, %s4987_s18  ;;  %2713 = vrot.lane.b32.xlu1 %v6043_v39, %s4987_s18 }
 0x52a   : > { %2683 = vrot.lane.b32.xlu0 %v6141_v62, %s4987_s18  ;;  %2687 = vrot.lane.b32.xlu1 %v6138_v51, %s4987_s18 }
 0x52e   : > { %2681 = vrot.lane.b32.xlu0 %v6125_v55, %s4987_s18  ;;  %2679 = vrot.lane.b32.xlu1 %v6148_v6, %s4987_s18 }
 0x532   : > { %2673 = vrot.lane.b32.xlu0 %v6083_v35, %s4987_s18  ;;  %2677 = vrot.lane.b32.xlu1 %v6153_v34, %s4987_s18 }
 0x536   : > { %2671 = vrot.lane.b32.xlu0 %v6128_v10, %s4987_s18  ;;  %2675 = vrot.lane.b32.xlu1 %v6086_v44, %s4987_s18 }
 0x53a   : > { %3545 = vperm.xlu0 %4958, %v3527_v23   ;;  %3540 = vperm.xlu1 %4959, %v3526_v15  }
 0x53e   : > { %3535 = vperm.xlu0 %4958, %v3525_v13  }
 0x54a   : > { %v6268_v42 = vpop.permute.xlu0 %2551  ;;  %v6270_v2 = vpop.permute.xlu1 %2593 }
 0x54f   : > { %v6272_v29 = vpop.permute.xlu0 %2591  ;;  %v6274_v46 = vpop.permute.xlu1 %2553 }
 0x554   : > { %v6276_v40 = vpop.permute.xlu0 %2597  ;;  %v6278_v30 = vpop.permute.xlu1 %2595 }
 0x558   : > { %v6280_v49 = vpop.permute.xlu0 %2555  ;;  %v6282_v56 = vpop.permute.xlu1 %2601 }
 0x55c   : > { %v6284_v19 = vpop.permute.xlu0 %2599  ;;  %v2558_v54 = vpop.permute.xlu1 %2557 }
 0x560   : > { %v2606_v43 = vpop.permute.xlu0 %2605  ;;  %v2604_v63 = vpop.permute.xlu1 %2603 }
 0x564   : > { %v2560_v48 = vpop.permute.xlu0 %2559  ;;  %v2610_v32 = vpop.permute.xlu1 %2609 }
 0x568   : > { %v2608_v8 = vpop.permute.xlu0 %2607  ;;  %v2562_v50 = vpop.permute.xlu1 %2561 }
 0x56c   : > { %v6286_v33 = vpop.permute.xlu0 %2705  ;;  %v2612_v57 = vpop.permute.xlu1 %2611 }
 0x56d   : > { %v6341_v25 = vsel %vm462_vm4, %v2562_v50, %v2612_v57 }
 0x570   : > { %v2614_v24 = vpop.permute.xlu0 %2613  ;;  %v6288_v58 = vpop.permute.xlu1 %2703 }
 0x574   : > { %v2564_v18 = vpop.permute.xlu0 %2563  ;;  %v6290_v16 = vpop.permute.xlu1 %2701 }
 0x578   : > { %v2616_v14 = vpop.permute.xlu0 %2615  ;;  %v6292_v47 = vpop.permute.xlu1 %2711 }
 0x57c   : > { %v6294_v45 = vpop.permute.xlu0 %2709  ;;  %v2618_v60 = vpop.permute.xlu1 %2617 }
 0x57d   : > { %v6316_v13 = vsel %vm462_vm4, %v2618_v60, %v2564_v18  ;;  %v6319_v52 = vsel %vm462_vm4, %v2616_v14, %v2618_v60  ;;  %v6336_v60 = vsel %vm462_vm4, %v2614_v24, %v2562_v50  ;;  %v6358_v50 = vsel %vm462_vm4, %v2560_v48, %v2608_v8 }
 0x57e   : > { %7555 = vst [vmem:[#allocation18_spill] sm:$0xff] %v6358_v50 }
 0x580   : > { %v6296_v21 = vpop.permute.xlu0 %2707  ;;  %v2566_v22 = vpop.permute.xlu1 %2565 }
 0x584   : > { %v6298_v9 = vpop.permute.xlu0 %2717  ;;  %v2620_v26 = vpop.permute.xlu1 %2619 }
 0x585   : > { %v6309_v15 = vsel %vm462_vm4, %v2566_v22, %v2620_v26 }
 0x588   : > { %v2622_v12 = vpop.permute.xlu0 %2621  ;;  %v6300_v0 = vpop.permute.xlu1 %2699 }
 0x589   : > { %v6303_v4 = vsel %vm462_vm4, %v2622_v12, %v2566_v22  ;;  %v6306_v23 = vsel %vm462_vm4, %v2620_v26, %v2622_v12  ;;  %v6328_v26 = vsel %vm462_vm4, %v2564_v18, %v2616_v14  ;;  %v6333_v12 = vsel %vm462_vm4, %v2612_v57, %v2614_v24 }
 0x58a   : > { %2812 = vmatprep.subr.mxu0 %v6306_v23  ;;  %2902 = vmatpush1.msra.mxu1 %v6303_v4  ;;  %7553 = vst [vmem:[#allocation7_spill] sm:$0xff] %v6328_v26  ;;  %v6346_v18 = vsel %vm462_vm4, %v2610_v32, %v2560_v48  ;;  %v6349_v14 = vsel %vm462_vm4, %v2608_v8, %v2610_v32 }
 0x58b   : > { %2813 = vmatpush1.msra.mxu0 %v6309_v15  ;;  %2903 = vmatprep.subr.mxu1 %v7552_v37  ;;  %7554 = vst [vmem:[#allocation15_spill] sm:$0xff] %v6346_v18  ;;  %v6363_v57 = vsel %vm462_vm4, %v2604_v63, %v2606_v43  ;;  %v6366_v32 = vsel %vm462_vm4, %v2606_v43, %v2558_v54 }
 0x58c   : > { %v6321_v27 = vpop.permute.xlu0 %2697  ;;  %2904 = vmatpush1.msra.mxu1 %v6316_v13  ;;  %v6324_v22 = vpop.permute.xlu1 %2691  ;;  %2814 = vmatprep.subr.mxu0 %v6319_v52  ;;  %7556 = vst [vmem:[#allocation12_spill] sm:$0xff] %v6366_v32  ;;  %v6378_v48 = vsel %vm462_vm4, %v6282_v56, %v6280_v49  ;;  %v6383_v43 = vsel %vm462_vm4, %v6284_v19, %v6282_v56 }
 0x58d   : > { %2815 = vmatpush1.msra.mxu0 %v6328_v26  ;;  %2905 = vmatprep.subr.mxu1 %v7552_v37  ;;  %v6397_v56 = vsel %vm462_vm4, %v6278_v30, %v6276_v40 }
 0x58e   : > { %2816 = vmatprep.subr.mxu0 %v6333_v12  ;;  %2906 = vmatpush1.msra.mxu1 %v6336_v60  ;;  %7557 = vst [vmem:[#allocation17_spill] sm:$0xff] %v6397_v56 }
 0x58f   : > { %2817 = vmatpush1.msra.mxu0 %v6341_v25  ;;  %2907 = vmatprep.subr.mxu1 %v7552_v37 }
 0x590   : > { %v6351_v26 = vpop.permute.xlu0 %2695  ;;  %2908 = vmatpush1.msra.mxu1 %v6346_v18  ;;  %v6354_v24 = vpop.permute.xlu1 %2689  ;;  %2818 = vmatprep.subr.mxu0 %v6349_v14  ;;  %v6371_v18 = vsel %vm462_vm4, %v2558_v54, %v2604_v63  ;;  %v6390_v54 = vsel %vm462_vm4, %v6280_v49, %v6284_v19  ;;  %v6402_v63 = vsel %vm462_vm4, %v6276_v40, %v6274_v46 }
 0x591   : > { %2819 = vmatpush1.msra.mxu0 %v6358_v50  ;;  %2909 = vmatprep.subr.mxu1 %v7552_v37  ;;  %7558 = vst [vmem:[#allocation19_spill] sm:$0xff] %v6402_v63  ;;  %v6409_v49 = vsel %vm462_vm4, %v6274_v46, %v6278_v30  ;;  %v6416_v19 = vsel %vm462_vm4, %v6270_v2, %v6268_v42 }
 0x592   : > { %2820 = vmatprep.subr.mxu0 %v6363_v57  ;;  %2910 = vmatpush1.msra.mxu1 %v6366_v32  ;;  %7559 = vst [vmem:[#allocation13_spill] sm:$0xff] %v6409_v49  ;;  %7560 = vst [vmem:[#allocation10_spill] sm:$0xff] %v6416_v19  ;;  %v6421_v40 = vsel %vm462_vm4, %v6272_v29, %v6270_v2  ;;  %v6428_v46 = vsel %vm462_vm4, %v6268_v42, %v6272_v29 }
 0x593   : > { %2821 = vmatpush1.msra.mxu0 %v6371_v18  ;;  %2911 = vmatprep.subr.mxu1 %v7552_v37  ;;  %7561 = vst [vmem:[#allocation8_spill] sm:$0xff] %v6428_v46  ;;  %v6448_v42 = vsel %vm475_vm3, %v6292_v47, %v6296_v21  ;;  %v6455_v29 = vsel %vm475_vm3, %v6294_v45, %v6292_v47 }
 0x594   : > { %v2694_v8 = vpop.permute.xlu0 %2693  ;;  %2912 = vmatpush1.msra.mxu1 %v6378_v48  ;;  %v2716_v32 = vpop.permute.xlu1 %2715  ;;  %2822 = vmatprep.subr.mxu0 %v6383_v43  ;;  %v6469_v47 = vsel %vm475_vm3, %v6288_v58, %v6286_v33 }
 0x595   : > { %2823 = vmatpush1.msra.mxu0 %v6390_v54  ;;  %2913 = vmatprep.subr.mxu1 %v7552_v37  ;;  %v6441_v2 = vsel %vm475_vm3, %v2716_v32, %v6298_v9 }
 0x596   : > { %2824 = vmatprep.subr.mxu0 %v6397_v56  ;;  %2914 = vmatpush1.msra.mxu1 %v6402_v63 }
 0x597   : > { %2825 = vmatpush1.msra.mxu0 %v6409_v49  ;;  %2915 = vmatprep.subr.mxu1 %v7552_v37 }
 0x598   : > { %v2686_v63 = vpop.permute.xlu0 %2685  ;;  %2916 = vmatpush1.msra.mxu1 %v6416_v19  ;;  %v2714_v56 = vpop.permute.xlu1 %2713  ;;  %2826 = vmatprep.subr.mxu0 %v6421_v40 }
 0x599   : > { %v6431_v30 = vsel %vm475_vm3, %v2714_v56, %v2716_v32  ;;  %v6435_v49 = vsel %vm475_vm3, %v6298_v9, %v2714_v56  ;;  %2827 = vmatpush1.msra.mxu0 %v6428_v46  ;;  %2933 = vmatprep.subr.mxu1 %v7552_v37  ;;  %v6460_v9 = vsel %vm475_vm3, %v6296_v21, %v6294_v45 }
 0x59a   : > { %7562 = vst [vmem:[#allocation9_spill] sm:$0xff] %v6431_v30  ;;  %7563 = vst [vmem:[#allocation11_spill] sm:$0xff] %v6435_v49  ;;  %2844 = vmatprep.subr.mxu0 %v6441_v2  ;;  %2934 = vmatpush2.msra.mxu1 %v6435_v49  ;;  %v6474_v45 = vsel %vm475_vm3, %v6286_v33, %v6290_v16  ;;  %v6481_v21 = vsel %vm475_vm3, %v6290_v16, %v6288_v58 }
 0x59b   : > { %2845 = vmatpush2.msra.mxu0 %v6431_v30  ;;  %2935 = vmatprep.subr.mxu1 %v7552_v37  ;;  %7564 = vst [vmem:[#allocation16_spill] sm:$0xff] %v6460_v9  ;;  %7565 = vst [vmem:[#allocation14_spill] sm:$0xff] %v6474_v45  ;;  %v6493_v33 = vsel %vm475_vm3, %v6321_v27, %v6300_v0 }
 0x59c   : > { %v2684_v32 = vpop.permute.xlu0 %2683  ;;  %2936 = vmatpush2.msra.mxu1 %v6448_v42  ;;  %v2688_v56 = vpop.permute.xlu1 %2687  ;;  %2846 = vmatprep.subr.mxu0 %v6455_v29  ;;  %7566 = vst [vmem:[#allocation20_spill] sm:$0xff] %v6481_v21 }
 0x59d   : > { %2847 = vmatpush2.msra.mxu0 %v6460_v9  ;;  %2937 = vmatprep.subr.mxu1 %v7552_v37  ;;  %v6486_v9 = vsel %vm475_vm3, %v6300_v0, %v6351_v26  ;;  %v6510_v0 = vsel %vm475_vm3, %v6324_v22, %v2694_v8 }
 0x59e   : > { %2848 = vmatprep.subr.mxu0 %v6469_v47  ;;  %2938 = vmatpush2.msra.mxu1 %v6474_v45  ;;  %7567 = vst [vmem:[#allocation21_spill] sm:$0xff] %v6486_v9  ;;  %v6498_v45 = vsel %vm475_vm3, %v6351_v26, %v6321_v27  ;;  %v6515_v27 = vsel %vm475_vm3, %v6354_v24, %v6324_v22 }
 0x59f   : > { %2849 = vmatpush2.msra.mxu0 %v6481_v21  ;;  %2939 = vmatprep.subr.mxu1 %v7552_v37  ;;  %7568 = vst [vmem:[#allocation22_spill] sm:$0xff] %v6498_v45  ;;  %v6504_v21 = vsel %vm475_vm3, %v2694_v8, %v6354_v24  ;;  %v6520_v26 = vsel %vm475_vm3, %v2688_v56, %v2684_v32 }
 0x5a0   : > { %v2682_v58 = vpop.permute.xlu0 %2681  ;;  %2940 = vmatpush2.msra.mxu1 %v6486_v9  ;;  %v2680_v16 = vpop.permute.xlu1 %2679  ;;  %2850 = vmatprep.subr.mxu0 %v6493_v33  ;;  %7569 = vst [vmem:[#allocation23_spill] sm:$0xff] %v6504_v21  ;;  %v6528_v8 = vsel %vm475_vm3, %v2684_v32, %v2686_v63 }
 0x5a1   : > { %2851 = vmatpush2.msra.mxu0 %v6498_v45  ;;  %2941 = vmatprep.subr.mxu1 %v7552_v37  ;;  %v6525_v45 = vsel %vm475_vm3, %v2686_v63, %v2688_v56  ;;  %7570 = vst [vmem:[#allocation24_spill] sm:$0xff] %v6528_v8  ;;  %v6541_v56 = vsel %vm475_vm3, %v2680_v16, %v2682_v58 }
 0x5a2   : > { %2852 = vmatprep.subr.mxu0 %v6510_v0  ;;  %2942 = vmatpush2.msra.mxu1 %v6504_v21 }
 0x5a3   : > { %2853 = vmatpush2.msra.mxu0 %v6515_v27  ;;  %2943 = vmatprep.subr.mxu1 %v7552_v37 }
 0x5a4   : > { %v2674_v9 = vpop.permute.xlu0 %2673  ;;  %2944 = vmatpush2.msra.mxu1 %v6520_v26  ;;  %v2678_v22 = vpop.permute.xlu1 %2677  ;;  %2854 = vmatprep.subr.mxu0 %v6525_v45 }
 0x5a5   : > { %v6533_v24 = vsel %vm475_vm3, %v2678_v22, %v2680_v16  ;;  %v6536_v21 = vsel %vm475_vm3, %v2682_v58, %v2678_v22  ;;  %2855 = vmatpush2.msra.mxu0 %v6528_v8  ;;  %2945 = vmatprep.subr.mxu1 %v7552_v37  ;;  %v2775_v22 = vld [vmem:[%s7457_s6] sm:$0xff] }
 0x5a6   : > { %2856 = vmatprep.subr.mxu0 %v6541_v56  ;;  %2946 = vmatpush2.msra.mxu1 %v6536_v21 }
 0x5a7   : > { %2857 = vmatpush2.msra.mxu0 %v6533_v24  ;;  %2947 = vmatprep.subr.mxu1 %v7552_v37 }
 0x5a8   : > { %v2672_v63 = vpop.permute.xlu0 %2671  ;;  %v2676_v32 = vpop.permute.xlu1 %2675 }
 0x5a9   : > { %v6551_v8 = vsel %vm475_vm3, %v2672_v63, %v2674_v9  ;;  %v6554_v58 = vsel %vm475_vm3, %v2676_v32, %v2672_v63  ;;  %v6557_v16 = vsel %vm475_vm3, %v2674_v9, %v2676_v32  ;;  %v2778_v63 = vld [vmem:[%s7457_s6 + $0x18] sm:$0xff]  ;;  %v2777_v9 = vld [vmem:[%s7457_s6 + $0x10] sm:$0xff]  ;;  %v2780_v32 = vld [vmem:[%s7457_s6 + $0x28] sm:$0xff] }
 0x5aa   : > { %2858 = vmatprep.subr.mxu0 %v6557_v16  ;;  %2948 = vmatpush2.msra.mxu1 %v6554_v58 }
 0x5ab   : > { %2859 = vmatpush2.msra.mxu0 %v6551_v8  ;;  %2950 = vmatmul.mubr.f32.vlgmr.msra.gmra.mxu1 %v2775_v22 }
 0x5ac   : > { %3156 = vmatprep.subr.mxu1 %v7552_v37  ;;  %2861 = vmatmul.mubr.f32.vlgmr.msra.gmra.mxu0 %v2775_v22  ;;  %v2779_v22 = vld [vmem:[%s7457_s6 + $0x20] sm:$0xff] }
 0x5ad   : > { %3067 = vmatprep.subr.mxu0 %v6036_v36  ;;  %3157 = vmatpush1.msra.mxu1 %v6046_v38 }
 0x5ae   : > { %3068 = vmatpush1.msra.mxu0 %v6043_v39  ;;  %3158 = vmatprep.subr.mxu1 %v7552_v37 }
 0x5af   : > { %3069 = vmatprep.subr.mxu0 %v6051_v61  ;;  %3159 = vmatpush1.msra.mxu1 %v6056_v5 }
 0x5b0   : > { %4519 = vmatprep.mubr.msk.f32.mxu1 %vm2783_vm8, %v2778_v63  ;;  %3070 = vmatpush1.msra.mxu0 %v6059_v3 }
 0x5b1   : > { %3160 = vmatprep.subr.mxu1 %v7552_v37  ;;  %2955 = vmatmul.mubr.f32.gmra.mxu1 %v2777_v9 }
 0x5b2   : > { %3071 = vmatprep.subr.mxu0 %v6065_v59  ;;  %3161 = vmatpush1.msra.mxu1 %v6076_v28 }
 0x5b3   : > { %4515 = vmatprep.mubr.msk.f32.mxu0 %vm2783_vm8, %v2778_v63  ;;  %3072 = vmatpush1.msra.mxu0 %v6073_v41  ;;  %v2782_v63 = vld [vmem:[%s7457_s6 + $0x38] sm:$0xff] }
 0x5b4   : > { %3162 = vmatprep.subr.mxu1 %v7552_v37  ;;  %2867 = vmatmul.mubr.f32.gmra.mxu0 %v2777_v9  ;;  %v2781_v9 = vld [vmem:[%s7457_s6 + $0x30] sm:$0xff] }
 0x5b5   : > { %3073 = vmatprep.subr.mxu0 %v6094_v17  ;;  %3163 = vmatpush1.msra.mxu1 %v6100_v11 }
 0x5b6   : > { %3074 = vmatpush1.msra.mxu0 %v6103_v53  ;;  %3164 = vmatprep.subr.mxu1 %v7552_v37 }
 0x5b7   : > { %3075 = vmatprep.subr.mxu0 %v6111_v31  ;;  %3165 = vmatpush1.msra.mxu1 %v6120_v1 }
 0x5b8   : > { %3166 = vmatprep.subr.mxu1 %v7552_v37  ;;  %3076 = vmatpush1.msra.mxu0 %v6117_v20 }
 0x5b9   : > { %4520 = vmatprep.mubr.msk.f32.mxu1 %vm2783_vm8, %v2780_v32  ;;  %3077 = vmatprep.subr.mxu0 %v6133_v7 }
 0x5ba   : > { %3167 = vmatpush1.msra.mxu1 %v6138_v51  ;;  %4516 = vmatprep.mubr.msk.f32.mxu0 %vm2783_vm8, %v2780_v32  ;;  %v7571_v32 = vld [vmem:[#allocation7_spill] sm:$0xff] }
 0x5bb   : > { %2960 = vmatmul.mubr.f32.gmra.mxu1 %v2779_v22  ;;  %3078 = vmatpush1.msra.mxu0 %v6141_v62 }
 0x5bc   : > { %3168 = vmatprep.subr.mxu1 %v7552_v37  ;;  %2873 = vmatmul.mubr.f32.gmra.mxu0 %v2779_v22  ;;  %v7572_v22 = vld [vmem:[#allocation15_spill] sm:$0xff] }
 0x5bd   : > { %3079 = vmatprep.subr.mxu0 %v6148_v6  ;;  %3169 = vmatpush1.msra.mxu1 %v6125_v55 }
 0x5be   : > { %3080 = vmatpush1.msra.mxu0 %v6153_v34  ;;  %3170 = vmatprep.subr.mxu1 %v7552_v37 }
 0x5bf   : > { %3081 = vmatprep.subr.mxu0 %v6083_v35  ;;  %3171 = vmatpush1.msra.mxu1 %v6086_v44 }
 0x5c0   : > { %3082 = vmatpush1.msra.mxu0 %v6128_v10  ;;  %3172 = vmatprep.subr.mxu1 %v7552_v37 }
 0x5c1   : > { %3083 = vmatprep.subr.mxu0 %v6306_v23  ;;  %3173 = vmatpush1.msra.mxu1 %v6303_v4 }
 0x5c2   : > { %3084 = vmatpush1.msra.mxu0 %v6309_v15  ;;  %3174 = vmatprep.subr.mxu1 %v7552_v37 }
 0x5c3   : > { %4517 = vmatprep.mubr.msk.f32.mxu0 %vm2783_vm8, %v2782_v63  ;;  %4521 = vmatprep.mubr.msk.f32.mxu1 %vm2783_vm8, %v2782_v63  ;;  %v7573_v63 = vld [vmem:[#allocation12_spill] sm:$0xff] }
 0x5c4   : > { %3085 = vmatprep.subr.mxu0 %v6319_v52  ;;  %3175 = vmatpush1.msra.mxu1 %v6316_v13 }
 0x5c5   : > { %2879 = vmatmul.mubr.f32.gmra.mxu0 %v2781_v9  ;;  %2965 = vmatmul.mubr.f32.gmra.mxu1 %v2781_v9  ;;  %v7574_v9 = vld [vmem:[#allocation17_spill] sm:$0xff] }
 0x5c6   : > { %3086 = vmatpush1.msra.mxu0 %v7571_v32  ;;  %3176 = vmatprep.subr.mxu1 %v7552_v37 }
 0x5c7   : > { %3087 = vmatprep.subr.mxu0 %v6333_v12  ;;  %3177 = vmatpush1.msra.mxu1 %v6336_v60 }
 0x5c8   : > { %3088 = vmatpush1.msra.mxu0 %v6341_v25  ;;  %3178 = vmatprep.subr.mxu1 %v7552_v37 }
 0x5c9   : > { %3089 = vmatprep.subr.mxu0 %v6349_v14  ;;  %3179 = vmatpush1.msra.mxu1 %v7572_v22  ;;  %v7576_v22 = vld [vmem:[#allocation13_spill] sm:$0xff] }
 0x5ca   : > { %3090 = vmatpush1.msra.mxu0 %v6358_v50  ;;  %3180 = vmatprep.subr.mxu1 %v7552_v37  ;;  %v7575_v50 = vld [vmem:[#allocation19_spill] sm:$0xff] }
 0x5cb   : > { %3091 = vmatprep.subr.mxu0 %v6363_v57  ;;  %3181 = vmatpush1.msra.mxu1 %v7573_v63 }
 0x5cc   : > { %3092 = vmatpush1.msra.mxu0 %v6371_v18  ;;  %3182 = vmatprep.subr.mxu1 %v7552_v37 }
 0x5cd   : > { %3093 = vmatprep.subr.mxu0 %v6383_v43  ;;  %3183 = vmatpush1.msra.mxu1 %v6378_v48 }
 0x5ce   : > { %3094 = vmatpush1.msra.mxu0 %v6390_v54  ;;  %3184 = vmatprep.subr.mxu1 %v7552_v37 }
 0x5cf   : > { %3095 = vmatprep.subr.mxu0 %v7574_v9  ;;  %3185 = vmatpush1.msra.mxu1 %v7575_v50 }
 0x5d0   : > { %3096 = vmatpush1.msra.mxu0 %v7576_v22  ;;  %3186 = vmatprep.subr.mxu1 %v7552_v37  ;;  %v7577_v22 = vld [vmem:[#allocation16_spill] sm:$0xff] }
 0x5d1   : > { %3097 = vmatprep.subr.mxu0 %v6421_v40  ;;  %3187 = vmatpush1.msra.mxu1 %v6416_v19  ;;  %v7579_v19 = vld [vmem:[#allocation20_spill] sm:$0xff] }
 0x5d2   : > { %3098 = vmatpush1.msra.mxu0 %v6428_v46  ;;  %3204 = vmatprep.subr.mxu1 %v7552_v37  ;;  %v7578_v46 = vld [vmem:[#allocation14_spill] sm:$0xff] }
 0x5d3   : > { %3115 = vmatprep.subr.mxu0 %v6441_v2  ;;  %3205 = vmatpush2.msra.mxu1 %v6435_v49  ;;  %v7581_v49 = vld [vmem:[#allocation22_spill] sm:$0xff] }
 0x5d4   : > { %3116 = vmatpush2.msra.mxu0 %v6431_v30  ;;  %3206 = vmatprep.subr.mxu1 %v7552_v37  ;;  %v7580_v30 = vld [vmem:[#allocation21_spill] sm:$0xff] }
 0x5d5   : > { %3117 = vmatprep.subr.mxu0 %v6455_v29  ;;  %3207 = vmatpush2.msra.mxu1 %v6448_v42 }
 0x5d6   : > { %3118 = vmatpush2.msra.mxu0 %v7577_v22  ;;  %3208 = vmatprep.subr.mxu1 %v7552_v37  ;;  %v7582_v22 = vld [vmem:[#allocation23_spill] sm:$0xff] }
 0x5d7   : > { %3119 = vmatprep.subr.mxu0 %v6469_v47  ;;  %3209 = vmatpush2.msra.mxu1 %v7578_v46 }
 0x5d8   : > { %3120 = vmatpush2.msra.mxu0 %v7579_v19  ;;  %3210 = vmatprep.subr.mxu1 %v7552_v37  ;;  %v7583_v19 = vld [vmem:[#allocation24_spill] sm:$0xff] }
 0x5d9   : > { %3121 = vmatprep.subr.mxu0 %v6493_v33  ;;  %3211 = vmatpush2.msra.mxu1 %v7580_v30 }
 0x5da   : > { %3122 = vmatpush2.msra.mxu0 %v7581_v49  ;;  %3212 = vmatprep.subr.mxu1 %v7552_v37 }
 0x5db   : > { %3123 = vmatprep.subr.mxu0 %v6510_v0  ;;  %3213 = vmatpush2.msra.mxu1 %v7582_v22  ;;  %v4523_v22 = vld [vmem:[%s7457_s6 + $0x48] sm:$0xff] }
 0x5dc   : > { %3124 = vmatpush2.msra.mxu0 %v6515_v27  ;;  %3214 = vmatprep.subr.mxu1 %v7552_v37 }
 0x5dd   : > { %3125 = vmatprep.subr.mxu0 %v6525_v45  ;;  %3215 = vmatpush2.msra.mxu1 %v6520_v26 }
 0x5de   : > { %3126 = vmatpush2.msra.mxu0 %v7583_v19  ;;  %3216 = vmatprep.subr.mxu1 %v7552_v37  ;;  %v4522_v19 = vld [vmem:[%s7457_s6 + $0x40] sm:$0xff] }
 0x5df   : > { %3127 = vmatprep.subr.mxu0 %v6541_v56  ;;  %3217 = vmatpush2.msra.mxu1 %v6536_v21 }
 0x5e0   : > { %3128 = vmatpush2.msra.mxu0 %v6533_v24  ;;  %3218 = vmatprep.subr.mxu1 %v7552_v37 }
 0x5e1   : > { %3129 = vmatprep.subr.mxu0 %v6557_v16  ;;  %3219 = vmatpush2.msra.mxu1 %v6554_v58 }
 0x5e2   : > { %3130 = vmatpush2.msra.mxu0 %v6551_v8  ;;  %4534 = vmatprep.mubr.msk.f32.mxu1 %vm2783_vm8, %v4523_v22 }
 0x5e3   : > { %3363 = vmatprep.subr.mxu1 %v7552_v37  ;;  %4530 = vmatprep.mubr.msk.f32.mxu0 %vm2783_vm8, %v4523_v22 }
 0x5e4   : > { %3221 = vmatmul.mubr.f32.vlgmr.msra.gmra.mxu1 %v4522_v19  ;;  %3274 = vmatprep.subr.mxu0 %v6036_v36  ;;  %v7584_v36 = vld [vmem:[#allocation15_spill] sm:$0xff] }
 0x5e5   : > { %3364 = vmatpush1.msra.mxu1 %v6046_v38  ;;  %3132 = vmatmul.mubr.f32.vlgmr.msra.gmra.mxu0 %v4522_v19  ;;  %v7588_v38 = vld [vmem:[#allocation8_spill] sm:$0xff] }
 0x5e6   : > { %3275 = vmatpush1.msra.mxu0 %v6043_v39  ;;  %3365 = vmatprep.subr.mxu1 %v7552_v37  ;;  %v7585_v39 = vld [vmem:[#allocation18_spill] sm:$0xff] }
 0x5e7   : > { %3276 = vmatprep.subr.mxu0 %v6051_v61  ;;  %3366 = vmatpush1.msra.mxu1 %v6056_v5  ;;  %v4525_v61 = vld [vmem:[%s7457_s6 + $0x58] sm:$0xff] }
 0x5e8   : > { %3277 = vmatpush1.msra.mxu0 %v6059_v3  ;;  %3367 = vmatprep.subr.mxu1 %v7552_v37  ;;  %v7589_v5 = vld [vmem:[#allocation11_spill] sm:$0xff]  ;;  %v7590_v3 = vld [vmem:[#allocation9_spill] sm:$0xff] }
 0x5e9   : > { %3278 = vmatprep.subr.mxu0 %v6065_v59  ;;  %3368 = vmatpush1.msra.mxu1 %v6076_v28  ;;  %v4524_v59 = vld [vmem:[%s7457_s6 + $0x50] sm:$0xff]  ;;  %v4527_v28 = vld [vmem:[%s7457_s6 + $0x68] sm:$0xff] }
 0x5ea   : > { %3279 = vmatpush1.msra.mxu0 %v6073_v41  ;;  %3369 = vmatprep.subr.mxu1 %v7552_v37  ;;  %v7591_v41 = vld [vmem:[#allocation16_spill] sm:$0xff] }
 0x5eb   : > { %3280 = vmatprep.subr.mxu0 %v6094_v17  ;;  %3370 = vmatpush1.msra.mxu1 %v6100_v11  ;;  %v4529_v17 = vld [vmem:[%s7457_s6 + $0x78] sm:$0xff] }
 0x5ec   : > { %3281 = vmatpush1.msra.mxu0 %v6103_v53  ;;  %3371 = vmatprep.subr.mxu1 %v7552_v37  ;;  %v7593_v11 = vld [vmem:[#allocation23_spill] sm:$0xff]  ;;  %v4528_v53 = vld [vmem:[%s7457_s6 + $0x70] sm:$0xff] }
 0x5ed   : > { %3282 = vmatprep.subr.mxu0 %v6111_v31  ;;  %3372 = vmatpush1.msra.mxu1 %v6120_v1  ;;  %v7594_v31 = vld [vmem:[#allocation24_spill] sm:$0xff] }
 0x5ee   : > { %3283 = vmatpush1.msra.mxu0 %v6117_v20  ;;  %3373 = vmatprep.subr.mxu1 %v7552_v37  ;;  %v4539_v20 = vld [vmem:[%s7457_s6 + $0x88] sm:$0xff]  ;;  %v4538_v1 = vld [vmem:[%s7457_s6 + $0x80] sm:$0xff] }
 0x5ef   : > { %3284 = vmatprep.subr.mxu0 %v6133_v7  ;;  %3374 = vmatpush1.msra.mxu1 %v6138_v51  ;;  %v4543_v7 = vld [vmem:[%s7457_s6 + $0xa8] sm:$0xff]  ;;  %v4542_v51 = vld [vmem:[%s7457_s6 + $0xa0] sm:$0xff] }
 0x5f0   : > { %3285 = vmatpush1.msra.mxu0 %v6141_v62  ;;  %3375 = vmatprep.subr.mxu1 %v7552_v37  ;;  %v4545_v62 = vld [vmem:[%s7457_s6 + $0xb8] sm:$0xff] }
 0x5f1   : > { %3286 = vmatprep.subr.mxu0 %v6148_v6  ;;  %3376 = vmatpush1.msra.mxu1 %v6125_v55  ;;  %v4541_v55 = vld [vmem:[%s7457_s6 + $0x98] sm:$0xff]  ;;  %v4544_v6 = vld [vmem:[%s7457_s6 + $0xb0] sm:$0xff] }
 0x5f2   : > { %3287 = vmatpush1.msra.mxu0 %v6153_v34  ;;  %3377 = vmatprep.subr.mxu1 %v7552_v37 }
 0x5f3   : > { %3288 = vmatprep.subr.mxu0 %v6083_v35  ;;  %3378 = vmatpush1.msra.mxu1 %v6086_v44  ;;  %v7592_v35 = vld [vmem:[#allocation20_spill] sm:$0xff] }
 0x5f4   : > { %3289 = vmatpush1.msra.mxu0 %v6128_v10  ;;  %3379 = vmatprep.subr.mxu1 %v7552_v37  ;;  %v4526_v44 = vld [vmem:[%s7457_s6 + $0x60] sm:$0xff]  ;;  %v4540_v10 = vld [vmem:[%s7457_s6 + $0x90] sm:$0xff] }
 0x5f5   : > { %3290 = vmatprep.subr.mxu0 %v6306_v23  ;;  %3380 = vmatpush1.msra.mxu1 %v6303_v4 }
 0x5f6   : > { %3291 = vmatpush1.msra.mxu0 %v6309_v15  ;;  %3381 = vmatprep.subr.mxu1 %v7552_v37 }
 0x5f7   : > { %3292 = vmatprep.subr.mxu0 %v6319_v52  ;;  %3382 = vmatpush1.msra.mxu1 %v6316_v13  ;;  %v7586_v52 = vld [vmem:[#allocation13_spill] sm:$0xff] }
 0x5f8   : > { %3293 = vmatpush1.msra.mxu0 %v7571_v32  ;;  %3383 = vmatprep.subr.mxu1 %v7552_v37 }
 0x5f9   : > { %3294 = vmatprep.subr.mxu0 %v6333_v12  ;;  %3384 = vmatpush1.msra.mxu1 %v6336_v60 }
 0x5fa   : > { %3295 = vmatpush1.msra.mxu0 %v6341_v25  ;;  %3385 = vmatprep.subr.mxu1 %v7552_v37  ;;  %v7587_v25 = vld [vmem:[#allocation10_spill] sm:$0xff] }
 0x5fb   : > { %3296 = vmatprep.subr.mxu0 %v6349_v14  ;;  %3386 = vmatpush1.msra.mxu1 %v7584_v36 }
 0x5fc   : > { %3297 = vmatpush1.msra.mxu0 %v7585_v39  ;;  %3387 = vmatprep.subr.mxu1 %v7552_v37 }
 0x5fd   : > { %3298 = vmatprep.subr.mxu0 %v6363_v57  ;;  %3388 = vmatpush1.msra.mxu1 %v7573_v63 }
 0x5fe   : > { %3299 = vmatpush1.msra.mxu0 %v6371_v18  ;;  %3389 = vmatprep.subr.mxu1 %v7552_v37 }
 0x5ff   : > { %3300 = vmatprep.subr.mxu0 %v6383_v43  ;;  %3390 = vmatpush1.msra.mxu1 %v6378_v48 }
 0x600   : > { %3301 = vmatpush1.msra.mxu0 %v6390_v54  ;;  %3391 = vmatprep.subr.mxu1 %v7552_v37 }
 0x601   : > { %3302 = vmatprep.subr.mxu0 %v7574_v9  ;;  %3392 = vmatpush1.msra.mxu1 %v7575_v50 }
 0x602   : > { %3303 = vmatpush1.msra.mxu0 %v7586_v52  ;;  %3393 = vmatprep.subr.mxu1 %v7552_v37 }
 0x603   : > { %3304 = vmatprep.subr.mxu0 %v6421_v40  ;;  %3394 = vmatpush1.msra.mxu1 %v7587_v25 }
 0x604   : > { %3305 = vmatpush1.msra.mxu0 %v7588_v38  ;;  %3411 = vmatprep.subr.mxu1 %v7552_v37 }
 0x605   : > { %3322 = vmatprep.subr.mxu0 %v6441_v2  ;;  %3412 = vmatpush2.msra.mxu1 %v7589_v5 }
 0x606   : > { %3323 = vmatpush2.msra.mxu0 %v7590_v3  ;;  %3413 = vmatprep.subr.mxu1 %v7552_v37 }
 0x607   : > { %4535 = vmatprep.mubr.msk.f32.mxu1 %vm2783_vm8, %v4525_v61  ;;  %3324 = vmatprep.subr.mxu0 %v6455_v29 }
 0x608   : > { %3414 = vmatpush2.msra.mxu1 %v6448_v42  ;;  %4531 = vmatprep.mubr.msk.f32.mxu0 %vm2783_vm8, %v4525_v61 }
 0x609   : > { %3226 = vmatmul.mubr.f32.gmra.mxu1 %v4524_v59  ;;  %3325 = vmatpush2.msra.mxu0 %v7591_v41 }
 0x60a   : > { %3415 = vmatprep.subr.mxu1 %v7552_v37  ;;  %3138 = vmatmul.mubr.f32.gmra.mxu0 %v4524_v59 }
 0x60b   : > { %3326 = vmatprep.subr.mxu0 %v6469_v47  ;;  %3416 = vmatpush2.msra.mxu1 %v7578_v46 }
 0x60c   : > { %3327 = vmatpush2.msra.mxu0 %v7592_v35  ;;  %3417 = vmatprep.subr.mxu1 %v7552_v37  ;;  %v6893_v35 = vpop.permute.xlu1 %3540 }
 0x60d   : > { %4536 = vmatprep.mubr.msk.f32.mxu1 %vm2783_vm8, %v4527_v28  ;;  %3328 = vmatprep.subr.mxu0 %v6493_v33 }
 0x60e   : > { %3418 = vmatpush2.msra.mxu1 %v7580_v30  ;;  %4532 = vmatprep.mubr.msk.f32.mxu0 %vm2783_vm8, %v4527_v28  ;;  %v3524_v28 = vld [vmem:[%s7458_s7] sm:$0xff] }
 0x60f   : > { %3231 = vmatmul.mubr.f32.gmra.mxu1 %v4526_v44  ;;  %3329 = vmatpush2.msra.mxu0 %v7581_v49 }
 0x610   : > { %3419 = vmatprep.subr.mxu1 %v7552_v37  ;;  %3144 = vmatmul.mubr.f32.gmra.mxu0 %v4526_v44  ;;  %v6895_v44 = vpop.permute.xlu0 %3545 }
 0x611   : > { %3330 = vmatprep.subr.mxu0 %v6510_v0  ;;  %3420 = vmatpush2.msra.mxu1 %v7593_v11 }
 0x612   : > { %3331 = vmatpush2.msra.mxu0 %v6515_v27  ;;  %3421 = vmatprep.subr.mxu1 %v7552_v37 }
 0x613   : > { %4537 = vmatprep.mubr.msk.f32.mxu1 %vm2783_vm8, %v4529_v17  ;;  %3332 = vmatprep.subr.mxu0 %v6525_v45 }
 0x614   : > { %3422 = vmatpush2.msra.mxu1 %v6520_v26  ;;  %4533 = vmatprep.mubr.msk.f32.mxu0 %vm2783_vm8, %v4529_v17  ;;  %v3536_v11 = vpop.permute.xlu0 %3535 }
 0x615   : > { %3236 = vmatmul.mubr.f32.gmra.mxu1 %v4528_v53  ;;  %3333 = vmatpush2.msra.mxu0 %v7594_v31 }
 0x616   : > { %3423 = vmatprep.subr.mxu1 %v7552_v37  ;;  %3150 = vmatmul.mubr.f32.gmra.mxu0 %v4528_v53 }
 0x617   : > { %3334 = vmatprep.subr.mxu0 %v6541_v56  ;;  %3424 = vmatpush2.msra.mxu1 %v6536_v21 }
 0x618   : > { %3335 = vmatpush2.msra.mxu0 %v6533_v24  ;;  %3425 = vmatprep.subr.mxu1 %v7552_v37 }
 0x619   : > { %3336 = vmatprep.subr.mxu0 %v6557_v16  ;;  %3426 = vmatpush2.msra.mxu1 %v6554_v58 }
 0x61a   : > { %4550 = vmatprep.mubr.msk.f32.mxu1 %vm2783_vm8, %v4539_v20  ;;  %3337 = vmatpush2.msra.mxu0 %v6551_v8 }
 0x61b   : > { %4546 = vmatprep.mubr.msk.f32.mxu0 %vm2783_vm8, %v4539_v20  ;;  %3428 = vmatmul.mubr.f32.vlgmr.msra.gmra.mxu1 %v4538_v1 }
 0x61c   : > { %3339 = vmatmul.mubr.f32.vlgmr.msra.gmra.mxu0 %v4538_v1  ;;  %4551 = vmatprep.mubr.msk.f32.mxu1 %vm2783_vm8, %v4541_v55 }
 0x61d   : > { %4547 = vmatprep.mubr.msk.f32.mxu0 %vm2783_vm8, %v4541_v55  ;;  %4829 = vmatprep.subr.mxu1 %v7552_v37 }
 0x61f   : > { %3433 = vmatmul.mubr.f32.gmra.mxu1 %v4540_v10 }
 0x620   : > { %3345 = vmatmul.mubr.f32.gmra.mxu0 %v4540_v10  ;;  %4552 = vmatprep.mubr.msk.f32.mxu1 %vm2783_vm8, %v4543_v7 }
 0x621   : > { %4548 = vmatprep.mubr.msk.f32.mxu0 %vm2783_vm8, %v4543_v7 }
 0x623   : > { %3438 = vmatmul.mubr.f32.gmra.mxu1 %v4542_v51 }
 0x624   : > { %3351 = vmatmul.mubr.f32.gmra.mxu0 %v4542_v51  ;;  %4553 = vmatprep.mubr.msk.f32.mxu1 %vm2783_vm8, %v4545_v62 }
 0x625   : > { %4549 = vmatprep.mubr.msk.f32.mxu0 %vm2783_vm8, %v4545_v62 }
 0x627   : > { %3443 = vmatmul.mubr.f32.gmra.mxu1 %v4544_v6 }
 0x628   : > { %3357 = vmatmul.mubr.f32.gmra.mxu0 %v4544_v6  ;;  %4853 = vmatprep.mubr.msk.f32.mxu1 %vm4991_vm9, %v7552_v37 }
 0x629   : > { %3768 = vmatprep.mubr.f32.mxu0 %v7552_v37 }
 0x66b   : > { %v2951_v34 = vpop.f32.mrf.mxu1 }
 0x66c   : > { %2974 = vrot.lane.b32.xlu1 %v2951_v34, %s4988_s19  ;;  %v2862_v4 = vpop.f32.mrf.mxu0 }
 0x66d   : > { %2994 = vrot.lane.b32.xlu0 %v2862_v4, %s4988_s19  ;;  %v2953_v23 = vpop.f32.mrf.mxu1 }
 0x66e   : > { %v2864_v15 = vpop.f32.mrf.mxu0 }
 0x670   : > { %2996 = vrot.lane.b32.xlu1 %v2864_v15, %s4988_s19 }
 0x671   : > { %v2956_v13 = vpop.f32.mrf.mxu1 }
 0x672   : > { %2976 = vrot.lane.b32.xlu0 %v2956_v13, %s4988_s19 }
 0x673   : > { %v2958_v12 = vpop.f32.mrf.mxu1 }
 0x674   : > { %v2868_v60 = vpop.f32.mrf.mxu0 }
 0x675   : > { %2998 = vrot.lane.b32.xlu1 %v2868_v60, %s4988_s19 }
 0x676   : > { %v2870_v18 = vpop.f32.mrf.mxu0 }
 0x677   : > { %3000 = vrot.lane.b32.xlu0 %v2870_v18, %s4988_s19 }
 0x67b   : > { %v2961_v14 = vpop.f32.mrf.mxu1 }
 0x67c   : > { %2978 = vrot.lane.b32.xlu1 %v2961_v14, %s4988_s19  ;;  %v2874_v50 = vpop.f32.mrf.mxu0 }
 0x67d   : > { %3002 = vrot.lane.b32.xlu0 %v2874_v50, %s4988_s19  ;;  %v2963_v57 = vpop.f32.mrf.mxu1 }
 0x67e   : > { %v2876_v48 = vpop.f32.mrf.mxu0 }
 0x680   : > { %3004 = vrot.lane.b32.xlu1 %v2876_v48, %s4988_s19 }
 0x685   : > { %v2880_v43 = vpop.f32.mrf.mxu0  ;;  %v2966_v54 = vpop.f32.mrf.mxu1 }
 0x686   : > { %2980 = vrot.lane.b32.xlu1 %v2966_v54, %s4988_s19  ;;  %3006 = vrot.lane.b32.xlu0 %v2880_v43, %s4988_s19 }
 0x687   : > { %v2882_v49 = vpop.f32.mrf.mxu0  ;;  %v2968_v19 = vpop.f32.mrf.mxu1 }
 0x68a   : > { %3008 = vrot.lane.b32.xlu1 %v2882_v49, %s4988_s19 }
 0x6a4   : > { %v6856_v40 = vpop.f32.mrf.mxu1 }
 0x6a5   : > { %v6858_v30 = vpop.f32.mrf.mxu0 }
 0x6a6   : > { %v3224_v46 = vpop.f32.mrf.mxu1 }
 0x6a7   : > { %v6860_v2 = vpop.f32.mrf.mxu0 }
 0x6c9   : > { %v3227_v42 = vpop.f32.mrf.mxu1 }
 0x6ca   : > { %v6862_v29 = vpop.f32.mrf.mxu0 }
 0x6cb   : > { %v3229_v47 = vpop.f32.mrf.mxu1 }
 0x6cc   : > { %v6864_v45 = vpop.f32.mrf.mxu0 }
 0x6cf   : > { %v6866_v21 = vpop.f32.mrf.mxu1 }
 0x6d0   : > { %v6868_v33 = vpop.f32.mrf.mxu0 }
 0x6d1   : > { %v3234_v0 = vpop.f32.mrf.mxu1 }
 0x6d2   : > { %v6870_v27 = vpop.f32.mrf.mxu0 }
 0x6d5   : > { %v6872_v26 = vpop.f32.mrf.mxu1 }
 0x6d6   : > { %v6874_v8 = vpop.f32.mrf.mxu0 }
 0x6d7   : > { %v3239_v24 = vpop.f32.mrf.mxu1 }
 0x6d8   : > { %v6876_v56 = vpop.f32.mrf.mxu0 }
 0x6db   : > { %v3429_v58 = vpop.f32.mrf.mxu1 }
 0x6dc   : > { %v3340_v16 = vpop.f32.mrf.mxu0 }
 0x6dd   : > { %v3431_v32 = vpop.f32.mrf.mxu1 }
 0x6de   : > { %v3342_v22 = vpop.f32.mrf.mxu0  ;;  %v2975_v17 = vpop.permute.xlu1 %2974 }
 0x6df   : > { %v3434_v63 = vpop.f32.mrf.mxu1  ;;  %v2995_v31 = vpop.permute.xlu0 %2994 }
 0x6e0   : > { %3470 = vrot.lane.b32.xlu0 %v3434_v63, %s4989_s20  ;;  %v3346_v9 = vpop.f32.mrf.mxu0 }
 0x6e1   : > { %v3436_v36 = vpop.f32.mrf.mxu1 }
 0x6e2   : > { %v3348_v39 = vpop.f32.mrf.mxu0  ;;  %v2997_v53 = vpop.permute.xlu1 %2996 }
 0x6e3   : > { %3468 = vrot.lane.b32.xlu1 %v3348_v39, %s4989_s20  ;;  %v3439_v52 = vpop.f32.mrf.mxu1  ;;  %v3011_v46 = vsel %vm510_vm5, %v2997_v53, %v2975_v17  ;;  %v3030_v39 = vsel %vm510_vm5, %v2975_v17, %v2995_v31 }
 0x6e4   : > { %3466 = vrot.lane.b32.xlu0 %v3346_v9, %s4989_s20  ;;  %v3352_v25 = vpop.f32.mrf.mxu0  ;;  %v2977_v1 = vpop.permute.xlu0 %2976  ;;  %v3243_v24 = vadd.f32 %v6856_v40, %v3011_v46  ;;  %v3010_v40 = vsel %vm510_vm5, %v2995_v31, %v2997_v53 }
 0x6e5   : > { %v3441_v38 = vpop.f32.mrf.mxu1 }
 0x6e6   : > { %v3354_v61 = vpop.f32.mrf.mxu0 }
 0x6e7   : > { %3476 = vrot.lane.b32.xlu1 %v3439_v52, %s4989_s20  ;;  %v3444_v5 = vpop.f32.mrf.mxu1  ;;  %v2999_v20 = vpop.permute.xlu1 %2998 }
 0x6e8   : > { %3474 = vrot.lane.b32.xlu0 %v3354_v61, %s4989_s20  ;;  %v3358_v59 = vpop.f32.mrf.mxu0  ;;  %v3031_v0 = vsel %vm510_vm5, %v2977_v1, %v2999_v20 }
 0x6e9   : > { %v3446_v3 = vpop.f32.mrf.mxu1  ;;  %v3001_v10 = vpop.permute.xlu0 %3000  ;;  %v3244_v9 = vadd.f32 %v6862_v29, %v3031_v0  ;;  %v3242_v29 = vadd.f32 %v6860_v2, %v3010_v40 }
 0x6ea   : > { %v3360_v41 = vpop.f32.mrf.mxu0  ;;  %v3013_v4 = vsel %vm510_vm5, %v3001_v10, %v2977_v1  ;;  %v3012_v49 = vsel %vm510_vm5, %v2999_v20, %v3001_v10  ;;  %v3241_v3 = vadd.f32 %v6858_v30, %v3030_v39 }
 0x6eb   : > { %3472 = vrot.lane.b32.xlu1 %v3352_v25, %s4989_s20  ;;  %v3246_v15 = vadd.f32 %v3227_v42, %v3013_v4  ;;  %v3245_v47 = vadd.f32 %v6864_v45, %v3012_v49  ;;  %v7596_v49 = vld [vmem:[#allocation5_spill] sm:$0xff] }
 0x6ec   : > { %3482 = vrot.lane.b32.xlu0 %v3444_v5, %s4989_s20 }
 0x6ee   : > { %v6897_v55 = vpop.permute.xlu1 %2978 }
 0x6ef   : > { %3480 = vrot.lane.b32.xlu1 %v3360_v41, %s4989_s20  ;;  %v6899_v51 = vpop.permute.xlu0 %3002 }
 0x6f0   : > { %3478 = vrot.lane.b32.xlu0 %v3358_v59, %s4989_s20 }
 0x6f2   : > { %v3005_v7 = vpop.permute.xlu1 %3004 }
 0x6f3   : > { %3530 = vperm.xlu1 %4959, %v3524_v28   ;;  %v3015_v52 = vsel %vm510_vm5, %v3005_v7, %v6897_v55  ;;  %v3014_v2 = vsel %vm510_vm5, %v6899_v51, %v3005_v7 }
 0x6f4   : > { %3460 = vrot.lane.b32.xlu0 %v3340_v16, %s4989_s20  ;;  %v3249_v59 = vadd.f32 %v6866_v21, %v3015_v52 }
 0x6f7   : > { %3462 = vrot.lane.b32.xlu1 %v3342_v22, %s4989_s20 }
 0x6f8   : > { %3464 = vrot.lane.b32.xlu0 %v3429_v58, %s4989_s20  ;;  %v6901_v62 = vpop.permute.xlu1 %2980  ;;  %v3007_v6 = vpop.permute.xlu0 %3006 }
 0x6fc   : > { %v6904_v23 = vpop.permute.xlu1 %3008 }
 0x6fd   : > { %v3016_v28 = vsel %vm510_vm5, %v3007_v6, %v6904_v23 }
 0x752   : > { %v3471_v34 = vpop.permute.xlu0 %3470 }
 0x755   : > { %v3469_v60 = vpop.permute.xlu1 %3468 }
 0x756   : > { %v3467_v13 = vpop.permute.xlu0 %3466  ;;  %v3487_v42 = vsel %vm930_vm6, %v3469_v60, %v3471_v34 }
 0x757   : > { %v3509_v12 = vsel %vm930_vm6, %v3471_v34, %v3467_v13  ;;  %v3516_v58 = vadd.f32 %v3487_v42, %v3245_v47  ;;  %v3486_v22 = vsel %vm930_vm6, %v3467_v13, %v3469_v60  ;;  %v7595_v34 = vld [vmem:[#allocation6_spill] sm:$0xff]  ;;  %v3251_v13 = vadd.f32 %v6876_v56, %v3016_v28 }
 0x758   : > { %v3517_v18 = vadd.f32 %v3509_v12, %v3246_v15  ;;  %v3515_v25 = vadd.f32 %v3486_v22, %v3244_v9  ;;  %v3248_v56 = vadd.f32 %v6870_v27, %v3014_v2 }
 0x759   : > { %v3477_v57 = vpop.permute.xlu1 %3476  ;;  %v3552_v45 = vadd.f32 %v3536_v11, %v3516_v58  ;;  %v3017_v58 = vsel %vm510_vm5, %v6904_v23, %v6901_v62 }
 0x75a   : > { %v6907_v14 = vadd.f32 %v3536_v11, %v3517_v18  ;;  %v6909_v50 = vpop.permute.xlu0 %3474  ;;  %v3551_v20 = vadd.f32 %v3536_v11, %v3515_v25  ;;  %v3033_v11 = vsel %vm510_vm5, %v6901_v62, %v3007_v6  ;;  %v3032_v6 = vsel %vm510_vm5, %v6897_v55, %v6899_v51 }
 0x75b   : > { %v3564_v17 = vmax.f32 %v3552_v45, 0.0  ;;  %v3489_v46 = vsel %vm930_vm6, %v6909_v50, %v3477_v57  ;;  %v3247_v62 = vadd.f32 %v6868_v33, %v3032_v6  ;;  %v3252_v9 = vadd.f32 %v6872_v26, %v3017_v58 }
 0x75c   : > { %v3563_v12 = vmax.f32 %v3551_v20, 0.0  ;;  %v3519_v27 = vadd.f32 %v3489_v46, %v3248_v56 }
 0x75d   : > { %v3473_v54 = vpop.permute.xlu1 %3472 }
 0x75e   : > { %v6911_v48 = vpop.permute.xlu0 %3482  ;;  %v3510_v5 = vsel %vm930_vm6, %v3477_v57, %v3473_v54  ;;  %v7597_v57 = vld [vmem:[#allocation4_spill] sm:$0xff]  ;;  %v3488_v55 = vsel %vm930_vm6, %v3473_v54, %v6909_v50  ;;  %v3565_v50 = vmax.f32 %v6907_v14, 0.0  ;;  %v3555_v54 = vadd.f32 %v6893_v35, %v3519_v27 }
 0x75f   : > { %v3520_v10 = vadd.f32 %v3510_v5, %v3249_v59 }
 0x760   : > { %v6998_v26 = vmul.f32 %v3565_v50, %v7595_v34  ;;  %v3567_v14 = vmax.f32 %v3555_v54, 0.0 }
 0x761   : > { %v3481_v16 = vpop.permute.xlu1 %3480  ;;  %v3556_v42 = vadd.f32 %v6893_v35, %v3520_v10 }
 0x762   : > { %v6913_v43 = vpop.permute.xlu0 %3478  ;;  %v3491_v30 = vsel %vm930_vm6, %v3481_v16, %v6911_v48 }
 0x763   : > { %v3522_v7 = vadd.f32 %v3491_v30, %v3251_v13  ;;  %v3490_v47 = vsel %vm930_vm6, %v6913_v43, %v3481_v16  ;;  %v3568_v51 = vmax.f32 %v3556_v42, 0.0  ;;  %v3511_v23 = vsel %vm930_vm6, %v6911_v48, %v6913_v43 }
 0x764   : > { %v3523_v43 = vadd.f32 %v3511_v23, %v3252_v9 }
 0x765   : > { %v6990_v33 = vmul.f32 %v3568_v51, %v7595_v34 }
 0x766   : > { %v3461_v19 = vpop.permute.xlu0 %3460 }
 0x76a   : > { %v3465_v32 = vpop.permute.xlu0 %3464 }
 0x76b   : > { %v3508_v63 = vsel %vm930_vm6, %v3465_v32, %v3461_v19 }
 0x76c   : > { %v3514_v36 = vadd.f32 %v3508_v63, %v3243_v24  ;;  %v3250_v24 = vadd.f32 %v6874_v8, %v3033_v11  ;;  %v3558_v8 = vadd.f32 %v6895_v44, %v3522_v7 }
 0x76e   : > { %v3531_v38 = vpop.permute.xlu1 %3530  ;;  %v3521_v63 = vadd.f32 %v3490_v47, %v3250_v24  ;;  %v3570_v48 = vmax.f32 %v3558_v8, 0.0 }
 0x76f   : > { %v3550_v61 = vadd.f32 %v3531_v38, %v3514_v36  ;;  %v3518_v36 = vadd.f32 %v3488_v55, %v3247_v62 }
 0x770   : > { %v3557_v52 = vadd.f32 %v6895_v44, %v3521_v63  ;;  %v7002_v25 = vmul.f32 %v3570_v48, %v7596_v49 }
 0x771   : > { %v3562_v41 = vmax.f32 %v3550_v61, 0.0  ;;  %v3554_v45 = vadd.f32 %v6893_v35, %v3518_v36  ;;  %v7010_v61 = vmul.f32 %v3567_v14, %v7596_v49 }
 0x772   : > { %v3463_v1 = vpop.permute.xlu1 %3462  ;;  %v3569_v40 = vmax.f32 %v3557_v52, 0.0 }
 0x773   : > { %v6935_v4 = vmul.f32 %v3562_v41, %v7595_v34  ;;  %v3484_v53 = vsel %vm930_vm6, %v3461_v19, %v3463_v1  ;;  %v3485_v31 = vsel %vm930_vm6, %v3463_v1, %v3465_v32  ;;  %v6949_v19 = vmul.f32 %v3564_v17, %v7596_v49  ;;  %v4178_v41 = vld [vmem:[%s7460_s9] sm:$0xff] }
 0x774   : > { %v3512_v21 = vadd.f32 %v3484_v53, %v3241_v3  ;;  %v3513_v15 = vadd.f32 %v3485_v31, %v3242_v29  ;;  %v6967_v32 = vmul.f32 %v3563_v12, %v7597_v57  ;;  %v3566_v5 = vmax.f32 %v3554_v45, 0.0 }
 0x775   : > { %3652 = vrot.lane.b32.xlu1 %v6935_v4, %s4987_s18  ;;  %v7013_v59 = vmul.f32 %v3569_v40, %v7597_v57 }
 0x776   : > { %v3548_v60 = vadd.f32 %v3531_v38, %v3512_v21  ;;  %v3549_v18 = vadd.f32 %v3531_v38, %v3513_v15  ;;  %v3559_v38 = vadd.f32 %v6895_v44, %v3523_v43  ;;  %v7020_v35 = vmul.f32 %v3566_v5, %v7597_v57 }
 0x778   : > { %v3561_v0 = vmax.f32 %v3549_v18, 0.0  ;;  %v3560_v22 = vmax.f32 %v3548_v60, 0.0  ;;  %v3571_v3 = vmax.f32 %v3559_v38, 0.0  ;;  %v3700_v38 = vld [vmem:[%s7459_s8] sm:$0xff] }
 0x779   : > { %3656 = vrot.lane.b32.xlu1 %v6949_v19, %s4987_s18 }
 0x77a   : > { %v6970_v16 = vmul.f32 %v3561_v0, %v7596_v49  ;;  %v6987_v39 = vmul.f32 %v3560_v22, %v7597_v57  ;;  %v7023_v44 = vmul.f32 %v3571_v3, %v7595_v34  ;;  %v4556_v3 = vld [vmem:[%s7459_s8 + $0x8] sm:$0xff] }
 0x77c   : > { %3650 = vrot.lane.b32.xlu0 %v6970_v16, %s4987_s18 }
 0x77d   : > { %3654 = vrot.lane.b32.xlu1 %v6967_v32, %s4987_s18 }
 0x780   : > { %3648 = vrot.lane.b32.xlu0 %v6987_v39, %s4987_s18 }
 0x781   : > { %3664 = vrot.lane.b32.xlu1 %v6990_v33, %s4987_s18 }
 0x784   : > { %3658 = vrot.lane.b32.xlu0 %v6998_v26, %s4987_s18 }
 0x785   : > { %3668 = vrot.lane.b32.xlu1 %v7002_v25, %s4987_s18 }
 0x788   : > { %3662 = vrot.lane.b32.xlu0 %v7010_v61, %s4987_s18 }
 0x789   : > { %3666 = vrot.lane.b32.xlu1 %v7013_v59, %s4987_s18 }
 0x78c   : > { %3660 = vrot.lane.b32.xlu0 %v7020_v35, %s4987_s18 }
 0x78d   : > { %3594 = vrot.lane.b32.xlu1 %v7023_v44, %s4986_s17 }
 0x790   : > { %3670 = vrot.lane.b32.xlu0 %v7023_v44, %s4987_s18  ;;  %s5003_s18 = smov 83  }
 0x791   : > { %3618 = vrot.lane.b32.xlu1 %v7010_v61, %s4986_s17 }
 0x794   : > { %3616 = vrot.lane.b32.xlu0 %v7020_v35, %s4986_s17 }
 0x795   : > { %3612 = vrot.lane.b32.xlu1 %v6967_v32, %s4986_s17 }
 0x798   : > { %3592 = vrot.lane.b32.xlu0 %v6990_v33, %s4986_s17 }
 0x799   : > { %3620 = vrot.lane.b32.xlu1 %v7013_v59, %s4986_s17 }
 0x79c   : > { %3614 = vrot.lane.b32.xlu0 %v6949_v19, %s4986_s17 }
 0x79d   : > { %3590 = vrot.lane.b32.xlu1 %v6998_v26, %s4986_s17 }
 0x7a0   : > { %3622 = vrot.lane.b32.xlu0 %v7002_v25, %s4986_s17 }
 0x7a1   : > { %3610 = vrot.lane.b32.xlu1 %v6970_v16, %s4986_s17 }
 0x7a4   : > { %3608 = vrot.lane.b32.xlu0 %v6987_v39, %s4986_s17 }
 0x7a8   : > { %3588 = vrot.lane.b32.xlu0 %v6935_v4, %s4986_s17  ;;  %s5005_s17 = smov 97  }
 0x7ac   : > { %4181 = vperm.xlu0 %4958, %v4178_v41  }
 0x7e7   : > { %v3653_v29 = vpop.permute.xlu1 %3652 }
 0x7eb   : > { %v3657_v28 = vpop.permute.xlu1 %3656 }
 0x7ee   : > { %v3651_v17 = vpop.permute.xlu0 %3650 }
 0x7ef   : > { %v3655_v20 = vpop.permute.xlu1 %3654  ;;  %v7101_v24 = vsel %vm475_vm3, %v3651_v17, %v3653_v29 }
 0x7f0   : > { %v7091_v0 = vsel %vm475_vm3, %v3655_v20, %v3657_v28 }
 0x7f2   : > { %v3649_v1 = vpop.permute.xlu0 %3648 }
 0x7f3   : > { %v3665_v10 = vpop.permute.xlu1 %3664  ;;  %v7096_v6 = vsel %vm475_vm3, %v3653_v29, %v3649_v1  ;;  %v7104_v58 = vsel %vm475_vm3, %v3649_v1, %v3651_v17 }
 0x7f6   : > { %v3659_v34 = vpop.permute.xlu0 %3658 }
 0x7f7   : > { %v3669_v53 = vpop.permute.xlu1 %3668  ;;  %v7083_v7 = vsel %vm475_vm3, %v3659_v34, %v3655_v20  ;;  %v7088_v47 = vsel %vm475_vm3, %v3657_v28, %v3659_v34  ;;  %v4992_v20 = vmov 1966171168  }
 0x7f8   : > { %v4189_v1 = vunpack.c.l.s4 %v4992_v20 }
 0x7fa   : > { %v3663_v31 = vpop.permute.xlu0 %3662 }
 0x7fb   : > { %v3667_v30 = vpop.permute.xlu1 %3666  ;;  %v7075_v49 = vsel %vm475_vm3, %v3663_v31, %v3665_v10 }
 0x7fc   : > { %v7065_v60 = vsel %vm475_vm3, %v3667_v30, %v3669_v53 }
 0x7fe   : > { %v3661_v21 = vpop.permute.xlu0 %3660 }
 0x7ff   : > { %v3595_v15 = vpop.permute.xlu1 %3594  ;;  %v7070_v18 = vsel %vm475_vm3, %v3665_v10, %v3661_v21  ;;  %v7078_v46 = vsel %vm475_vm3, %v3661_v21, %v3663_v31 }
 0x802   : > { %v3671_v2 = vpop.permute.xlu0 %3670 }
 0x803   : > { %v7059_v13 = vsel %vm475_vm3, %v3671_v2, %v3667_v30  ;;  %v3619_v11 = vpop.permute.xlu1 %3618  ;;  %v7062_v12 = vsel %vm475_vm3, %v3669_v53, %v3671_v2  ;;  %v4190_v53 = vunpack.c.0.s8 %v4189_v1 }
 0x804   : > { %3712 = vmatprep.subr.mxu0 %v7062_v12  ;;  %4830 = vmatpush3.msra.mxu1 %v7059_v13 }
 0x805   : > { %3713 = vmatpush1.msra.mxu0 %v7065_v60  ;;  %4831 = vmatprep.subr.mxu1 %v7552_v37 }
 0x806   : > { %v3617_v42 = vpop.permute.xlu0 %3616  ;;  %3714 = vmatprep.subr.mxu0 %v7075_v49  ;;  %4832 = vmatpush3.msra.mxu1 %v7070_v18 }
 0x807   : > { %3715 = vmatpush1.msra.mxu0 %v7078_v46  ;;  %4833 = vmatprep.subr.mxu1 %v7552_v37  ;;  %v3613_v56 = vpop.permute.xlu1 %3612  ;;  %v7143_v9 = vsel %vm462_vm4, %v3617_v42, %v3619_v11 }
 0x808   : > { %3716 = vmatprep.subr.mxu0 %v7088_v47  ;;  %4834 = vmatpush3.msra.mxu1 %v7083_v7 }
 0x809   : > { %3717 = vmatpush1.msra.mxu0 %v7091_v0  ;;  %4835 = vmatprep.subr.mxu1 %v7552_v37 }
 0x80a   : > { %v3593_v57 = vpop.permute.xlu0 %3592  ;;  %3718 = vmatprep.subr.mxu0 %v7101_v24  ;;  %4836 = vmatpush3.msra.mxu1 %v7096_v6 }
 0x80b   : > { %3719 = vmatpush1.msra.mxu0 %v7104_v58  ;;  %4837 = vmatprep.subr.mxu1 %v7552_v37  ;;  %v3621_v27 = vpop.permute.xlu1 %3620  ;;  %v7138_v23 = vsel %vm462_vm4, %v3619_v11, %v3593_v57  ;;  %v7146_v50 = vsel %vm462_vm4, %v3593_v57, %v3617_v42 }
 0x80c   : > { %3720 = vmatprep.subr.mxu0 %v7002_v25  ;;  %4838 = vmatpush3.msra.mxu1 %v7023_v44  ;;  %v7133_v62 = vsel %vm462_vm4, %v3595_v15, %v3621_v27 }
 0x80d   : > { %3721 = vmatpush1.msra.mxu0 %v7013_v59  ;;  %4839 = vmatprep.subr.mxu1 %v7552_v37 }
 0x80e   : > { %v3615_v22 = vpop.permute.xlu0 %3614  ;;  %3722 = vmatprep.subr.mxu0 %v7010_v61  ;;  %4840 = vmatpush3.msra.mxu1 %v6990_v33 }
 0x80f   : > { %3723 = vmatpush1.msra.mxu0 %v7020_v35  ;;  %4841 = vmatprep.subr.mxu1 %v7552_v37  ;;  %v3591_v55 = vpop.permute.xlu1 %3590  ;;  %v7156_v48 = vsel %vm462_vm4, %v3613_v56, %v3615_v22 }
 0x810   : > { %3724 = vmatprep.subr.mxu0 %v6949_v19  ;;  %4842 = vmatpush3.msra.mxu1 %v6998_v26  ;;  %v7151_v36 = vsel %vm462_vm4, %v3615_v22, %v3591_v55  ;;  %v7159_v43 = vsel %vm462_vm4, %v3591_v55, %v3613_v56 }
 0x811   : > { %3725 = vmatpush1.msra.mxu0 %v6967_v32  ;;  %4843 = vmatprep.subr.mxu1 %v7552_v37 }
 0x812   : > { %v3623_v51 = vpop.permute.xlu0 %3622  ;;  %3726 = vmatprep.subr.mxu0 %v6970_v16  ;;  %4844 = vmatpush3.msra.mxu1 %v6935_v4 }
 0x813   : > { %v7125_v8 = vsel %vm462_vm4, %v3623_v51, %v3595_v15  ;;  %3727 = vmatpush1.msra.mxu0 %v6987_v39  ;;  %4845 = vmatprep.subr.mxu1 %v7552_v37  ;;  %v7130_v63 = vsel %vm462_vm4, %v3621_v27, %v3623_v51  ;;  %v3611_v52 = vpop.permute.xlu1 %3610 }
 0x814   : > { %3728 = vmatprep.subr.mxu0 %v7130_v63  ;;  %4846 = vmatpush3.msra.mxu1 %v7125_v8 }
 0x815   : > { %3729 = vmatpush1.msra.mxu0 %v7133_v62  ;;  %4847 = vmatprep.subr.mxu1 %v7552_v37 }
 0x816   : > { %v3609_v54 = vpop.permute.xlu0 %3608  ;;  %3730 = vmatprep.subr.mxu0 %v7143_v9  ;;  %4848 = vmatpush3.msra.mxu1 %v7138_v23 }
 0x817   : > { %3731 = vmatpush1.msra.mxu0 %v7146_v50  ;;  %4849 = vmatprep.subr.mxu1 %v7552_v37  ;;  %v7165_v14 = vsel %vm462_vm4, %v3609_v54, %v3611_v52 }
 0x818   : > { %3732 = vmatprep.subr.mxu0 %v7156_v48  ;;  %4850 = vmatpush3.msra.mxu1 %v7151_v36 }
 0x819   : > { %3733 = vmatpush1.msra.mxu0 %v7159_v43  ;;  %4851 = vmatprep.subr.mxu1 %v7552_v37 }
 0x81a   : > { %v3589_v45 = vpop.permute.xlu0 %3588  ;;  %3734 = vmatprep.subr.mxu0 %v7165_v14 }
 0x81b   : > { %v7173_v40 = vsel %vm462_vm4, %v3611_v52, %v3589_v45  ;;  %v7176_v5 = vsel %vm462_vm4, %v3589_v45, %v3609_v54 }
 0x81c   : > { %3735 = vmatpush1.msra.mxu0 %v7176_v5  ;;  %4852 = vmatpush3.msra.mxu1 %v7173_v40 }
 0x81d   : > { %4554 = vmatmul.mubr.msk.f32.vlgmr.msra.gmra.mxu0 %vm1350_vm7, %v3700_v38  ;;  %4854 = vmatmul.mubr.msk.f32.vlgmr.msra.gmra.mxu1 %vm1350_vm7, %v3700_v38 }
 0x81e   : > { %3877 = vmatprep.subr.mxu0 %v7062_v12  ;;  %4856 = vmatprep.subr.mxu1 %v7552_v37 }
 0x81f   : > { %3878 = vmatpush1.msra.mxu0 %v7065_v60  ;;  %4857 = vmatpush3.msra.mxu1 %v7059_v13 }
 0x820   : > { %3879 = vmatprep.subr.mxu0 %v7075_v49  ;;  %4858 = vmatprep.subr.mxu1 %v7552_v37 }
 0x821   : > { %3880 = vmatpush1.msra.mxu0 %v7078_v46  ;;  %4859 = vmatpush3.msra.mxu1 %v7070_v18 }
 0x822   : > { %3881 = vmatprep.subr.mxu0 %v7088_v47  ;;  %4860 = vmatprep.subr.mxu1 %v7552_v37 }
 0x823   : > { %3882 = vmatpush1.msra.mxu0 %v7091_v0  ;;  %4861 = vmatpush3.msra.mxu1 %v7083_v7 }
 0x824   : > { %3883 = vmatprep.subr.mxu0 %v7101_v24  ;;  %4862 = vmatprep.subr.mxu1 %v7552_v37 }
 0x825   : > { %3884 = vmatpush1.msra.mxu0 %v7104_v58  ;;  %4863 = vmatpush3.msra.mxu1 %v7096_v6 }
 0x826   : > { %3885 = vmatprep.subr.mxu0 %v7002_v25  ;;  %4864 = vmatprep.subr.mxu1 %v7552_v37 }
 0x827   : > { %3886 = vmatpush1.msra.mxu0 %v7013_v59  ;;  %4865 = vmatpush3.msra.mxu1 %v7023_v44  ;;  %v4182_v29 = vpop.permute.xlu0 %4181 }
 0x828   : > { %3887 = vmatprep.subr.mxu0 %v7010_v61  ;;  %4866 = vmatprep.subr.mxu1 %v7552_v37 }
 0x829   : > { %3888 = vmatpush1.msra.mxu0 %v7020_v35  ;;  %4867 = vmatpush3.msra.mxu1 %v6990_v33 }
 0x82a   : > { %3889 = vmatprep.subr.mxu0 %v6949_v19  ;;  %4868 = vmatprep.subr.mxu1 %v7552_v37 }
 0x82b   : > { %3890 = vmatpush1.msra.mxu0 %v6967_v32  ;;  %4869 = vmatpush3.msra.mxu1 %v6998_v26 }
 0x82c   : > { %3891 = vmatprep.subr.mxu0 %v6970_v16  ;;  %4870 = vmatprep.subr.mxu1 %v7552_v37 }
 0x82d   : > { %3892 = vmatpush1.msra.mxu0 %v6987_v39  ;;  %4871 = vmatpush3.msra.mxu1 %v6935_v4 }
 0x82e   : > { %3893 = vmatprep.subr.mxu0 %v7130_v63  ;;  %4872 = vmatprep.subr.mxu1 %v7552_v37 }
 0x82f   : > { %3894 = vmatpush1.msra.mxu0 %v7133_v62  ;;  %4873 = vmatpush3.msra.mxu1 %v7125_v8 }
 0x830   : > { %3895 = vmatprep.subr.mxu0 %v7143_v9  ;;  %4874 = vmatprep.subr.mxu1 %v7552_v37 }
 0x831   : > { %3896 = vmatpush1.msra.mxu0 %v7146_v50  ;;  %4875 = vmatpush3.msra.mxu1 %v7138_v23 }
 0x832   : > { %3897 = vmatprep.subr.mxu0 %v7156_v48  ;;  %4876 = vmatprep.subr.mxu1 %v7552_v37 }
 0x833   : > { %3898 = vmatpush1.msra.mxu0 %v7159_v43  ;;  %4877 = vmatpush3.msra.mxu1 %v7151_v36 }
 0x834   : > { %3899 = vmatprep.subr.mxu0 %v7165_v14  ;;  %4878 = vmatprep.subr.mxu1 %v7552_v37 }
 0x835   : > { %3900 = vmatpush1.msra.mxu0 %v7176_v5  ;;  %4879 = vmatpush3.msra.mxu1 %v7173_v40 }
 0x836   : > { %3933 = vmatprep.mubr.f32.mxu0 %v7552_v37  ;;  %4880 = vmatprep.mubr.msk.f32.mxu1 %vm4991_vm9, %v7552_v37 }
 0x837   : > { %4026 = vmatprep.subr.mxu0 %v7062_v12  ;;  %4883 = vmatprep.subr.mxu1 %v7552_v37  ;;  %v7598_v12 = vld [vmem:[#allocation3_spill] sm:$0xff] }
 0x838   : > { %4557 = vmatmul.mubr.msk.f32.vlgmr.msra.gmra.mxu0 %vm1350_vm7, %v4556_v3  ;;  %4881 = vmatmul.mubr.msk.f32.vlgmr.msra.gmra.mxu1 %vm1350_vm7, %v4556_v3 }
 0x839   : > { %4027 = vmatpush1.msra.mxu0 %v7065_v60  ;;  %4884 = vmatpush3.msra.mxu1 %v7059_v13  ;;  %v4193_v60 = vsub.s32 %v4190_v53, %v7598_v12 }
 0x83a   : > { %4028 = vmatprep.subr.mxu0 %v7075_v49  ;;  %4885 = vmatprep.subr.mxu1 %v7552_v37 }
 0x83b   : > { %4029 = vmatpush1.msra.mxu0 %v7078_v46  ;;  %4886 = vmatpush3.msra.mxu1 %v7070_v18 }
 0x83c   : > { %4030 = vmatprep.subr.mxu0 %v7088_v47  ;;  %4887 = vmatprep.subr.mxu1 %v7552_v37 }
 0x83d   : > { %4031 = vmatpush1.msra.mxu0 %v7091_v0  ;;  %4888 = vmatpush3.msra.mxu1 %v7083_v7 }
 0x83e   : > { %4032 = vmatprep.subr.mxu0 %v7101_v24  ;;  %4889 = vmatprep.subr.mxu1 %v7552_v37 }
 0x83f   : > { %4033 = vmatpush1.msra.mxu0 %v7104_v58  ;;  %4890 = vmatpush3.msra.mxu1 %v7096_v6 }
 0x840   : > { %4034 = vmatprep.subr.mxu0 %v7002_v25  ;;  %4891 = vmatprep.subr.mxu1 %v7552_v37 }
 0x841   : > { %4035 = vmatpush1.msra.mxu0 %v7013_v59  ;;  %4892 = vmatpush3.msra.mxu1 %v7023_v44 }
 0x842   : > { %4036 = vmatprep.subr.mxu0 %v7010_v61  ;;  %4893 = vmatprep.subr.mxu1 %v7552_v37 }
 0x843   : > { %4037 = vmatpush1.msra.mxu0 %v7020_v35  ;;  %4894 = vmatpush3.msra.mxu1 %v6990_v33 }
 0x844   : > { %4038 = vmatprep.subr.mxu0 %v6949_v19  ;;  %4895 = vmatprep.subr.mxu1 %v7552_v37 }
 0x845   : > { %4039 = vmatpush1.msra.mxu0 %v6967_v32  ;;  %4896 = vmatpush3.msra.mxu1 %v6998_v26 }
 0x846   : > { %4040 = vmatprep.subr.mxu0 %v6970_v16  ;;  %4897 = vmatprep.subr.mxu1 %v7552_v37 }
 0x847   : > { %4041 = vmatpush1.msra.mxu0 %v6987_v39  ;;  %4898 = vmatpush3.msra.mxu1 %v6935_v4  ;;  %v4559_v4 = vld [vmem:[%s7459_s8 + $0x10] sm:$0xff] }
 0x848   : > { %4042 = vmatprep.subr.mxu0 %v7130_v63  ;;  %4899 = vmatprep.subr.mxu1 %v7552_v37 }
 0x849   : > { %4043 = vmatpush1.msra.mxu0 %v7133_v62  ;;  %4900 = vmatpush3.msra.mxu1 %v7125_v8 }
 0x84a   : > { %4044 = vmatprep.subr.mxu0 %v7143_v9  ;;  %4901 = vmatprep.subr.mxu1 %v7552_v37 }
 0x84b   : > { %4045 = vmatpush1.msra.mxu0 %v7146_v50  ;;  %4902 = vmatpush3.msra.mxu1 %v7138_v23  ;;  %v7599_v50 = vlaneseq }
 0x84c   : > { %4046 = vmatprep.subr.mxu0 %v7156_v48  ;;  %4903 = vmatprep.subr.mxu1 %v7552_v37 }
 0x84d   : > { %4047 = vmatpush1.msra.mxu0 %v7159_v43  ;;  %4904 = vmatpush3.msra.mxu1 %v7151_v36  ;;  %vm4207_vm10 = vcmp.lt.s32.totalorder %v7599_v50, 16  ;;  %vm7315_vm11 = vcmp.ge.s32.totalorder %v7599_v50, 16  ;;  %vm7320_vm12 = vcmp.lt.s32.totalorder %v7599_v50, 32  ;;  %vm7330_vm14 = vcmp.ge.s32.totalorder %v7599_v50, 32 }
 0x84e   : > { %4048 = vmatprep.subr.mxu0 %v7165_v14  ;;  %4905 = vmatprep.subr.mxu1 %v7552_v37  ;;  %vm4215_vm13 = vmand %vm7315_vm11, %vm7320_vm12  ;;  %vm7335_vm15 = vcmp.lt.s32.totalorder %v7599_v50, 48  ;;  %vm7348_vm1 = vcmp.ge.s32.totalorder %v7599_v50, 48  ;;  %vm7353_vm2 = vcmp.lt.s32.totalorder %v7599_v50, 64  ;;  %vm7358_vm3 = vcmp.ge.s32.totalorder %v7599_v50, 64 }
 0x84f   : > { %4049 = vmatpush1.msra.mxu0 %v7176_v5  ;;  %4082 = vmatprep.mubr.f32.mxu0 %v7552_v37  ;;  %vm4222_vm0 = vmand %vm7330_vm14, %vm7335_vm15  ;;  %vm7363_vm4 = vcmp.lt.s32.totalorder %v7599_v50, 80  ;;  %vm7409_vm11 = vcmp.lt.s32.totalorder %v7599_v50, 112  ;;  %vm7414_vm12 = vcmp.ge.s32.totalorder %v7599_v50, 112  ;;  %vm4264_vm14 = vcmask 793600  }
 0x850   : > { %4906 = vmatpush3.msra.mxu1 %v7173_v40  ;;  %4560 = vmatmul.mubr.msk.f32.vlgmr.msra.gmra.mxu0 %vm1350_vm7, %v4559_v4  ;;  %vm4236_vm8 = vmand %vm7358_vm3, %vm7363_vm4  ;;  %vm4331_vm15 = vcmask 678912  }
 0x851   : > { %4907 = vmatprep.mubr.msk.f32.mxu1 %vm4991_vm9, %v7552_v37 }
 0x852   : > { %4908 = vmatmul.mubr.msk.f32.vlgmr.msra.gmra.mxu1 %vm1350_vm7, %v4559_v4  ;;  %vm4229_vm7 = vmand %vm7348_vm1, %vm7353_vm2 }
 0x8dd   : > { %v3770_v19 = vpop.f32.mrf.mxu0  ;;  %v3841_v32 = vpop.f32.mrf.mxu1 }
 0x8de   : > { %3846 = vrot.lane.b32.xlu1 %v3841_v32, %s4988_s19  ;;  %3851 = vrot.lane.b32.xlu0 %v3770_v19, %s4988_s19 }
 0x8df   : > { %v4855_v16 = vpop.f32.mrf.mxu1  ;;  %v3772_v39 = vpop.f32.mrf.mxu0 }
 0x8e2   : > { %3853 = vrot.lane.b32.xlu1 %v3772_v39, %s4988_s19  ;;  %s4993_s19 = smov 109  }
 0x8f8   : > { %v4006_v33 = vpop.f32.mrf.mxu1  ;;  %v3935_v25 = vpop.f32.mrf.mxu0 }
 0x8fa   : > { %v4882_v26 = vpop.f32.mrf.mxu1  ;;  %v3937_v61 = vpop.f32.mrf.mxu0 }
 0x910   : > { %v4084_v59 = vpop.f32.mrf.mxu0 }
 0x911   : > { %4162 = vrot.lane.b32.xlu1 %v4084_v59, %s4989_s20 }
 0x912   : > { %v4086_v37 = vpop.f32.mrf.mxu0  ;;  %v4155_v35 = vpop.f32.mrf.mxu1 }
 0x913   : > { %4164 = vrot.lane.b32.xlu0 %v4086_v37, %s4989_s20 }
 0x914   : > { %v4909_v44 = vpop.f32.mrf.mxu1 }
 0x915   : > { %4166 = vrot.lane.b32.xlu1 %v4155_v35, %s4989_s20  ;;  %s4994_s20 = smov 81  }
 0x950   : > { %v3847_v41 = vpop.permute.xlu1 %3846  ;;  %v3852_v28 = vpop.permute.xlu0 %3851 }
 0x951   : > { %v3860_v10 = vsel %vm510_vm5, %v3847_v41, %v3852_v28 }
 0x952   : > { %v4010_v21 = vadd.f32 %v3935_v25, %v3860_v10 }
 0x954   : > { %v3854_v17 = vpop.permute.xlu1 %3853 }
 0x955   : > { %v3855_v31 = vsel %vm510_vm5, %v3852_v28, %v3854_v17  ;;  %v3856_v30 = vsel %vm510_vm5, %v3854_v17, %v3847_v41  ;;  %vm7369_vm5 = vcmp.ge.s32.totalorder %v7599_v50, 80 }
 0x956   : > { %v4011_v13 = vadd.f32 %v3937_v61, %v3855_v31  ;;  %v4012_v11 = vadd.f32 %v4006_v33, %v3856_v30 }
 0x983   : > { %v4163_v34 = vpop.permute.xlu1 %4162 }
 0x985   : > { %v4165_v15 = vpop.permute.xlu0 %4164 }
 0x986   : > { %v4168_v2 = vsel %vm930_vm6, %v4163_v34, %v4165_v15 }
 0x987   : > { %v4175_v18 = vadd.f32 %v4168_v2, %v4010_v21  ;;  %v4167_v49 = vpop.permute.xlu1 %4166 }
 0x988   : > { %v4169_v46 = vsel %vm930_vm6, %v4165_v15, %v4167_v49  ;;  %v4174_v42 = vsel %vm930_vm6, %v4167_v49, %v4163_v34  ;;  %vm7374_vm6 = vcmp.lt.s32.totalorder %v7599_v50, 96 }
 0x989   : > { %v4184_v7 = vadd.f32 %v4182_v29, %v4175_v18  ;;  %v4176_v56 = vadd.f32 %v4169_v46, %v4011_v13  ;;  %v4177_v47 = vadd.f32 %v4174_v42, %v4012_v11  ;;  %vm4243_vm9 = vmand %vm7369_vm5, %vm7374_vm6 }
 0x98b   : > { %v4194_v0 = vrot.slane %v4184_v7, %v4193_v60  ;;  %v4186_v6 = vadd.f32 %v4182_v29, %v4177_v47  ;;  %v4185_v24 = vadd.f32 %v4182_v29, %v4176_v56 }
 0x98d   : > { %v4201_v58 = vrot.slane %v4194_v0, %v4193_v60  ;;  %v4341_v57 = vrot.slane %v4186_v6, %v4193_v60  ;;  %v4277_v27 = vrot.slane %v4185_v24, %v4193_v60  ;;  %v4313_v51 = vcombine.low %v4185_v24, %v4186_v6 }
 0x98e   : > { %v4246_v8 = vcombine.low %v4184_v7, %v4185_v24 }
 0x98f   : > { %4202 = vrot.lane.b32.xlu0 %v4201_v58, %s4993_s19  ;;  %v4348_v22 = vrot.slane %v4341_v57, %v4193_v60  ;;  %v4284_v55 = vrot.slane %v4277_v27, %v4193_v60  ;;  %v4320_v63 = vrot.slane %v4313_v51, %v4193_v60 }
 0x990   : > { %v4253_v23 = vrot.slane %v4246_v8, %v4193_v60 }
 0x991   : > { %4349 = vrot.lane.b32.xlu1 %v4348_v22, %s4994_s20  ;;  %v4327_v62 = vrot.slane %v4320_v63, %v4193_v60  ;;  %s7311_s20 = scalar_lea.vmem %s7461_s10, %s4417_s25 }
 0x992   : > { %v4260_v9 = vrot.slane %v4253_v23, %v4193_v60 }
 0x993   : > { %4210 = vrot.lane.b32.xlu0 %v4201_v58, %s4995_s27 }
 0x995   : > { %4292 = vrot.lane.b32.xlu1 %v4284_v55, %s4996_s28 }
 0x997   : > { %4217 = vrot.lane.b32.xlu0 %v4201_v58, %s4997_s29 }
 0x999   : > { %4296 = vrot.lane.b32.xlu1 %v4284_v55, %s4998_s30 }
 0x99b   : > { %4231 = vrot.lane.b32.xlu0 %v4201_v58, %s4999_s11 }
 0x99d   : > { %4300 = vrot.lane.b32.xlu1 %v4284_v55, %s5000_s12 }
 0x99f   : > { %4238 = vrot.lane.b32.xlu0 %v4201_v58, %s5001_s15 }
 0x9a1   : > { %4224 = vrot.lane.b32.xlu1 %v4201_v58, %s5002_s16 }
 0x9a3   : > { %4328 = vrot.lane.b32.xlu0 %v4327_v62, %s5003_s18 }
 0x9a5   : > { %4304 = vrot.lane.b32.xlu1 %v4284_v55, %s5004_s21 }
 0x9a7   : > { %4261 = vrot.lane.b32.xlu0 %v4260_v9, %s5005_s17 }
 0x9a9   : > { %4308 = vrot.lane.b32.xlu1 %v4284_v55, %s5006_s22 }
 0x9ab   : > { %4285 = vrot.lane.b32.xlu0 %v4284_v55, %s5007_s23 }
 0x9ad   : > { %4353 = vrot.lane.b32.xlu1 %v4348_v22, %s5008_s24 }
 0xa01   : > { %v4203_v48 = vpop.permute.xlu0 %4202 }
 0xa02   : > { %4209 = vst.msk [vmem:[%s7311_s20] sm:$0x1] %vm4207_vm10, %v4203_v48 }
 0xa03   : > { %v4350_v43 = vpop.permute.xlu1 %4349 }
 0xa05   : > { %v4211_v45 = vpop.permute.xlu0 %4210 }
 0xa06   : > { %4216 = vst.msk [vmem:[%s7311_s20] sm:$0x1] %vm4215_vm13, %v4211_v45 }
 0xa07   : > { %v4293_v38 = vpop.permute.xlu1 %4292 }
 0xa08   : > { %4295 = vst.msk [vmem:[%s7311_s20 + $0x1] sm:$0x1] %vm4207_vm10, %v4293_v38  ;;  %vm7404_vm10 = vcmp.ge.s32.totalorder %v7599_v50, 96 }
 0xa09   : > { %v4218_v40 = vpop.permute.xlu0 %4217 }
 0xa0a   : > { %4223 = vst.msk [vmem:[%s7311_s20] sm:$0x1] %vm4222_vm0, %v4218_v40 }
 0xa0b   : > { %v4297_v5 = vpop.permute.xlu1 %4296 }
 0xa0c   : > { %4299 = vst.msk [vmem:[%s7311_s20 + $0x1] sm:$0x1] %vm4215_vm13, %v4297_v5  ;;  %vm7419_vm13 = vcmp.lt.s32.totalorder %v7599_v50, 128 }
 0xa0d   : > { %v4232_v3 = vpop.permute.xlu0 %4231  ;;  %vm4290_vm1 = vmand %vm7414_vm12, %vm7419_vm13 }
 0xa0f   : > { %v4301_v32 = vpop.permute.xlu1 %4300 }
 0xa10   : > { %4303 = vst.msk [vmem:[%s7311_s20 + $0x1] sm:$0x1] %vm4222_vm0, %v4301_v32  ;;  %vm4269_vm0 = vmand %vm7404_vm10, %vm7409_vm11 }
 0xa11   : > { %v4239_v33 = vpop.permute.xlu0 %4238 }
 0xa13   : > { %v4225_v61 = vpop.permute.xlu1 %4224 }
 0xa14   : > { %4230 = vst.msk [vmem:[%s7311_s20] sm:$0x1] %vm4229_vm7, %v4225_v61 }
 0xa15   : > { %v4329_v59 = vpop.permute.xlu0 %4328  ;;  %4237 = vst.msk [vmem:[%s7311_s20] sm:$0x1] %vm4236_vm8, %v4232_v3 }
 0xa16   : > { %4244 = vst.msk [vmem:[%s7311_s20] sm:$0x1] %vm4243_vm9, %v4239_v33  ;;  %v4330_v28 = vrot.slane %v4329_v59, 1 }
 0xa17   : > { %v4305_v44 = vpop.permute.xlu1 %4304 }
 0xa18   : > { %4307 = vst.msk [vmem:[%s7311_s20 + $0x1] sm:$0x1] %vm4229_vm7, %v4305_v44  ;;  %v4332_v34 = vsel %vm4331_vm15, %v4329_v59, %v4330_v28 }
 0xa19   : > { %v4262_v17 = vpop.permute.xlu0 %4261 }
 0xa1a   : > { %v4263_v20 = vrot.slane %v4262_v17, 1 }
 0xa1b   : > { %v4309_v10 = vpop.permute.xlu1 %4308 }
 0xa1c   : > { %v4265_v1 = vsel %vm4264_vm14, %v4262_v17, %v4263_v20  ;;  %4311 = vst.msk [vmem:[%s7311_s20 + $0x1] sm:$0x1] %vm4236_vm8, %v4309_v10 }
 0xa1d   : > { %4270 = vst.msk [vmem:[%s7311_s20] sm:$0x1] %vm4269_vm0, %v4265_v1  ;;  %v4286_v53 = vpop.permute.xlu0 %4285 }
 0xa1e   : > { %4334 = vst.msk [vmem:[%s7311_s20 + $0x1] sm:$0x1] %vm4243_vm9, %v4332_v34 }
 0xa1f   : > { %4291 = vst.msk [vmem:[%s7311_s20] sm:$0x1] %vm4290_vm1, %v4286_v53  ;;  %v4354_v31 = vpop.permute.xlu1 %4353 }
 0xa20   : > { %4352 = vst.msk [vmem:[%s7311_s20 + $0x1] sm:$0x1] %vm4269_vm0, %v4350_v43 }
 0xa21   : > { %4356 = vst.msk [vmem:[%s7311_s20 + $0x1] sm:$0x1] %vm4290_vm1, %v4354_v31 }
 0xa22 PF: > { %s20_s13 = sadd.s32 1, %s4967_s13  }
 0xa23   : > { %p17_p4 = scmp.ge.s32.totalorder %s20_s13, 4  }
 0xa25   :  { %19 = sbr.rel (!%p17_p4) target bundleno = 1 (0x1), region = 98 }

</bundles_post_ra>
